<compile_context>
chip_gen: v7x
topology: tpu7x:2x2x1
jax: 0.10.0
libtpu: 0.0.40
codegen_flags: <defaults>
</compile_context>

<pallas_src>
import jax
import jax.numpy as jnp
from jax.experimental import pallas as pl
from jax.experimental.pallas import tpu as pltpu

INPUT_DIM = 3
HIDDEN_DIM = 64
OUTPUT_DIM = 1
LANES = 128               # vreg lane width; batch is laid out on lanes
PALLAS_MIN_BATCH = 8192   # crossover vs. fused XLA expr (re-benchmark per generation)


def _round_up(n, m):
    return ((n + m - 1) // m) * m


def mlp_kernel(x_ref, w1_ref, b1_ref, w2_ref, b2_ref, o_ref):
    # x_ref : (INPUT_DIM, tr, 128) VMEM  -- batch on (sublanes, lanes), lane-dense
    # w1_ref: (INPUT_DIM, HIDDEN_DIM) f32 in SMEM (scalar reads)
    # b1_ref: (HIDDEN_DIM,)  w2_ref: (HIDDEN_DIM,)  b2_ref: (1,)   all SMEM
    # o_ref : (tr, 128) VMEM -- lane-dense output slab
    x0 = x_ref[0]                      # (tr, 128)
    x1 = x_ref[1]
    x2 = x_ref[2]
    # fold the fc2 bias into the accumulator init
    acc = jnp.full_like(x0, b2_ref[0])
    # unrolled scalar-weight loop over the 64 hidden units: all work stays on
    # the VPU (splat-FMA + max), SMEM scalar loads ride the free scalar slots.
    for j in range(HIDDEN_DIM):
        h = x0 * w1_ref[0, j] + x1 * w1_ref[1, j] + (x2 * w1_ref[2, j] + b1_ref[j])
        acc = acc + jnp.maximum(h, 0.0) * w2_ref[j]
    o_ref[...] = acc.astype(o_ref.dtype)


def _pick_tile_rows(rows, block_rows):
    """rows-of-128 per grid step: multiple of 8 sublanes, capped at block_rows,
    and split so the grid keeps >= 2 steps when the input allows (v7x megacore)."""
    rows8 = _round_up(max(rows, 1), 8)
    tr = min(_round_up(block_rows, 8), rows8)
    if rows8 > 8 and rows8 <= tr:          # would collapse to a single grid step
        tr = _round_up(-(-rows8 // 2), 8)  # split roughly in half
    return tr


def calculator_model_forward_pallas(x, w1, b1, w2, b2, *, block_rows=64):
    """Pallas TPU forward of CalculatorModel: relu(x @ w1 + b1) @ w2 + b2.

    w1 is (INPUT_DIM, HIDDEN_DIM) (pre-transposed vs. nn.Linear storage),
    b1 is (1, HIDDEN_DIM), w2 is (HIDDEN_DIM, OUTPUT_DIM), b2 is (1, OUTPUT_DIM).
    """
    assert OUTPUT_DIM == 1, "kernel flattens w2; only OUTPUT_DIM == 1 is supported"
    B = x.shape[0]

    rows = pl.cdiv(B, LANES)                      # rows of 128 batch elements
    tr = _pick_tile_rows(rows, block_rows)        # rows-of-128 per grid step
    rows_pad = _round_up(_round_up(rows, 8), tr)
    b_pad = rows_pad * LANES

    # Single fused layout expression: pad batch, put batch on the minor (lane)
    # axis.  Element (k, r, l) = x[r*128 + l, k]; padded rows are sliced off.
    xt = jnp.pad(x, ((0, b_pad - B), (0, 0))).T.reshape(INPUT_DIM, rows_pad, LANES)

    # Flatten the tiny parameter tensors for SMEM residence.
    w1s = w1.astype(jnp.float32)                       # (3, 64)
    b1s = b1.reshape(-1).astype(jnp.float32)           # (64,)
    w2s = w2.reshape(-1).astype(jnp.float32)           # (64,)  (valid since OUTPUT_DIM==1)
    b2s = b2.reshape(-1).astype(jnp.float32)           # (1,)

    smem = pl.BlockSpec(memory_space=pltpu.MemorySpace.SMEM)

    out = pl.pallas_call(
        mlp_kernel,
        out_shape=jax.ShapeDtypeStruct((rows_pad, LANES), jnp.float32),
        grid_spec=pltpu.PrefetchScalarGridSpec(
            num_scalar_prefetch=0,
            grid=(rows_pad // tr,),
            in_specs=[
                pl.BlockSpec((INPUT_DIM, tr, LANES), lambda i: (0, i, 0)),
                smem,   # w1  (3, 64)
                smem,   # b1  (64,)
                smem,   # w2  (64,)
                smem,   # b2  (1,)
            ],
            out_specs=pl.BlockSpec((tr, LANES), lambda i: (i, 0)),
        ),
        compiler_params=pltpu.CompilerParams(
            # batch tiles are independent; lets v7x's two TCs split the grid.
            # Measured no-op on single-TC v5e/v6e (serial grid loop there).
            dimension_semantics=("parallel",),
        ),
    )(xt, w1s, b1s, w2s, b2s)

    return out.reshape(b_pad, 1)[:B]


def calculator_model_forward(x, w1, b1, w2, b2, *, block_rows=64):
    """Dispatcher: the whole forward is ~1.5 KFLOP/row, so below the crossover
    the XLA-fused expression beats custom-call overhead (threshold is a rough
    per-generation estimate; re-benchmark on the target chip)."""
    if x.shape[0] < PALLAS_MIN_BATCH:
        return jnp.maximum(x @ w1 + b1, 0.0) @ w2 + b2
    return calculator_model_forward_pallas(x, w1, b1, w2, b2, block_rows=block_rows)


def init_params(key):
    """Deterministic init mirroring nn.Linear's U(-1/sqrt(fan_in), 1/sqrt(fan_in))."""
    k1, k2, k3, k4 = jax.random.split(key, 4)
    bound1 = 1.0 / jnp.sqrt(INPUT_DIM)
    bound2 = 1.0 / jnp.sqrt(HIDDEN_DIM)
    w1 = jax.random.uniform(k1, (INPUT_DIM, HIDDEN_DIM), jnp.float32, -bound1, bound1)
    b1 = jax.random.uniform(k2, (1, HIDDEN_DIM), jnp.float32, -bound1, bound1)
    w2 = jax.random.uniform(k3, (HIDDEN_DIM, OUTPUT_DIM), jnp.float32, -bound2, bound2)
    b2 = jax.random.uniform(k4, (1, OUTPUT_DIM), jnp.float32, -bound2, bound2)
    return w1, b1, w2, b2


def _ref_forward(x, w1, b1, w2, b2):
    h = jnp.maximum(jnp.dot(x, w1, precision=jax.lax.Precision.HIGHEST) + b1, 0.0)
    return jnp.dot(h, w2, precision=jax.lax.Precision.HIGHEST) + b2


if __name__ == "__main__":
    key = jax.random.PRNGKey(0)
    k_params, k_x1, k_x2 = jax.random.split(key, 3)
    w1, b1, w2, b2 = init_params(k_params)

    # 1) small, non-multiple-of-8 batch -> single grid step, heavy lane padding.
    x_small = jax.random.normal(k_x1, (20, INPUT_DIM), dtype=jnp.float32)
    out_small = jax.block_until_ready(
        calculator_model_forward_pallas(x_small, w1, b1, w2, b2))
    ref_small = _ref_forward(x_small, w1, b1, w2, b2)
    assert out_small.shape == (20, OUTPUT_DIM)
    assert jnp.allclose(out_small, ref_small, atol=1e-4, rtol=1e-4)

    # 2) larger batch -> multi-step grid (exercises tiling, tail padding, and
    #    the >=2-step split used for v7x megacore sharding).
    x_big = jax.random.normal(k_x2, (3000, INPUT_DIM), dtype=jnp.float32)
    out_big = jax.block_until_ready(
        calculator_model_forward_pallas(x_big, w1, b1, w2, b2))
    ref_big = _ref_forward(x_big, w1, b1, w2, b2)
    assert out_big.shape == (3000, OUTPUT_DIM)
    assert jnp.allclose(out_big, ref_big, atol=1e-4, rtol=1e-4)

    # 3) dispatcher coverage (small batch routes to the fused XLA expression).
    out_disp = jax.block_until_ready(calculator_model_forward(x_small, w1, b1, w2, b2))
    assert jnp.allclose(out_disp, ref_small, atol=1e-4, rtol=1e-4)

    print("KERNEL_OK")
</pallas_src>

<mosaic_0001>
module attributes {stable_mosaic.version = 11 : i64} {
  func.func @mlp_kernel(%arg0: i32, %arg1: memref<3x8x128xf32, #tpu.memory_space<vmem>>, %arg2: memref<3x64xf32, #tpu.memory_space<smem>>, %arg3: memref<64xf32, #tpu.memory_space<smem>>, %arg4: memref<64xf32, #tpu.memory_space<smem>>, %arg5: memref<1xf32, #tpu.memory_space<smem>>, %arg6: memref<8x128xf32, #tpu.memory_space<vmem>>) attributes {dimension_semantics = [#tpu.dimension_semantics<parallel>], iteration_bounds = array<i64: 1>, scalar_prefetch = 0 : i64, scratch_operands = 0 : i64, tpu.core_type = #tpu.core_type<tc>, window_params = [{transform_indices = @transform_0, window_bounds = array<i64: 3, 8, 128>}, {transform_indices = @transform_1, window_bounds = array<i64: 3, 64>}, {transform_indices = @transform_2, window_bounds = array<i64: 64>}, {transform_indices = @transform_3, window_bounds = array<i64: 64>}, {transform_indices = @transform_4, window_bounds = array<i64: 1>}, {transform_indices = @transform_5, window_bounds = array<i64: 8, 128>}]} {
    %c0 = arith.constant 0 : index
    %c0_0 = arith.constant 0 : index
    %c0_1 = arith.constant 0 : index
    %0 = vector.load %arg1[%c0, %c0_0, %c0_1] : memref<3x8x128xf32, #tpu.memory_space<vmem>>, vector<1x8x128xf32>
    %1 = vector.shape_cast %0 : vector<1x8x128xf32> to vector<8x128xf32>
    %c1 = arith.constant 1 : index
    %c0_2 = arith.constant 0 : index
    %c0_3 = arith.constant 0 : index
    %2 = vector.load %arg1[%c1, %c0_2, %c0_3] : memref<3x8x128xf32, #tpu.memory_space<vmem>>, vector<1x8x128xf32>
    %3 = vector.shape_cast %2 : vector<1x8x128xf32> to vector<8x128xf32>
    %c2 = arith.constant 2 : index
    %c0_4 = arith.constant 0 : index
    %c0_5 = arith.constant 0 : index
    %4 = vector.load %arg1[%c2, %c0_4, %c0_5] : memref<3x8x128xf32, #tpu.memory_space<vmem>>, vector<1x8x128xf32>
    %5 = vector.shape_cast %4 : vector<1x8x128xf32> to vector<8x128xf32>
    %c0_6 = arith.constant 0 : index
    %6 = memref.load %arg5[%c0_6] : memref<1xf32, #tpu.memory_space<smem>>
    %7 = vector.broadcast %6 : f32 to vector<8x128xf32>
    %c0_7 = arith.constant 0 : index
    %c0_8 = arith.constant 0 : index
    %8 = memref.load %arg2[%c0_7, %c0_8] : memref<3x64xf32, #tpu.memory_space<smem>>
    %9 = vector.broadcast %8 : f32 to vector<8x128xf32>
    %10 = arith.mulf %1, %9 : vector<8x128xf32>
    %c1_9 = arith.constant 1 : index
    %c0_10 = arith.constant 0 : index
    %11 = memref.load %arg2[%c1_9, %c0_10] : memref<3x64xf32, #tpu.memory_space<smem>>
    %12 = vector.broadcast %11 : f32 to vector<8x128xf32>
    %13 = arith.mulf %3, %12 : vector<8x128xf32>
    %14 = arith.addf %10, %13 : vector<8x128xf32>
    %c2_11 = arith.constant 2 : index
    %c0_12 = arith.constant 0 : index
    %15 = memref.load %arg2[%c2_11, %c0_12] : memref<3x64xf32, #tpu.memory_space<smem>>
    %16 = vector.broadcast %15 : f32 to vector<8x128xf32>
    %17 = arith.mulf %5, %16 : vector<8x128xf32>
    %c0_13 = arith.constant 0 : index
    %18 = memref.load %arg3[%c0_13] : memref<64xf32, #tpu.memory_space<smem>>
    %19 = vector.broadcast %18 : f32 to vector<8x128xf32>
    %20 = arith.addf %17, %19 : vector<8x128xf32>
    %21 = arith.addf %14, %20 : vector<8x128xf32>
    %cst = arith.constant 0.000000e+00 : f32
    %22 = vector.broadcast %cst : f32 to vector<8x128xf32>
    %23 = arith.maximumf %21, %22 : vector<8x128xf32>
    %c0_14 = arith.constant 0 : index
    %24 = memref.load %arg4[%c0_14] : memref<64xf32, #tpu.memory_space<smem>>
    %25 = vector.broadcast %24 : f32 to vector<8x128xf32>
    %26 = arith.mulf %23, %25 : vector<8x128xf32>
    %27 = arith.addf %7, %26 : vector<8x128xf32>
    %c0_15 = arith.constant 0 : index
    %c1_16 = arith.constant 1 : index
    %28 = memref.load %arg2[%c0_15, %c1_16] : memref<3x64xf32, #tpu.memory_space<smem>>
    %29 = vector.broadcast %28 : f32 to vector<8x128xf32>
    %30 = arith.mulf %1, %29 : vector<8x128xf32>
    %c1_17 = arith.constant 1 : index
    %c1_18 = arith.constant 1 : index
    %31 = memref.load %arg2[%c1_17, %c1_18] : memref<3x64xf32, #tpu.memory_space<smem>>
    %32 = vector.broadcast %31 : f32 to vector<8x128xf32>
    %33 = arith.mulf %3, %32 : vector<8x128xf32>
    %34 = arith.addf %30, %33 : vector<8x128xf32>
    %c2_19 = arith.constant 2 : index
    %c1_20 = arith.constant 1 : index
    %35 = memref.load %arg2[%c2_19, %c1_20] : memref<3x64xf32, #tpu.memory_space<smem>>
    %36 = vector.broadcast %35 : f32 to vector<8x128xf32>
    %37 = arith.mulf %5, %36 : vector<8x128xf32>
    %c1_21 = arith.constant 1 : index
    %38 = memref.load %arg3[%c1_21] : memref<64xf32, #tpu.memory_space<smem>>
    %39 = vector.broadcast %38 : f32 to vector<8x128xf32>
    %40 = arith.addf %37, %39 : vector<8x128xf32>
    %41 = arith.addf %34, %40 : vector<8x128xf32>
    %cst_22 = arith.constant 0.000000e+00 : f32
    %42 = vector.broadcast %cst_22 : f32 to vector<8x128xf32>
    %43 = arith.maximumf %41, %42 : vector<8x128xf32>
    %c1_23 = arith.constant 1 : index
    %44 = memref.load %arg4[%c1_23] : memref<64xf32, #tpu.memory_space<smem>>
    %45 = vector.broadcast %44 : f32 to vector<8x128xf32>
    %46 = arith.mulf %43, %45 : vector<8x128xf32>
    %47 = arith.addf %27, %46 : vector<8x128xf32>
    %c0_24 = arith.constant 0 : index
    %c2_25 = arith.constant 2 : index
    %48 = memref.load %arg2[%c0_24, %c2_25] : memref<3x64xf32, #tpu.memory_space<smem>>
    %49 = vector.broadcast %48 : f32 to vector<8x128xf32>
    %50 = arith.mulf %1, %49 : vector<8x128xf32>
    %c1_26 = arith.constant 1 : index
    %c2_27 = arith.constant 2 : index
    %51 = memref.load %arg2[%c1_26, %c2_27] : memref<3x64xf32, #tpu.memory_space<smem>>
    %52 = vector.broadcast %51 : f32 to vector<8x128xf32>
    %53 = arith.mulf %3, %52 : vector<8x128xf32>
    %54 = arith.addf %50, %53 : vector<8x128xf32>
    %c2_28 = arith.constant 2 : index
    %c2_29 = arith.constant 2 : index
    %55 = memref.load %arg2[%c2_28, %c2_29] : memref<3x64xf32, #tpu.memory_space<smem>>
    %56 = vector.broadcast %55 : f32 to vector<8x128xf32>
    %57 = arith.mulf %5, %56 : vector<8x128xf32>
    %c2_30 = arith.constant 2 : index
    %58 = memref.load %arg3[%c2_30] : memref<64xf32, #tpu.memory_space<smem>>
    %59 = vector.broadcast %58 : f32 to vector<8x128xf32>
    %60 = arith.addf %57, %59 : vector<8x128xf32>
    %61 = arith.addf %54, %60 : vector<8x128xf32>
    %cst_31 = arith.constant 0.000000e+00 : f32
    %62 = vector.broadcast %cst_31 : f32 to vector<8x128xf32>
    %63 = arith.maximumf %61, %62 : vector<8x128xf32>
    %c2_32 = arith.constant 2 : index
    %64 = memref.load %arg4[%c2_32] : memref<64xf32, #tpu.memory_space<smem>>
    %65 = vector.broadcast %64 : f32 to vector<8x128xf32>
    %66 = arith.mulf %63, %65 : vector<8x128xf32>
    %67 = arith.addf %47, %66 : vector<8x128xf32>
    %c0_33 = arith.constant 0 : index
    %c3 = arith.constant 3 : index
    %68 = memref.load %arg2[%c0_33, %c3] : memref<3x64xf32, #tpu.memory_space<smem>>
    %69 = vector.broadcast %68 : f32 to vector<8x128xf32>
    %70 = arith.mulf %1, %69 : vector<8x128xf32>
    %c1_34 = arith.constant 1 : index
    %c3_35 = arith.constant 3 : index
    %71 = memref.load %arg2[%c1_34, %c3_35] : memref<3x64xf32, #tpu.memory_space<smem>>
    %72 = vector.broadcast %71 : f32 to vector<8x128xf32>
    %73 = arith.mulf %3, %72 : vector<8x128xf32>
    %74 = arith.addf %70, %73 : vector<8x128xf32>
    %c2_36 = arith.constant 2 : index
    %c3_37 = arith.constant 3 : index
    %75 = memref.load %arg2[%c2_36, %c3_37] : memref<3x64xf32, #tpu.memory_space<smem>>
    %76 = vector.broadcast %75 : f32 to vector<8x128xf32>
    %77 = arith.mulf %5, %76 : vector<8x128xf32>
    %c3_38 = arith.constant 3 : index
    %78 = memref.load %arg3[%c3_38] : memref<64xf32, #tpu.memory_space<smem>>
    %79 = vector.broadcast %78 : f32 to vector<8x128xf32>
    %80 = arith.addf %77, %79 : vector<8x128xf32>
    %81 = arith.addf %74, %80 : vector<8x128xf32>
    %cst_39 = arith.constant 0.000000e+00 : f32
    %82 = vector.broadcast %cst_39 : f32 to vector<8x128xf32>
    %83 = arith.maximumf %81, %82 : vector<8x128xf32>
    %c3_40 = arith.constant 3 : index
    %84 = memref.load %arg4[%c3_40] : memref<64xf32, #tpu.memory_space<smem>>
    %85 = vector.broadcast %84 : f32 to vector<8x128xf32>
    %86 = arith.mulf %83, %85 : vector<8x128xf32>
    %87 = arith.addf %67, %86 : vector<8x128xf32>
    %c0_41 = arith.constant 0 : index
    %c4 = arith.constant 4 : index
    %88 = memref.load %arg2[%c0_41, %c4] : memref<3x64xf32, #tpu.memory_space<smem>>
    %89 = vector.broadcast %88 : f32 to vector<8x128xf32>
    %90 = arith.mulf %1, %89 : vector<8x128xf32>
    %c1_42 = arith.constant 1 : index
    %c4_43 = arith.constant 4 : index
    %91 = memref.load %arg2[%c1_42, %c4_43] : memref<3x64xf32, #tpu.memory_space<smem>>
    %92 = vector.broadcast %91 : f32 to vector<8x128xf32>
    %93 = arith.mulf %3, %92 : vector<8x128xf32>
    %94 = arith.addf %90, %93 : vector<8x128xf32>
    %c2_44 = arith.constant 2 : index
    %c4_45 = arith.constant 4 : index
    %95 = memref.load %arg2[%c2_44, %c4_45] : memref<3x64xf32, #tpu.memory_space<smem>>
    %96 = vector.broadcast %95 : f32 to vector<8x128xf32>
    %97 = arith.mulf %5, %96 : vector<8x128xf32>
    %c4_46 = arith.constant 4 : index
    %98 = memref.load %arg3[%c4_46] : memref<64xf32, #tpu.memory_space<smem>>
    %99 = vector.broadcast %98 : f32 to vector<8x128xf32>
    %100 = arith.addf %97, %99 : vector<8x128xf32>
    %101 = arith.addf %94, %100 : vector<8x128xf32>
    %cst_47 = arith.constant 0.000000e+00 : f32
    %102 = vector.broadcast %cst_47 : f32 to vector<8x128xf32>
    %103 = arith.maximumf %101, %102 : vector<8x128xf32>
    %c4_48 = arith.constant 4 : index
    %104 = memref.load %arg4[%c4_48] : memref<64xf32, #tpu.memory_space<smem>>
    %105 = vector.broadcast %104 : f32 to vector<8x128xf32>
    %106 = arith.mulf %103, %105 : vector<8x128xf32>
    %107 = arith.addf %87, %106 : vector<8x128xf32>
    %c0_49 = arith.constant 0 : index
    %c5 = arith.constant 5 : index
    %108 = memref.load %arg2[%c0_49, %c5] : memref<3x64xf32, #tpu.memory_space<smem>>
    %109 = vector.broadcast %108 : f32 to vector<8x128xf32>
    %110 = arith.mulf %1, %109 : vector<8x128xf32>
    %c1_50 = arith.constant 1 : index
    %c5_51 = arith.constant 5 : index
    %111 = memref.load %arg2[%c1_50, %c5_51] : memref<3x64xf32, #tpu.memory_space<smem>>
    %112 = vector.broadcast %111 : f32 to vector<8x128xf32>
    %113 = arith.mulf %3, %112 : vector<8x128xf32>
    %114 = arith.addf %110, %113 : vector<8x128xf32>
    %c2_52 = arith.constant 2 : index
    %c5_53 = arith.constant 5 : index
    %115 = memref.load %arg2[%c2_52, %c5_53] : memref<3x64xf32, #tpu.memory_space<smem>>
    %116 = vector.broadcast %115 : f32 to vector<8x128xf32>
    %117 = arith.mulf %5, %116 : vector<8x128xf32>
    %c5_54 = arith.constant 5 : index
    %118 = memref.load %arg3[%c5_54] : memref<64xf32, #tpu.memory_space<smem>>
    %119 = vector.broadcast %118 : f32 to vector<8x128xf32>
    %120 = arith.addf %117, %119 : vector<8x128xf32>
    %121 = arith.addf %114, %120 : vector<8x128xf32>
    %cst_55 = arith.constant 0.000000e+00 : f32
    %122 = vector.broadcast %cst_55 : f32 to vector<8x128xf32>
    %123 = arith.maximumf %121, %122 : vector<8x128xf32>
    %c5_56 = arith.constant 5 : index
    %124 = memref.load %arg4[%c5_56] : memref<64xf32, #tpu.memory_space<smem>>
    %125 = vector.broadcast %124 : f32 to vector<8x128xf32>
    %126 = arith.mulf %123, %125 : vector<8x128xf32>
    %127 = arith.addf %107, %126 : vector<8x128xf32>
    %c0_57 = arith.constant 0 : index
    %c6 = arith.constant 6 : index
    %128 = memref.load %arg2[%c0_57, %c6] : memref<3x64xf32, #tpu.memory_space<smem>>
    %129 = vector.broadcast %128 : f32 to vector<8x128xf32>
    %130 = arith.mulf %1, %129 : vector<8x128xf32>
    %c1_58 = arith.constant 1 : index
    %c6_59 = arith.constant 6 : index
    %131 = memref.load %arg2[%c1_58, %c6_59] : memref<3x64xf32, #tpu.memory_space<smem>>
    %132 = vector.broadcast %131 : f32 to vector<8x128xf32>
    %133 = arith.mulf %3, %132 : vector<8x128xf32>
    %134 = arith.addf %130, %133 : vector<8x128xf32>
    %c2_60 = arith.constant 2 : index
    %c6_61 = arith.constant 6 : index
    %135 = memref.load %arg2[%c2_60, %c6_61] : memref<3x64xf32, #tpu.memory_space<smem>>
    %136 = vector.broadcast %135 : f32 to vector<8x128xf32>
    %137 = arith.mulf %5, %136 : vector<8x128xf32>
    %c6_62 = arith.constant 6 : index
    %138 = memref.load %arg3[%c6_62] : memref<64xf32, #tpu.memory_space<smem>>
    %139 = vector.broadcast %138 : f32 to vector<8x128xf32>
    %140 = arith.addf %137, %139 : vector<8x128xf32>
    %141 = arith.addf %134, %140 : vector<8x128xf32>
    %cst_63 = arith.constant 0.000000e+00 : f32
    %142 = vector.broadcast %cst_63 : f32 to vector<8x128xf32>
    %143 = arith.maximumf %141, %142 : vector<8x128xf32>
    %c6_64 = arith.constant 6 : index
    %144 = memref.load %arg4[%c6_64] : memref<64xf32, #tpu.memory_space<smem>>
    %145 = vector.broadcast %144 : f32 to vector<8x128xf32>
    %146 = arith.mulf %143, %145 : vector<8x128xf32>
    %147 = arith.addf %127, %146 : vector<8x128xf32>
    %c0_65 = arith.constant 0 : index
    %c7 = arith.constant 7 : index
    %148 = memref.load %arg2[%c0_65, %c7] : memref<3x64xf32, #tpu.memory_space<smem>>
    %149 = vector.broadcast %148 : f32 to vector<8x128xf32>
    %150 = arith.mulf %1, %149 : vector<8x128xf32>
    %c1_66 = arith.constant 1 : index
    %c7_67 = arith.constant 7 : index
    %151 = memref.load %arg2[%c1_66, %c7_67] : memref<3x64xf32, #tpu.memory_space<smem>>
    %152 = vector.broadcast %151 : f32 to vector<8x128xf32>
    %153 = arith.mulf %3, %152 : vector<8x128xf32>
    %154 = arith.addf %150, %153 : vector<8x128xf32>
    %c2_68 = arith.constant 2 : index
    %c7_69 = arith.constant 7 : index
    %155 = memref.load %arg2[%c2_68, %c7_69] : memref<3x64xf32, #tpu.memory_space<smem>>
    %156 = vector.broadcast %155 : f32 to vector<8x128xf32>
    %157 = arith.mulf %5, %156 : vector<8x128xf32>
    %c7_70 = arith.constant 7 : index
    %158 = memref.load %arg3[%c7_70] : memref<64xf32, #tpu.memory_space<smem>>
    %159 = vector.broadcast %158 : f32 to vector<8x128xf32>
    %160 = arith.addf %157, %159 : vector<8x128xf32>
    %161 = arith.addf %154, %160 : vector<8x128xf32>
    %cst_71 = arith.constant 0.000000e+00 : f32
    %162 = vector.broadcast %cst_71 : f32 to vector<8x128xf32>
    %163 = arith.maximumf %161, %162 : vector<8x128xf32>
    %c7_72 = arith.constant 7 : index
    %164 = memref.load %arg4[%c7_72] : memref<64xf32, #tpu.memory_space<smem>>
    %165 = vector.broadcast %164 : f32 to vector<8x128xf32>
    %166 = arith.mulf %163, %165 : vector<8x128xf32>
    %167 = arith.addf %147, %166 : vector<8x128xf32>
    %c0_73 = arith.constant 0 : index
    %c8 = arith.constant 8 : index
    %168 = memref.load %arg2[%c0_73, %c8] : memref<3x64xf32, #tpu.memory_space<smem>>
    %169 = vector.broadcast %168 : f32 to vector<8x128xf32>
    %170 = arith.mulf %1, %169 : vector<8x128xf32>
    %c1_74 = arith.constant 1 : index
    %c8_75 = arith.constant 8 : index
    %171 = memref.load %arg2[%c1_74, %c8_75] : memref<3x64xf32, #tpu.memory_space<smem>>
    %172 = vector.broadcast %171 : f32 to vector<8x128xf32>
    %173 = arith.mulf %3, %172 : vector<8x128xf32>
    %174 = arith.addf %170, %173 : vector<8x128xf32>
    %c2_76 = arith.constant 2 : index
    %c8_77 = arith.constant 8 : index
    %175 = memref.load %arg2[%c2_76, %c8_77] : memref<3x64xf32, #tpu.memory_space<smem>>
    %176 = vector.broadcast %175 : f32 to vector<8x128xf32>
    %177 = arith.mulf %5, %176 : vector<8x128xf32>
    %c8_78 = arith.constant 8 : index
    %178 = memref.load %arg3[%c8_78] : memref<64xf32, #tpu.memory_space<smem>>
    %179 = vector.broadcast %178 : f32 to vector<8x128xf32>
    %180 = arith.addf %177, %179 : vector<8x128xf32>
    %181 = arith.addf %174, %180 : vector<8x128xf32>
    %cst_79 = arith.constant 0.000000e+00 : f32
    %182 = vector.broadcast %cst_79 : f32 to vector<8x128xf32>
    %183 = arith.maximumf %181, %182 : vector<8x128xf32>
    %c8_80 = arith.constant 8 : index
    %184 = memref.load %arg4[%c8_80] : memref<64xf32, #tpu.memory_space<smem>>
    %185 = vector.broadcast %184 : f32 to vector<8x128xf32>
    %186 = arith.mulf %183, %185 : vector<8x128xf32>
    %187 = arith.addf %167, %186 : vector<8x128xf32>
    %c0_81 = arith.constant 0 : index
    %c9 = arith.constant 9 : index
    %188 = memref.load %arg2[%c0_81, %c9] : memref<3x64xf32, #tpu.memory_space<smem>>
    %189 = vector.broadcast %188 : f32 to vector<8x128xf32>
    %190 = arith.mulf %1, %189 : vector<8x128xf32>
    %c1_82 = arith.constant 1 : index
    %c9_83 = arith.constant 9 : index
    %191 = memref.load %arg2[%c1_82, %c9_83] : memref<3x64xf32, #tpu.memory_space<smem>>
    %192 = vector.broadcast %191 : f32 to vector<8x128xf32>
    %193 = arith.mulf %3, %192 : vector<8x128xf32>
    %194 = arith.addf %190, %193 : vector<8x128xf32>
    %c2_84 = arith.constant 2 : index
    %c9_85 = arith.constant 9 : index
    %195 = memref.load %arg2[%c2_84, %c9_85] : memref<3x64xf32, #tpu.memory_space<smem>>
    %196 = vector.broadcast %195 : f32 to vector<8x128xf32>
    %197 = arith.mulf %5, %196 : vector<8x128xf32>
    %c9_86 = arith.constant 9 : index
    %198 = memref.load %arg3[%c9_86] : memref<64xf32, #tpu.memory_space<smem>>
    %199 = vector.broadcast %198 : f32 to vector<8x128xf32>
    %200 = arith.addf %197, %199 : vector<8x128xf32>
    %201 = arith.addf %194, %200 : vector<8x128xf32>
    %cst_87 = arith.constant 0.000000e+00 : f32
    %202 = vector.broadcast %cst_87 : f32 to vector<8x128xf32>
    %203 = arith.maximumf %201, %202 : vector<8x128xf32>
    %c9_88 = arith.constant 9 : index
    %204 = memref.load %arg4[%c9_88] : memref<64xf32, #tpu.memory_space<smem>>
    %205 = vector.broadcast %204 : f32 to vector<8x128xf32>
    %206 = arith.mulf %203, %205 : vector<8x128xf32>
    %207 = arith.addf %187, %206 : vector<8x128xf32>
    %c0_89 = arith.constant 0 : index
    %c10 = arith.constant 10 : index
    %208 = memref.load %arg2[%c0_89, %c10] : memref<3x64xf32, #tpu.memory_space<smem>>
    %209 = vector.broadcast %208 : f32 to vector<8x128xf32>
    %210 = arith.mulf %1, %209 : vector<8x128xf32>
    %c1_90 = arith.constant 1 : index
    %c10_91 = arith.constant 10 : index
    %211 = memref.load %arg2[%c1_90, %c10_91] : memref<3x64xf32, #tpu.memory_space<smem>>
    %212 = vector.broadcast %211 : f32 to vector<8x128xf32>
    %213 = arith.mulf %3, %212 : vector<8x128xf32>
    %214 = arith.addf %210, %213 : vector<8x128xf32>
    %c2_92 = arith.constant 2 : index
    %c10_93 = arith.constant 10 : index
    %215 = memref.load %arg2[%c2_92, %c10_93] : memref<3x64xf32, #tpu.memory_space<smem>>
    %216 = vector.broadcast %215 : f32 to vector<8x128xf32>
    %217 = arith.mulf %5, %216 : vector<8x128xf32>
    %c10_94 = arith.constant 10 : index
    %218 = memref.load %arg3[%c10_94] : memref<64xf32, #tpu.memory_space<smem>>
    %219 = vector.broadcast %218 : f32 to vector<8x128xf32>
    %220 = arith.addf %217, %219 : vector<8x128xf32>
    %221 = arith.addf %214, %220 : vector<8x128xf32>
    %cst_95 = arith.constant 0.000000e+00 : f32
    %222 = vector.broadcast %cst_95 : f32 to vector<8x128xf32>
    %223 = arith.maximumf %221, %222 : vector<8x128xf32>
    %c10_96 = arith.constant 10 : index
    %224 = memref.load %arg4[%c10_96] : memref<64xf32, #tpu.memory_space<smem>>
    %225 = vector.broadcast %224 : f32 to vector<8x128xf32>
    %226 = arith.mulf %223, %225 : vector<8x128xf32>
    %227 = arith.addf %207, %226 : vector<8x128xf32>
    %c0_97 = arith.constant 0 : index
    %c11 = arith.constant 11 : index
    %228 = memref.load %arg2[%c0_97, %c11] : memref<3x64xf32, #tpu.memory_space<smem>>
    %229 = vector.broadcast %228 : f32 to vector<8x128xf32>
    %230 = arith.mulf %1, %229 : vector<8x128xf32>
    %c1_98 = arith.constant 1 : index
    %c11_99 = arith.constant 11 : index
    %231 = memref.load %arg2[%c1_98, %c11_99] : memref<3x64xf32, #tpu.memory_space<smem>>
    %232 = vector.broadcast %231 : f32 to vector<8x128xf32>
    %233 = arith.mulf %3, %232 : vector<8x128xf32>
    %234 = arith.addf %230, %233 : vector<8x128xf32>
    %c2_100 = arith.constant 2 : index
    %c11_101 = arith.constant 11 : index
    %235 = memref.load %arg2[%c2_100, %c11_101] : memref<3x64xf32, #tpu.memory_space<smem>>
    %236 = vector.broadcast %235 : f32 to vector<8x128xf32>
    %237 = arith.mulf %5, %236 : vector<8x128xf32>
    %c11_102 = arith.constant 11 : index
    %238 = memref.load %arg3[%c11_102] : memref<64xf32, #tpu.memory_space<smem>>
    %239 = vector.broadcast %238 : f32 to vector<8x128xf32>
    %240 = arith.addf %237, %239 : vector<8x128xf32>
    %241 = arith.addf %234, %240 : vector<8x128xf32>
    %cst_103 = arith.constant 0.000000e+00 : f32
    %242 = vector.broadcast %cst_103 : f32 to vector<8x128xf32>
    %243 = arith.maximumf %241, %242 : vector<8x128xf32>
    %c11_104 = arith.constant 11 : index
    %244 = memref.load %arg4[%c11_104] : memref<64xf32, #tpu.memory_space<smem>>
    %245 = vector.broadcast %244 : f32 to vector<8x128xf32>
    %246 = arith.mulf %243, %245 : vector<8x128xf32>
    %247 = arith.addf %227, %246 : vector<8x128xf32>
    %c0_105 = arith.constant 0 : index
    %c12 = arith.constant 12 : index
    %248 = memref.load %arg2[%c0_105, %c12] : memref<3x64xf32, #tpu.memory_space<smem>>
    %249 = vector.broadcast %248 : f32 to vector<8x128xf32>
    %250 = arith.mulf %1, %249 : vector<8x128xf32>
    %c1_106 = arith.constant 1 : index
    %c12_107 = arith.constant 12 : index
    %251 = memref.load %arg2[%c1_106, %c12_107] : memref<3x64xf32, #tpu.memory_space<smem>>
    %252 = vector.broadcast %251 : f32 to vector<8x128xf32>
    %253 = arith.mulf %3, %252 : vector<8x128xf32>
    %254 = arith.addf %250, %253 : vector<8x128xf32>
    %c2_108 = arith.constant 2 : index
    %c12_109 = arith.constant 12 : index
    %255 = memref.load %arg2[%c2_108, %c12_109] : memref<3x64xf32, #tpu.memory_space<smem>>
    %256 = vector.broadcast %255 : f32 to vector<8x128xf32>
    %257 = arith.mulf %5, %256 : vector<8x128xf32>
    %c12_110 = arith.constant 12 : index
    %258 = memref.load %arg3[%c12_110] : memref<64xf32, #tpu.memory_space<smem>>
    %259 = vector.broadcast %258 : f32 to vector<8x128xf32>
    %260 = arith.addf %257, %259 : vector<8x128xf32>
    %261 = arith.addf %254, %260 : vector<8x128xf32>
    %cst_111 = arith.constant 0.000000e+00 : f32
    %262 = vector.broadcast %cst_111 : f32 to vector<8x128xf32>
    %263 = arith.maximumf %261, %262 : vector<8x128xf32>
    %c12_112 = arith.constant 12 : index
    %264 = memref.load %arg4[%c12_112] : memref<64xf32, #tpu.memory_space<smem>>
    %265 = vector.broadcast %264 : f32 to vector<8x128xf32>
    %266 = arith.mulf %263, %265 : vector<8x128xf32>
    %267 = arith.addf %247, %266 : vector<8x128xf32>
    %c0_113 = arith.constant 0 : index
    %c13 = arith.constant 13 : index
    %268 = memref.load %arg2[%c0_113, %c13] : memref<3x64xf32, #tpu.memory_space<smem>>
    %269 = vector.broadcast %268 : f32 to vector<8x128xf32>
    %270 = arith.mulf %1, %269 : vector<8x128xf32>
    %c1_114 = arith.constant 1 : index
    %c13_115 = arith.constant 13 : index
    %271 = memref.load %arg2[%c1_114, %c13_115] : memref<3x64xf32, #tpu.memory_space<smem>>
    %272 = vector.broadcast %271 : f32 to vector<8x128xf32>
    %273 = arith.mulf %3, %272 : vector<8x128xf32>
    %274 = arith.addf %270, %273 : vector<8x128xf32>
    %c2_116 = arith.constant 2 : index
    %c13_117 = arith.constant 13 : index
    %275 = memref.load %arg2[%c2_116, %c13_117] : memref<3x64xf32, #tpu.memory_space<smem>>
    %276 = vector.broadcast %275 : f32 to vector<8x128xf32>
    %277 = arith.mulf %5, %276 : vector<8x128xf32>
    %c13_118 = arith.constant 13 : index
    %278 = memref.load %arg3[%c13_118] : memref<64xf32, #tpu.memory_space<smem>>
    %279 = vector.broadcast %278 : f32 to vector<8x128xf32>
    %280 = arith.addf %277, %279 : vector<8x128xf32>
    %281 = arith.addf %274, %280 : vector<8x128xf32>
    %cst_119 = arith.constant 0.000000e+00 : f32
    %282 = vector.broadcast %cst_119 : f32 to vector<8x128xf32>
    %283 = arith.maximumf %281, %282 : vector<8x128xf32>
    %c13_120 = arith.constant 13 : index
    %284 = memref.load %arg4[%c13_120] : memref<64xf32, #tpu.memory_space<smem>>
    %285 = vector.broadcast %284 : f32 to vector<8x128xf32>
    %286 = arith.mulf %283, %285 : vector<8x128xf32>
    %287 = arith.addf %267, %286 : vector<8x128xf32>
    %c0_121 = arith.constant 0 : index
    %c14 = arith.constant 14 : index
    %288 = memref.load %arg2[%c0_121, %c14] : memref<3x64xf32, #tpu.memory_space<smem>>
    %289 = vector.broadcast %288 : f32 to vector<8x128xf32>
    %290 = arith.mulf %1, %289 : vector<8x128xf32>
    %c1_122 = arith.constant 1 : index
    %c14_123 = arith.constant 14 : index
    %291 = memref.load %arg2[%c1_122, %c14_123] : memref<3x64xf32, #tpu.memory_space<smem>>
    %292 = vector.broadcast %291 : f32 to vector<8x128xf32>
    %293 = arith.mulf %3, %292 : vector<8x128xf32>
    %294 = arith.addf %290, %293 : vector<8x128xf32>
    %c2_124 = arith.constant 2 : index
    %c14_125 = arith.constant 14 : index
    %295 = memref.load %arg2[%c2_124, %c14_125] : memref<3x64xf32, #tpu.memory_space<smem>>
    %296 = vector.broadcast %295 : f32 to vector<8x128xf32>
    %297 = arith.mulf %5, %296 : vector<8x128xf32>
    %c14_126 = arith.constant 14 : index
    %298 = memref.load %arg3[%c14_126] : memref<64xf32, #tpu.memory_space<smem>>
    %299 = vector.broadcast %298 : f32 to vector<8x128xf32>
    %300 = arith.addf %297, %299 : vector<8x128xf32>
    %301 = arith.addf %294, %300 : vector<8x128xf32>
    %cst_127 = arith.constant 0.000000e+00 : f32
    %302 = vector.broadcast %cst_127 : f32 to vector<8x128xf32>
    %303 = arith.maximumf %301, %302 : vector<8x128xf32>
    %c14_128 = arith.constant 14 : index
    %304 = memref.load %arg4[%c14_128] : memref<64xf32, #tpu.memory_space<smem>>
    %305 = vector.broadcast %304 : f32 to vector<8x128xf32>
    %306 = arith.mulf %303, %305 : vector<8x128xf32>
    %307 = arith.addf %287, %306 : vector<8x128xf32>
    %c0_129 = arith.constant 0 : index
    %c15 = arith.constant 15 : index
    %308 = memref.load %arg2[%c0_129, %c15] : memref<3x64xf32, #tpu.memory_space<smem>>
    %309 = vector.broadcast %308 : f32 to vector<8x128xf32>
    %310 = arith.mulf %1, %309 : vector<8x128xf32>
    %c1_130 = arith.constant 1 : index
    %c15_131 = arith.constant 15 : index
    %311 = memref.load %arg2[%c1_130, %c15_131] : memref<3x64xf32, #tpu.memory_space<smem>>
    %312 = vector.broadcast %311 : f32 to vector<8x128xf32>
    %313 = arith.mulf %3, %312 : vector<8x128xf32>
    %314 = arith.addf %310, %313 : vector<8x128xf32>
    %c2_132 = arith.constant 2 : index
    %c15_133 = arith.constant 15 : index
    %315 = memref.load %arg2[%c2_132, %c15_133] : memref<3x64xf32, #tpu.memory_space<smem>>
    %316 = vector.broadcast %315 : f32 to vector<8x128xf32>
    %317 = arith.mulf %5, %316 : vector<8x128xf32>
    %c15_134 = arith.constant 15 : index
    %318 = memref.load %arg3[%c15_134] : memref<64xf32, #tpu.memory_space<smem>>
    %319 = vector.broadcast %318 : f32 to vector<8x128xf32>
    %320 = arith.addf %317, %319 : vector<8x128xf32>
    %321 = arith.addf %314, %320 : vector<8x128xf32>
    %cst_135 = arith.constant 0.000000e+00 : f32
    %322 = vector.broadcast %cst_135 : f32 to vector<8x128xf32>
    %323 = arith.maximumf %321, %322 : vector<8x128xf32>
    %c15_136 = arith.constant 15 : index
    %324 = memref.load %arg4[%c15_136] : memref<64xf32, #tpu.memory_space<smem>>
    %325 = vector.broadcast %324 : f32 to vector<8x128xf32>
    %326 = arith.mulf %323, %325 : vector<8x128xf32>
    %327 = arith.addf %307, %326 : vector<8x128xf32>
    %c0_137 = arith.constant 0 : index
    %c16 = arith.constant 16 : index
    %328 = memref.load %arg2[%c0_137, %c16] : memref<3x64xf32, #tpu.memory_space<smem>>
    %329 = vector.broadcast %328 : f32 to vector<8x128xf32>
    %330 = arith.mulf %1, %329 : vector<8x128xf32>
    %c1_138 = arith.constant 1 : index
    %c16_139 = arith.constant 16 : index
    %331 = memref.load %arg2[%c1_138, %c16_139] : memref<3x64xf32, #tpu.memory_space<smem>>
    %332 = vector.broadcast %331 : f32 to vector<8x128xf32>
    %333 = arith.mulf %3, %332 : vector<8x128xf32>
    %334 = arith.addf %330, %333 : vector<8x128xf32>
    %c2_140 = arith.constant 2 : index
    %c16_141 = arith.constant 16 : index
    %335 = memref.load %arg2[%c2_140, %c16_141] : memref<3x64xf32, #tpu.memory_space<smem>>
    %336 = vector.broadcast %335 : f32 to vector<8x128xf32>
    %337 = arith.mulf %5, %336 : vector<8x128xf32>
    %c16_142 = arith.constant 16 : index
    %338 = memref.load %arg3[%c16_142] : memref<64xf32, #tpu.memory_space<smem>>
    %339 = vector.broadcast %338 : f32 to vector<8x128xf32>
    %340 = arith.addf %337, %339 : vector<8x128xf32>
    %341 = arith.addf %334, %340 : vector<8x128xf32>
    %cst_143 = arith.constant 0.000000e+00 : f32
    %342 = vector.broadcast %cst_143 : f32 to vector<8x128xf32>
    %343 = arith.maximumf %341, %342 : vector<8x128xf32>
    %c16_144 = arith.constant 16 : index
    %344 = memref.load %arg4[%c16_144] : memref<64xf32, #tpu.memory_space<smem>>
    %345 = vector.broadcast %344 : f32 to vector<8x128xf32>
    %346 = arith.mulf %343, %345 : vector<8x128xf32>
    %347 = arith.addf %327, %346 : vector<8x128xf32>
    %c0_145 = arith.constant 0 : index
    %c17 = arith.constant 17 : index
    %348 = memref.load %arg2[%c0_145, %c17] : memref<3x64xf32, #tpu.memory_space<smem>>
    %349 = vector.broadcast %348 : f32 to vector<8x128xf32>
    %350 = arith.mulf %1, %349 : vector<8x128xf32>
    %c1_146 = arith.constant 1 : index
    %c17_147 = arith.constant 17 : index
    %351 = memref.load %arg2[%c1_146, %c17_147] : memref<3x64xf32, #tpu.memory_space<smem>>
    %352 = vector.broadcast %351 : f32 to vector<8x128xf32>
    %353 = arith.mulf %3, %352 : vector<8x128xf32>
    %354 = arith.addf %350, %353 : vector<8x128xf32>
    %c2_148 = arith.constant 2 : index
    %c17_149 = arith.constant 17 : index
    %355 = memref.load %arg2[%c2_148, %c17_149] : memref<3x64xf32, #tpu.memory_space<smem>>
    %356 = vector.broadcast %355 : f32 to vector<8x128xf32>
    %357 = arith.mulf %5, %356 : vector<8x128xf32>
    %c17_150 = arith.constant 17 : index
    %358 = memref.load %arg3[%c17_150] : memref<64xf32, #tpu.memory_space<smem>>
    %359 = vector.broadcast %358 : f32 to vector<8x128xf32>
    %360 = arith.addf %357, %359 : vector<8x128xf32>
    %361 = arith.addf %354, %360 : vector<8x128xf32>
    %cst_151 = arith.constant 0.000000e+00 : f32
    %362 = vector.broadcast %cst_151 : f32 to vector<8x128xf32>
    %363 = arith.maximumf %361, %362 : vector<8x128xf32>
    %c17_152 = arith.constant 17 : index
    %364 = memref.load %arg4[%c17_152] : memref<64xf32, #tpu.memory_space<smem>>
    %365 = vector.broadcast %364 : f32 to vector<8x128xf32>
    %366 = arith.mulf %363, %365 : vector<8x128xf32>
    %367 = arith.addf %347, %366 : vector<8x128xf32>
    %c0_153 = arith.constant 0 : index
    %c18 = arith.constant 18 : index
    %368 = memref.load %arg2[%c0_153, %c18] : memref<3x64xf32, #tpu.memory_space<smem>>
    %369 = vector.broadcast %368 : f32 to vector<8x128xf32>
    %370 = arith.mulf %1, %369 : vector<8x128xf32>
    %c1_154 = arith.constant 1 : index
    %c18_155 = arith.constant 18 : index
    %371 = memref.load %arg2[%c1_154, %c18_155] : memref<3x64xf32, #tpu.memory_space<smem>>
    %372 = vector.broadcast %371 : f32 to vector<8x128xf32>
    %373 = arith.mulf %3, %372 : vector<8x128xf32>
    %374 = arith.addf %370, %373 : vector<8x128xf32>
    %c2_156 = arith.constant 2 : index
    %c18_157 = arith.constant 18 : index
    %375 = memref.load %arg2[%c2_156, %c18_157] : memref<3x64xf32, #tpu.memory_space<smem>>
    %376 = vector.broadcast %375 : f32 to vector<8x128xf32>
    %377 = arith.mulf %5, %376 : vector<8x128xf32>
    %c18_158 = arith.constant 18 : index
    %378 = memref.load %arg3[%c18_158] : memref<64xf32, #tpu.memory_space<smem>>
    %379 = vector.broadcast %378 : f32 to vector<8x128xf32>
    %380 = arith.addf %377, %379 : vector<8x128xf32>
    %381 = arith.addf %374, %380 : vector<8x128xf32>
    %cst_159 = arith.constant 0.000000e+00 : f32
    %382 = vector.broadcast %cst_159 : f32 to vector<8x128xf32>
    %383 = arith.maximumf %381, %382 : vector<8x128xf32>
    %c18_160 = arith.constant 18 : index
    %384 = memref.load %arg4[%c18_160] : memref<64xf32, #tpu.memory_space<smem>>
    %385 = vector.broadcast %384 : f32 to vector<8x128xf32>
    %386 = arith.mulf %383, %385 : vector<8x128xf32>
    %387 = arith.addf %367, %386 : vector<8x128xf32>
    %c0_161 = arith.constant 0 : index
    %c19 = arith.constant 19 : index
    %388 = memref.load %arg2[%c0_161, %c19] : memref<3x64xf32, #tpu.memory_space<smem>>
    %389 = vector.broadcast %388 : f32 to vector<8x128xf32>
    %390 = arith.mulf %1, %389 : vector<8x128xf32>
    %c1_162 = arith.constant 1 : index
    %c19_163 = arith.constant 19 : index
    %391 = memref.load %arg2[%c1_162, %c19_163] : memref<3x64xf32, #tpu.memory_space<smem>>
    %392 = vector.broadcast %391 : f32 to vector<8x128xf32>
    %393 = arith.mulf %3, %392 : vector<8x128xf32>
    %394 = arith.addf %390, %393 : vector<8x128xf32>
    %c2_164 = arith.constant 2 : index
    %c19_165 = arith.constant 19 : index
    %395 = memref.load %arg2[%c2_164, %c19_165] : memref<3x64xf32, #tpu.memory_space<smem>>
    %396 = vector.broadcast %395 : f32 to vector<8x128xf32>
    %397 = arith.mulf %5, %396 : vector<8x128xf32>
    %c19_166 = arith.constant 19 : index
    %398 = memref.load %arg3[%c19_166] : memref<64xf32, #tpu.memory_space<smem>>
    %399 = vector.broadcast %398 : f32 to vector<8x128xf32>
    %400 = arith.addf %397, %399 : vector<8x128xf32>
    %401 = arith.addf %394, %400 : vector<8x128xf32>
    %cst_167 = arith.constant 0.000000e+00 : f32
    %402 = vector.broadcast %cst_167 : f32 to vector<8x128xf32>
    %403 = arith.maximumf %401, %402 : vector<8x128xf32>
    %c19_168 = arith.constant 19 : index
    %404 = memref.load %arg4[%c19_168] : memref<64xf32, #tpu.memory_space<smem>>
    %405 = vector.broadcast %404 : f32 to vector<8x128xf32>
    %406 = arith.mulf %403, %405 : vector<8x128xf32>
    %407 = arith.addf %387, %406 : vector<8x128xf32>
    %c0_169 = arith.constant 0 : index
    %c20 = arith.constant 20 : index
    %408 = memref.load %arg2[%c0_169, %c20] : memref<3x64xf32, #tpu.memory_space<smem>>
    %409 = vector.broadcast %408 : f32 to vector<8x128xf32>
    %410 = arith.mulf %1, %409 : vector<8x128xf32>
    %c1_170 = arith.constant 1 : index
    %c20_171 = arith.constant 20 : index
    %411 = memref.load %arg2[%c1_170, %c20_171] : memref<3x64xf32, #tpu.memory_space<smem>>
    %412 = vector.broadcast %411 : f32 to vector<8x128xf32>
    %413 = arith.mulf %3, %412 : vector<8x128xf32>
    %414 = arith.addf %410, %413 : vector<8x128xf32>
    %c2_172 = arith.constant 2 : index
    %c20_173 = arith.constant 20 : index
    %415 = memref.load %arg2[%c2_172, %c20_173] : memref<3x64xf32, #tpu.memory_space<smem>>
    %416 = vector.broadcast %415 : f32 to vector<8x128xf32>
    %417 = arith.mulf %5, %416 : vector<8x128xf32>
    %c20_174 = arith.constant 20 : index
    %418 = memref.load %arg3[%c20_174] : memref<64xf32, #tpu.memory_space<smem>>
    %419 = vector.broadcast %418 : f32 to vector<8x128xf32>
    %420 = arith.addf %417, %419 : vector<8x128xf32>
    %421 = arith.addf %414, %420 : vector<8x128xf32>
    %cst_175 = arith.constant 0.000000e+00 : f32
    %422 = vector.broadcast %cst_175 : f32 to vector<8x128xf32>
    %423 = arith.maximumf %421, %422 : vector<8x128xf32>
    %c20_176 = arith.constant 20 : index
    %424 = memref.load %arg4[%c20_176] : memref<64xf32, #tpu.memory_space<smem>>
    %425 = vector.broadcast %424 : f32 to vector<8x128xf32>
    %426 = arith.mulf %423, %425 : vector<8x128xf32>
    %427 = arith.addf %407, %426 : vector<8x128xf32>
    %c0_177 = arith.constant 0 : index
    %c21 = arith.constant 21 : index
    %428 = memref.load %arg2[%c0_177, %c21] : memref<3x64xf32, #tpu.memory_space<smem>>
    %429 = vector.broadcast %428 : f32 to vector<8x128xf32>
    %430 = arith.mulf %1, %429 : vector<8x128xf32>
    %c1_178 = arith.constant 1 : index
    %c21_179 = arith.constant 21 : index
    %431 = memref.load %arg2[%c1_178, %c21_179] : memref<3x64xf32, #tpu.memory_space<smem>>
    %432 = vector.broadcast %431 : f32 to vector<8x128xf32>
    %433 = arith.mulf %3, %432 : vector<8x128xf32>
    %434 = arith.addf %430, %433 : vector<8x128xf32>
    %c2_180 = arith.constant 2 : index
    %c21_181 = arith.constant 21 : index
    %435 = memref.load %arg2[%c2_180, %c21_181] : memref<3x64xf32, #tpu.memory_space<smem>>
    %436 = vector.broadcast %435 : f32 to vector<8x128xf32>
    %437 = arith.mulf %5, %436 : vector<8x128xf32>
    %c21_182 = arith.constant 21 : index
    %438 = memref.load %arg3[%c21_182] : memref<64xf32, #tpu.memory_space<smem>>
    %439 = vector.broadcast %438 : f32 to vector<8x128xf32>
    %440 = arith.addf %437, %439 : vector<8x128xf32>
    %441 = arith.addf %434, %440 : vector<8x128xf32>
    %cst_183 = arith.constant 0.000000e+00 : f32
    %442 = vector.broadcast %cst_183 : f32 to vector<8x128xf32>
    %443 = arith.maximumf %441, %442 : vector<8x128xf32>
    %c21_184 = arith.constant 21 : index
    %444 = memref.load %arg4[%c21_184] : memref<64xf32, #tpu.memory_space<smem>>
    %445 = vector.broadcast %444 : f32 to vector<8x128xf32>
    %446 = arith.mulf %443, %445 : vector<8x128xf32>
    %447 = arith.addf %427, %446 : vector<8x128xf32>
    %c0_185 = arith.constant 0 : index
    %c22 = arith.constant 22 : index
    %448 = memref.load %arg2[%c0_185, %c22] : memref<3x64xf32, #tpu.memory_space<smem>>
    %449 = vector.broadcast %448 : f32 to vector<8x128xf32>
    %450 = arith.mulf %1, %449 : vector<8x128xf32>
    %c1_186 = arith.constant 1 : index
    %c22_187 = arith.constant 22 : index
    %451 = memref.load %arg2[%c1_186, %c22_187] : memref<3x64xf32, #tpu.memory_space<smem>>
    %452 = vector.broadcast %451 : f32 to vector<8x128xf32>
    %453 = arith.mulf %3, %452 : vector<8x128xf32>
    %454 = arith.addf %450, %453 : vector<8x128xf32>
    %c2_188 = arith.constant 2 : index
    %c22_189 = arith.constant 22 : index
    %455 = memref.load %arg2[%c2_188, %c22_189] : memref<3x64xf32, #tpu.memory_space<smem>>
    %456 = vector.broadcast %455 : f32 to vector<8x128xf32>
    %457 = arith.mulf %5, %456 : vector<8x128xf32>
    %c22_190 = arith.constant 22 : index
    %458 = memref.load %arg3[%c22_190] : memref<64xf32, #tpu.memory_space<smem>>
    %459 = vector.broadcast %458 : f32 to vector<8x128xf32>
    %460 = arith.addf %457, %459 : vector<8x128xf32>
    %461 = arith.addf %454, %460 : vector<8x128xf32>
    %cst_191 = arith.constant 0.000000e+00 : f32
    %462 = vector.broadcast %cst_191 : f32 to vector<8x128xf32>
    %463 = arith.maximumf %461, %462 : vector<8x128xf32>
    %c22_192 = arith.constant 22 : index
    %464 = memref.load %arg4[%c22_192] : memref<64xf32, #tpu.memory_space<smem>>
    %465 = vector.broadcast %464 : f32 to vector<8x128xf32>
    %466 = arith.mulf %463, %465 : vector<8x128xf32>
    %467 = arith.addf %447, %466 : vector<8x128xf32>
    %c0_193 = arith.constant 0 : index
    %c23 = arith.constant 23 : index
    %468 = memref.load %arg2[%c0_193, %c23] : memref<3x64xf32, #tpu.memory_space<smem>>
    %469 = vector.broadcast %468 : f32 to vector<8x128xf32>
    %470 = arith.mulf %1, %469 : vector<8x128xf32>
    %c1_194 = arith.constant 1 : index
    %c23_195 = arith.constant 23 : index
    %471 = memref.load %arg2[%c1_194, %c23_195] : memref<3x64xf32, #tpu.memory_space<smem>>
    %472 = vector.broadcast %471 : f32 to vector<8x128xf32>
    %473 = arith.mulf %3, %472 : vector<8x128xf32>
    %474 = arith.addf %470, %473 : vector<8x128xf32>
    %c2_196 = arith.constant 2 : index
    %c23_197 = arith.constant 23 : index
    %475 = memref.load %arg2[%c2_196, %c23_197] : memref<3x64xf32, #tpu.memory_space<smem>>
    %476 = vector.broadcast %475 : f32 to vector<8x128xf32>
    %477 = arith.mulf %5, %476 : vector<8x128xf32>
    %c23_198 = arith.constant 23 : index
    %478 = memref.load %arg3[%c23_198] : memref<64xf32, #tpu.memory_space<smem>>
    %479 = vector.broadcast %478 : f32 to vector<8x128xf32>
    %480 = arith.addf %477, %479 : vector<8x128xf32>
    %481 = arith.addf %474, %480 : vector<8x128xf32>
    %cst_199 = arith.constant 0.000000e+00 : f32
    %482 = vector.broadcast %cst_199 : f32 to vector<8x128xf32>
    %483 = arith.maximumf %481, %482 : vector<8x128xf32>
    %c23_200 = arith.constant 23 : index
    %484 = memref.load %arg4[%c23_200] : memref<64xf32, #tpu.memory_space<smem>>
    %485 = vector.broadcast %484 : f32 to vector<8x128xf32>
    %486 = arith.mulf %483, %485 : vector<8x128xf32>
    %487 = arith.addf %467, %486 : vector<8x128xf32>
    %c0_201 = arith.constant 0 : index
    %c24 = arith.constant 24 : index
    %488 = memref.load %arg2[%c0_201, %c24] : memref<3x64xf32, #tpu.memory_space<smem>>
    %489 = vector.broadcast %488 : f32 to vector<8x128xf32>
    %490 = arith.mulf %1, %489 : vector<8x128xf32>
    %c1_202 = arith.constant 1 : index
    %c24_203 = arith.constant 24 : index
    %491 = memref.load %arg2[%c1_202, %c24_203] : memref<3x64xf32, #tpu.memory_space<smem>>
    %492 = vector.broadcast %491 : f32 to vector<8x128xf32>
    %493 = arith.mulf %3, %492 : vector<8x128xf32>
    %494 = arith.addf %490, %493 : vector<8x128xf32>
    %c2_204 = arith.constant 2 : index
    %c24_205 = arith.constant 24 : index
    %495 = memref.load %arg2[%c2_204, %c24_205] : memref<3x64xf32, #tpu.memory_space<smem>>
    %496 = vector.broadcast %495 : f32 to vector<8x128xf32>
    %497 = arith.mulf %5, %496 : vector<8x128xf32>
    %c24_206 = arith.constant 24 : index
    %498 = memref.load %arg3[%c24_206] : memref<64xf32, #tpu.memory_space<smem>>
    %499 = vector.broadcast %498 : f32 to vector<8x128xf32>
    %500 = arith.addf %497, %499 : vector<8x128xf32>
    %501 = arith.addf %494, %500 : vector<8x128xf32>
    %cst_207 = arith.constant 0.000000e+00 : f32
    %502 = vector.broadcast %cst_207 : f32 to vector<8x128xf32>
    %503 = arith.maximumf %501, %502 : vector<8x128xf32>
    %c24_208 = arith.constant 24 : index
    %504 = memref.load %arg4[%c24_208] : memref<64xf32, #tpu.memory_space<smem>>
    %505 = vector.broadcast %504 : f32 to vector<8x128xf32>
    %506 = arith.mulf %503, %505 : vector<8x128xf32>
    %507 = arith.addf %487, %506 : vector<8x128xf32>
    %c0_209 = arith.constant 0 : index
    %c25 = arith.constant 25 : index
    %508 = memref.load %arg2[%c0_209, %c25] : memref<3x64xf32, #tpu.memory_space<smem>>
    %509 = vector.broadcast %508 : f32 to vector<8x128xf32>
    %510 = arith.mulf %1, %509 : vector<8x128xf32>
    %c1_210 = arith.constant 1 : index
    %c25_211 = arith.constant 25 : index
    %511 = memref.load %arg2[%c1_210, %c25_211] : memref<3x64xf32, #tpu.memory_space<smem>>
    %512 = vector.broadcast %511 : f32 to vector<8x128xf32>
    %513 = arith.mulf %3, %512 : vector<8x128xf32>
    %514 = arith.addf %510, %513 : vector<8x128xf32>
    %c2_212 = arith.constant 2 : index
    %c25_213 = arith.constant 25 : index
    %515 = memref.load %arg2[%c2_212, %c25_213] : memref<3x64xf32, #tpu.memory_space<smem>>
    %516 = vector.broadcast %515 : f32 to vector<8x128xf32>
    %517 = arith.mulf %5, %516 : vector<8x128xf32>
    %c25_214 = arith.constant 25 : index
    %518 = memref.load %arg3[%c25_214] : memref<64xf32, #tpu.memory_space<smem>>
    %519 = vector.broadcast %518 : f32 to vector<8x128xf32>
    %520 = arith.addf %517, %519 : vector<8x128xf32>
    %521 = arith.addf %514, %520 : vector<8x128xf32>
    %cst_215 = arith.constant 0.000000e+00 : f32
    %522 = vector.broadcast %cst_215 : f32 to vector<8x128xf32>
    %523 = arith.maximumf %521, %522 : vector<8x128xf32>
    %c25_216 = arith.constant 25 : index
    %524 = memref.load %arg4[%c25_216] : memref<64xf32, #tpu.memory_space<smem>>
    %525 = vector.broadcast %524 : f32 to vector<8x128xf32>
    %526 = arith.mulf %523, %525 : vector<8x128xf32>
    %527 = arith.addf %507, %526 : vector<8x128xf32>
    %c0_217 = arith.constant 0 : index
    %c26 = arith.constant 26 : index
    %528 = memref.load %arg2[%c0_217, %c26] : memref<3x64xf32, #tpu.memory_space<smem>>
    %529 = vector.broadcast %528 : f32 to vector<8x128xf32>
    %530 = arith.mulf %1, %529 : vector<8x128xf32>
    %c1_218 = arith.constant 1 : index
    %c26_219 = arith.constant 26 : index
    %531 = memref.load %arg2[%c1_218, %c26_219] : memref<3x64xf32, #tpu.memory_space<smem>>
    %532 = vector.broadcast %531 : f32 to vector<8x128xf32>
    %533 = arith.mulf %3, %532 : vector<8x128xf32>
    %534 = arith.addf %530, %533 : vector<8x128xf32>
    %c2_220 = arith.constant 2 : index
    %c26_221 = arith.constant 26 : index
    %535 = memref.load %arg2[%c2_220, %c26_221] : memref<3x64xf32, #tpu.memory_space<smem>>
    %536 = vector.broadcast %535 : f32 to vector<8x128xf32>
    %537 = arith.mulf %5, %536 : vector<8x128xf32>
    %c26_222 = arith.constant 26 : index
    %538 = memref.load %arg3[%c26_222] : memref<64xf32, #tpu.memory_space<smem>>
    %539 = vector.broadcast %538 : f32 to vector<8x128xf32>
    %540 = arith.addf %537, %539 : vector<8x128xf32>
    %541 = arith.addf %534, %540 : vector<8x128xf32>
    %cst_223 = arith.constant 0.000000e+00 : f32
    %542 = vector.broadcast %cst_223 : f32 to vector<8x128xf32>
    %543 = arith.maximumf %541, %542 : vector<8x128xf32>
    %c26_224 = arith.constant 26 : index
    %544 = memref.load %arg4[%c26_224] : memref<64xf32, #tpu.memory_space<smem>>
    %545 = vector.broadcast %544 : f32 to vector<8x128xf32>
    %546 = arith.mulf %543, %545 : vector<8x128xf32>
    %547 = arith.addf %527, %546 : vector<8x128xf32>
    %c0_225 = arith.constant 0 : index
    %c27 = arith.constant 27 : index
    %548 = memref.load %arg2[%c0_225, %c27] : memref<3x64xf32, #tpu.memory_space<smem>>
    %549 = vector.broadcast %548 : f32 to vector<8x128xf32>
    %550 = arith.mulf %1, %549 : vector<8x128xf32>
    %c1_226 = arith.constant 1 : index
    %c27_227 = arith.constant 27 : index
    %551 = memref.load %arg2[%c1_226, %c27_227] : memref<3x64xf32, #tpu.memory_space<smem>>
    %552 = vector.broadcast %551 : f32 to vector<8x128xf32>
    %553 = arith.mulf %3, %552 : vector<8x128xf32>
    %554 = arith.addf %550, %553 : vector<8x128xf32>
    %c2_228 = arith.constant 2 : index
    %c27_229 = arith.constant 27 : index
    %555 = memref.load %arg2[%c2_228, %c27_229] : memref<3x64xf32, #tpu.memory_space<smem>>
    %556 = vector.broadcast %555 : f32 to vector<8x128xf32>
    %557 = arith.mulf %5, %556 : vector<8x128xf32>
    %c27_230 = arith.constant 27 : index
    %558 = memref.load %arg3[%c27_230] : memref<64xf32, #tpu.memory_space<smem>>
    %559 = vector.broadcast %558 : f32 to vector<8x128xf32>
    %560 = arith.addf %557, %559 : vector<8x128xf32>
    %561 = arith.addf %554, %560 : vector<8x128xf32>
    %cst_231 = arith.constant 0.000000e+00 : f32
    %562 = vector.broadcast %cst_231 : f32 to vector<8x128xf32>
    %563 = arith.maximumf %561, %562 : vector<8x128xf32>
    %c27_232 = arith.constant 27 : index
    %564 = memref.load %arg4[%c27_232] : memref<64xf32, #tpu.memory_space<smem>>
    %565 = vector.broadcast %564 : f32 to vector<8x128xf32>
    %566 = arith.mulf %563, %565 : vector<8x128xf32>
    %567 = arith.addf %547, %566 : vector<8x128xf32>
    %c0_233 = arith.constant 0 : index
    %c28 = arith.constant 28 : index
    %568 = memref.load %arg2[%c0_233, %c28] : memref<3x64xf32, #tpu.memory_space<smem>>
    %569 = vector.broadcast %568 : f32 to vector<8x128xf32>
    %570 = arith.mulf %1, %569 : vector<8x128xf32>
    %c1_234 = arith.constant 1 : index
    %c28_235 = arith.constant 28 : index
    %571 = memref.load %arg2[%c1_234, %c28_235] : memref<3x64xf32, #tpu.memory_space<smem>>
    %572 = vector.broadcast %571 : f32 to vector<8x128xf32>
    %573 = arith.mulf %3, %572 : vector<8x128xf32>
    %574 = arith.addf %570, %573 : vector<8x128xf32>
    %c2_236 = arith.constant 2 : index
    %c28_237 = arith.constant 28 : index
    %575 = memref.load %arg2[%c2_236, %c28_237] : memref<3x64xf32, #tpu.memory_space<smem>>
    %576 = vector.broadcast %575 : f32 to vector<8x128xf32>
    %577 = arith.mulf %5, %576 : vector<8x128xf32>
    %c28_238 = arith.constant 28 : index
    %578 = memref.load %arg3[%c28_238] : memref<64xf32, #tpu.memory_space<smem>>
    %579 = vector.broadcast %578 : f32 to vector<8x128xf32>
    %580 = arith.addf %577, %579 : vector<8x128xf32>
    %581 = arith.addf %574, %580 : vector<8x128xf32>
    %cst_239 = arith.constant 0.000000e+00 : f32
    %582 = vector.broadcast %cst_239 : f32 to vector<8x128xf32>
    %583 = arith.maximumf %581, %582 : vector<8x128xf32>
    %c28_240 = arith.constant 28 : index
    %584 = memref.load %arg4[%c28_240] : memref<64xf32, #tpu.memory_space<smem>>
    %585 = vector.broadcast %584 : f32 to vector<8x128xf32>
    %586 = arith.mulf %583, %585 : vector<8x128xf32>
    %587 = arith.addf %567, %586 : vector<8x128xf32>
    %c0_241 = arith.constant 0 : index
    %c29 = arith.constant 29 : index
    %588 = memref.load %arg2[%c0_241, %c29] : memref<3x64xf32, #tpu.memory_space<smem>>
    %589 = vector.broadcast %588 : f32 to vector<8x128xf32>
    %590 = arith.mulf %1, %589 : vector<8x128xf32>
    %c1_242 = arith.constant 1 : index
    %c29_243 = arith.constant 29 : index
    %591 = memref.load %arg2[%c1_242, %c29_243] : memref<3x64xf32, #tpu.memory_space<smem>>
    %592 = vector.broadcast %591 : f32 to vector<8x128xf32>
    %593 = arith.mulf %3, %592 : vector<8x128xf32>
    %594 = arith.addf %590, %593 : vector<8x128xf32>
    %c2_244 = arith.constant 2 : index
    %c29_245 = arith.constant 29 : index
    %595 = memref.load %arg2[%c2_244, %c29_245] : memref<3x64xf32, #tpu.memory_space<smem>>
    %596 = vector.broadcast %595 : f32 to vector<8x128xf32>
    %597 = arith.mulf %5, %596 : vector<8x128xf32>
    %c29_246 = arith.constant 29 : index
    %598 = memref.load %arg3[%c29_246] : memref<64xf32, #tpu.memory_space<smem>>
    %599 = vector.broadcast %598 : f32 to vector<8x128xf32>
    %600 = arith.addf %597, %599 : vector<8x128xf32>
    %601 = arith.addf %594, %600 : vector<8x128xf32>
    %cst_247 = arith.constant 0.000000e+00 : f32
    %602 = vector.broadcast %cst_247 : f32 to vector<8x128xf32>
    %603 = arith.maximumf %601, %602 : vector<8x128xf32>
    %c29_248 = arith.constant 29 : index
    %604 = memref.load %arg4[%c29_248] : memref<64xf32, #tpu.memory_space<smem>>
    %605 = vector.broadcast %604 : f32 to vector<8x128xf32>
    %606 = arith.mulf %603, %605 : vector<8x128xf32>
    %607 = arith.addf %587, %606 : vector<8x128xf32>
    %c0_249 = arith.constant 0 : index
    %c30 = arith.constant 30 : index
    %608 = memref.load %arg2[%c0_249, %c30] : memref<3x64xf32, #tpu.memory_space<smem>>
    %609 = vector.broadcast %608 : f32 to vector<8x128xf32>
    %610 = arith.mulf %1, %609 : vector<8x128xf32>
    %c1_250 = arith.constant 1 : index
    %c30_251 = arith.constant 30 : index
    %611 = memref.load %arg2[%c1_250, %c30_251] : memref<3x64xf32, #tpu.memory_space<smem>>
    %612 = vector.broadcast %611 : f32 to vector<8x128xf32>
    %613 = arith.mulf %3, %612 : vector<8x128xf32>
    %614 = arith.addf %610, %613 : vector<8x128xf32>
    %c2_252 = arith.constant 2 : index
    %c30_253 = arith.constant 30 : index
    %615 = memref.load %arg2[%c2_252, %c30_253] : memref<3x64xf32, #tpu.memory_space<smem>>
    %616 = vector.broadcast %615 : f32 to vector<8x128xf32>
    %617 = arith.mulf %5, %616 : vector<8x128xf32>
    %c30_254 = arith.constant 30 : index
    %618 = memref.load %arg3[%c30_254] : memref<64xf32, #tpu.memory_space<smem>>
    %619 = vector.broadcast %618 : f32 to vector<8x128xf32>
    %620 = arith.addf %617, %619 : vector<8x128xf32>
    %621 = arith.addf %614, %620 : vector<8x128xf32>
    %cst_255 = arith.constant 0.000000e+00 : f32
    %622 = vector.broadcast %cst_255 : f32 to vector<8x128xf32>
    %623 = arith.maximumf %621, %622 : vector<8x128xf32>
    %c30_256 = arith.constant 30 : index
    %624 = memref.load %arg4[%c30_256] : memref<64xf32, #tpu.memory_space<smem>>
    %625 = vector.broadcast %624 : f32 to vector<8x128xf32>
    %626 = arith.mulf %623, %625 : vector<8x128xf32>
    %627 = arith.addf %607, %626 : vector<8x128xf32>
    %c0_257 = arith.constant 0 : index
    %c31 = arith.constant 31 : index
    %628 = memref.load %arg2[%c0_257, %c31] : memref<3x64xf32, #tpu.memory_space<smem>>
    %629 = vector.broadcast %628 : f32 to vector<8x128xf32>
    %630 = arith.mulf %1, %629 : vector<8x128xf32>
    %c1_258 = arith.constant 1 : index
    %c31_259 = arith.constant 31 : index
    %631 = memref.load %arg2[%c1_258, %c31_259] : memref<3x64xf32, #tpu.memory_space<smem>>
    %632 = vector.broadcast %631 : f32 to vector<8x128xf32>
    %633 = arith.mulf %3, %632 : vector<8x128xf32>
    %634 = arith.addf %630, %633 : vector<8x128xf32>
    %c2_260 = arith.constant 2 : index
    %c31_261 = arith.constant 31 : index
    %635 = memref.load %arg2[%c2_260, %c31_261] : memref<3x64xf32, #tpu.memory_space<smem>>
    %636 = vector.broadcast %635 : f32 to vector<8x128xf32>
    %637 = arith.mulf %5, %636 : vector<8x128xf32>
    %c31_262 = arith.constant 31 : index
    %638 = memref.load %arg3[%c31_262] : memref<64xf32, #tpu.memory_space<smem>>
    %639 = vector.broadcast %638 : f32 to vector<8x128xf32>
    %640 = arith.addf %637, %639 : vector<8x128xf32>
    %641 = arith.addf %634, %640 : vector<8x128xf32>
    %cst_263 = arith.constant 0.000000e+00 : f32
    %642 = vector.broadcast %cst_263 : f32 to vector<8x128xf32>
    %643 = arith.maximumf %641, %642 : vector<8x128xf32>
    %c31_264 = arith.constant 31 : index
    %644 = memref.load %arg4[%c31_264] : memref<64xf32, #tpu.memory_space<smem>>
    %645 = vector.broadcast %644 : f32 to vector<8x128xf32>
    %646 = arith.mulf %643, %645 : vector<8x128xf32>
    %647 = arith.addf %627, %646 : vector<8x128xf32>
    %c0_265 = arith.constant 0 : index
    %c32 = arith.constant 32 : index
    %648 = memref.load %arg2[%c0_265, %c32] : memref<3x64xf32, #tpu.memory_space<smem>>
    %649 = vector.broadcast %648 : f32 to vector<8x128xf32>
    %650 = arith.mulf %1, %649 : vector<8x128xf32>
    %c1_266 = arith.constant 1 : index
    %c32_267 = arith.constant 32 : index
    %651 = memref.load %arg2[%c1_266, %c32_267] : memref<3x64xf32, #tpu.memory_space<smem>>
    %652 = vector.broadcast %651 : f32 to vector<8x128xf32>
    %653 = arith.mulf %3, %652 : vector<8x128xf32>
    %654 = arith.addf %650, %653 : vector<8x128xf32>
    %c2_268 = arith.constant 2 : index
    %c32_269 = arith.constant 32 : index
    %655 = memref.load %arg2[%c2_268, %c32_269] : memref<3x64xf32, #tpu.memory_space<smem>>
    %656 = vector.broadcast %655 : f32 to vector<8x128xf32>
    %657 = arith.mulf %5, %656 : vector<8x128xf32>
    %c32_270 = arith.constant 32 : index
    %658 = memref.load %arg3[%c32_270] : memref<64xf32, #tpu.memory_space<smem>>
    %659 = vector.broadcast %658 : f32 to vector<8x128xf32>
    %660 = arith.addf %657, %659 : vector<8x128xf32>
    %661 = arith.addf %654, %660 : vector<8x128xf32>
    %cst_271 = arith.constant 0.000000e+00 : f32
    %662 = vector.broadcast %cst_271 : f32 to vector<8x128xf32>
    %663 = arith.maximumf %661, %662 : vector<8x128xf32>
    %c32_272 = arith.constant 32 : index
    %664 = memref.load %arg4[%c32_272] : memref<64xf32, #tpu.memory_space<smem>>
    %665 = vector.broadcast %664 : f32 to vector<8x128xf32>
    %666 = arith.mulf %663, %665 : vector<8x128xf32>
    %667 = arith.addf %647, %666 : vector<8x128xf32>
    %c0_273 = arith.constant 0 : index
    %c33 = arith.constant 33 : index
    %668 = memref.load %arg2[%c0_273, %c33] : memref<3x64xf32, #tpu.memory_space<smem>>
    %669 = vector.broadcast %668 : f32 to vector<8x128xf32>
    %670 = arith.mulf %1, %669 : vector<8x128xf32>
    %c1_274 = arith.constant 1 : index
    %c33_275 = arith.constant 33 : index
    %671 = memref.load %arg2[%c1_274, %c33_275] : memref<3x64xf32, #tpu.memory_space<smem>>
    %672 = vector.broadcast %671 : f32 to vector<8x128xf32>
    %673 = arith.mulf %3, %672 : vector<8x128xf32>
    %674 = arith.addf %670, %673 : vector<8x128xf32>
    %c2_276 = arith.constant 2 : index
    %c33_277 = arith.constant 33 : index
    %675 = memref.load %arg2[%c2_276, %c33_277] : memref<3x64xf32, #tpu.memory_space<smem>>
    %676 = vector.broadcast %675 : f32 to vector<8x128xf32>
    %677 = arith.mulf %5, %676 : vector<8x128xf32>
    %c33_278 = arith.constant 33 : index
    %678 = memref.load %arg3[%c33_278] : memref<64xf32, #tpu.memory_space<smem>>
    %679 = vector.broadcast %678 : f32 to vector<8x128xf32>
    %680 = arith.addf %677, %679 : vector<8x128xf32>
    %681 = arith.addf %674, %680 : vector<8x128xf32>
    %cst_279 = arith.constant 0.000000e+00 : f32
    %682 = vector.broadcast %cst_279 : f32 to vector<8x128xf32>
    %683 = arith.maximumf %681, %682 : vector<8x128xf32>
    %c33_280 = arith.constant 33 : index
    %684 = memref.load %arg4[%c33_280] : memref<64xf32, #tpu.memory_space<smem>>
    %685 = vector.broadcast %684 : f32 to vector<8x128xf32>
    %686 = arith.mulf %683, %685 : vector<8x128xf32>
    %687 = arith.addf %667, %686 : vector<8x128xf32>
    %c0_281 = arith.constant 0 : index
    %c34 = arith.constant 34 : index
    %688 = memref.load %arg2[%c0_281, %c34] : memref<3x64xf32, #tpu.memory_space<smem>>
    %689 = vector.broadcast %688 : f32 to vector<8x128xf32>
    %690 = arith.mulf %1, %689 : vector<8x128xf32>
    %c1_282 = arith.constant 1 : index
    %c34_283 = arith.constant 34 : index
    %691 = memref.load %arg2[%c1_282, %c34_283] : memref<3x64xf32, #tpu.memory_space<smem>>
    %692 = vector.broadcast %691 : f32 to vector<8x128xf32>
    %693 = arith.mulf %3, %692 : vector<8x128xf32>
    %694 = arith.addf %690, %693 : vector<8x128xf32>
    %c2_284 = arith.constant 2 : index
    %c34_285 = arith.constant 34 : index
    %695 = memref.load %arg2[%c2_284, %c34_285] : memref<3x64xf32, #tpu.memory_space<smem>>
    %696 = vector.broadcast %695 : f32 to vector<8x128xf32>
    %697 = arith.mulf %5, %696 : vector<8x128xf32>
    %c34_286 = arith.constant 34 : index
    %698 = memref.load %arg3[%c34_286] : memref<64xf32, #tpu.memory_space<smem>>
    %699 = vector.broadcast %698 : f32 to vector<8x128xf32>
    %700 = arith.addf %697, %699 : vector<8x128xf32>
    %701 = arith.addf %694, %700 : vector<8x128xf32>
    %cst_287 = arith.constant 0.000000e+00 : f32
    %702 = vector.broadcast %cst_287 : f32 to vector<8x128xf32>
    %703 = arith.maximumf %701, %702 : vector<8x128xf32>
    %c34_288 = arith.constant 34 : index
    %704 = memref.load %arg4[%c34_288] : memref<64xf32, #tpu.memory_space<smem>>
    %705 = vector.broadcast %704 : f32 to vector<8x128xf32>
    %706 = arith.mulf %703, %705 : vector<8x128xf32>
    %707 = arith.addf %687, %706 : vector<8x128xf32>
    %c0_289 = arith.constant 0 : index
    %c35 = arith.constant 35 : index
    %708 = memref.load %arg2[%c0_289, %c35] : memref<3x64xf32, #tpu.memory_space<smem>>
    %709 = vector.broadcast %708 : f32 to vector<8x128xf32>
    %710 = arith.mulf %1, %709 : vector<8x128xf32>
    %c1_290 = arith.constant 1 : index
    %c35_291 = arith.constant 35 : index
    %711 = memref.load %arg2[%c1_290, %c35_291] : memref<3x64xf32, #tpu.memory_space<smem>>
    %712 = vector.broadcast %711 : f32 to vector<8x128xf32>
    %713 = arith.mulf %3, %712 : vector<8x128xf32>
    %714 = arith.addf %710, %713 : vector<8x128xf32>
    %c2_292 = arith.constant 2 : index
    %c35_293 = arith.constant 35 : index
    %715 = memref.load %arg2[%c2_292, %c35_293] : memref<3x64xf32, #tpu.memory_space<smem>>
    %716 = vector.broadcast %715 : f32 to vector<8x128xf32>
    %717 = arith.mulf %5, %716 : vector<8x128xf32>
    %c35_294 = arith.constant 35 : index
    %718 = memref.load %arg3[%c35_294] : memref<64xf32, #tpu.memory_space<smem>>
    %719 = vector.broadcast %718 : f32 to vector<8x128xf32>
    %720 = arith.addf %717, %719 : vector<8x128xf32>
    %721 = arith.addf %714, %720 : vector<8x128xf32>
    %cst_295 = arith.constant 0.000000e+00 : f32
    %722 = vector.broadcast %cst_295 : f32 to vector<8x128xf32>
    %723 = arith.maximumf %721, %722 : vector<8x128xf32>
    %c35_296 = arith.constant 35 : index
    %724 = memref.load %arg4[%c35_296] : memref<64xf32, #tpu.memory_space<smem>>
    %725 = vector.broadcast %724 : f32 to vector<8x128xf32>
    %726 = arith.mulf %723, %725 : vector<8x128xf32>
    %727 = arith.addf %707, %726 : vector<8x128xf32>
    %c0_297 = arith.constant 0 : index
    %c36 = arith.constant 36 : index
    %728 = memref.load %arg2[%c0_297, %c36] : memref<3x64xf32, #tpu.memory_space<smem>>
    %729 = vector.broadcast %728 : f32 to vector<8x128xf32>
    %730 = arith.mulf %1, %729 : vector<8x128xf32>
    %c1_298 = arith.constant 1 : index
    %c36_299 = arith.constant 36 : index
    %731 = memref.load %arg2[%c1_298, %c36_299] : memref<3x64xf32, #tpu.memory_space<smem>>
    %732 = vector.broadcast %731 : f32 to vector<8x128xf32>
    %733 = arith.mulf %3, %732 : vector<8x128xf32>
    %734 = arith.addf %730, %733 : vector<8x128xf32>
    %c2_300 = arith.constant 2 : index
    %c36_301 = arith.constant 36 : index
    %735 = memref.load %arg2[%c2_300, %c36_301] : memref<3x64xf32, #tpu.memory_space<smem>>
    %736 = vector.broadcast %735 : f32 to vector<8x128xf32>
    %737 = arith.mulf %5, %736 : vector<8x128xf32>
    %c36_302 = arith.constant 36 : index
    %738 = memref.load %arg3[%c36_302] : memref<64xf32, #tpu.memory_space<smem>>
    %739 = vector.broadcast %738 : f32 to vector<8x128xf32>
    %740 = arith.addf %737, %739 : vector<8x128xf32>
    %741 = arith.addf %734, %740 : vector<8x128xf32>
    %cst_303 = arith.constant 0.000000e+00 : f32
    %742 = vector.broadcast %cst_303 : f32 to vector<8x128xf32>
    %743 = arith.maximumf %741, %742 : vector<8x128xf32>
    %c36_304 = arith.constant 36 : index
    %744 = memref.load %arg4[%c36_304] : memref<64xf32, #tpu.memory_space<smem>>
    %745 = vector.broadcast %744 : f32 to vector<8x128xf32>
    %746 = arith.mulf %743, %745 : vector<8x128xf32>
    %747 = arith.addf %727, %746 : vector<8x128xf32>
    %c0_305 = arith.constant 0 : index
    %c37 = arith.constant 37 : index
    %748 = memref.load %arg2[%c0_305, %c37] : memref<3x64xf32, #tpu.memory_space<smem>>
    %749 = vector.broadcast %748 : f32 to vector<8x128xf32>
    %750 = arith.mulf %1, %749 : vector<8x128xf32>
    %c1_306 = arith.constant 1 : index
    %c37_307 = arith.constant 37 : index
    %751 = memref.load %arg2[%c1_306, %c37_307] : memref<3x64xf32, #tpu.memory_space<smem>>
    %752 = vector.broadcast %751 : f32 to vector<8x128xf32>
    %753 = arith.mulf %3, %752 : vector<8x128xf32>
    %754 = arith.addf %750, %753 : vector<8x128xf32>
    %c2_308 = arith.constant 2 : index
    %c37_309 = arith.constant 37 : index
    %755 = memref.load %arg2[%c2_308, %c37_309] : memref<3x64xf32, #tpu.memory_space<smem>>
    %756 = vector.broadcast %755 : f32 to vector<8x128xf32>
    %757 = arith.mulf %5, %756 : vector<8x128xf32>
    %c37_310 = arith.constant 37 : index
    %758 = memref.load %arg3[%c37_310] : memref<64xf32, #tpu.memory_space<smem>>
    %759 = vector.broadcast %758 : f32 to vector<8x128xf32>
    %760 = arith.addf %757, %759 : vector<8x128xf32>
    %761 = arith.addf %754, %760 : vector<8x128xf32>
    %cst_311 = arith.constant 0.000000e+00 : f32
    %762 = vector.broadcast %cst_311 : f32 to vector<8x128xf32>
    %763 = arith.maximumf %761, %762 : vector<8x128xf32>
    %c37_312 = arith.constant 37 : index
    %764 = memref.load %arg4[%c37_312] : memref<64xf32, #tpu.memory_space<smem>>
    %765 = vector.broadcast %764 : f32 to vector<8x128xf32>
    %766 = arith.mulf %763, %765 : vector<8x128xf32>
    %767 = arith.addf %747, %766 : vector<8x128xf32>
    %c0_313 = arith.constant 0 : index
    %c38 = arith.constant 38 : index
    %768 = memref.load %arg2[%c0_313, %c38] : memref<3x64xf32, #tpu.memory_space<smem>>
    %769 = vector.broadcast %768 : f32 to vector<8x128xf32>
    %770 = arith.mulf %1, %769 : vector<8x128xf32>
    %c1_314 = arith.constant 1 : index
    %c38_315 = arith.constant 38 : index
    %771 = memref.load %arg2[%c1_314, %c38_315] : memref<3x64xf32, #tpu.memory_space<smem>>
    %772 = vector.broadcast %771 : f32 to vector<8x128xf32>
    %773 = arith.mulf %3, %772 : vector<8x128xf32>
    %774 = arith.addf %770, %773 : vector<8x128xf32>
    %c2_316 = arith.constant 2 : index
    %c38_317 = arith.constant 38 : index
    %775 = memref.load %arg2[%c2_316, %c38_317] : memref<3x64xf32, #tpu.memory_space<smem>>
    %776 = vector.broadcast %775 : f32 to vector<8x128xf32>
    %777 = arith.mulf %5, %776 : vector<8x128xf32>
    %c38_318 = arith.constant 38 : index
    %778 = memref.load %arg3[%c38_318] : memref<64xf32, #tpu.memory_space<smem>>
    %779 = vector.broadcast %778 : f32 to vector<8x128xf32>
    %780 = arith.addf %777, %779 : vector<8x128xf32>
    %781 = arith.addf %774, %780 : vector<8x128xf32>
    %cst_319 = arith.constant 0.000000e+00 : f32
    %782 = vector.broadcast %cst_319 : f32 to vector<8x128xf32>
    %783 = arith.maximumf %781, %782 : vector<8x128xf32>
    %c38_320 = arith.constant 38 : index
    %784 = memref.load %arg4[%c38_320] : memref<64xf32, #tpu.memory_space<smem>>
    %785 = vector.broadcast %784 : f32 to vector<8x128xf32>
    %786 = arith.mulf %783, %785 : vector<8x128xf32>
    %787 = arith.addf %767, %786 : vector<8x128xf32>
    %c0_321 = arith.constant 0 : index
    %c39 = arith.constant 39 : index
    %788 = memref.load %arg2[%c0_321, %c39] : memref<3x64xf32, #tpu.memory_space<smem>>
    %789 = vector.broadcast %788 : f32 to vector<8x128xf32>
    %790 = arith.mulf %1, %789 : vector<8x128xf32>
    %c1_322 = arith.constant 1 : index
    %c39_323 = arith.constant 39 : index
    %791 = memref.load %arg2[%c1_322, %c39_323] : memref<3x64xf32, #tpu.memory_space<smem>>
    %792 = vector.broadcast %791 : f32 to vector<8x128xf32>
    %793 = arith.mulf %3, %792 : vector<8x128xf32>
    %794 = arith.addf %790, %793 : vector<8x128xf32>
    %c2_324 = arith.constant 2 : index
    %c39_325 = arith.constant 39 : index
    %795 = memref.load %arg2[%c2_324, %c39_325] : memref<3x64xf32, #tpu.memory_space<smem>>
    %796 = vector.broadcast %795 : f32 to vector<8x128xf32>
    %797 = arith.mulf %5, %796 : vector<8x128xf32>
    %c39_326 = arith.constant 39 : index
    %798 = memref.load %arg3[%c39_326] : memref<64xf32, #tpu.memory_space<smem>>
    %799 = vector.broadcast %798 : f32 to vector<8x128xf32>
    %800 = arith.addf %797, %799 : vector<8x128xf32>
    %801 = arith.addf %794, %800 : vector<8x128xf32>
    %cst_327 = arith.constant 0.000000e+00 : f32
    %802 = vector.broadcast %cst_327 : f32 to vector<8x128xf32>
    %803 = arith.maximumf %801, %802 : vector<8x128xf32>
    %c39_328 = arith.constant 39 : index
    %804 = memref.load %arg4[%c39_328] : memref<64xf32, #tpu.memory_space<smem>>
    %805 = vector.broadcast %804 : f32 to vector<8x128xf32>
    %806 = arith.mulf %803, %805 : vector<8x128xf32>
    %807 = arith.addf %787, %806 : vector<8x128xf32>
    %c0_329 = arith.constant 0 : index
    %c40 = arith.constant 40 : index
    %808 = memref.load %arg2[%c0_329, %c40] : memref<3x64xf32, #tpu.memory_space<smem>>
    %809 = vector.broadcast %808 : f32 to vector<8x128xf32>
    %810 = arith.mulf %1, %809 : vector<8x128xf32>
    %c1_330 = arith.constant 1 : index
    %c40_331 = arith.constant 40 : index
    %811 = memref.load %arg2[%c1_330, %c40_331] : memref<3x64xf32, #tpu.memory_space<smem>>
    %812 = vector.broadcast %811 : f32 to vector<8x128xf32>
    %813 = arith.mulf %3, %812 : vector<8x128xf32>
    %814 = arith.addf %810, %813 : vector<8x128xf32>
    %c2_332 = arith.constant 2 : index
    %c40_333 = arith.constant 40 : index
    %815 = memref.load %arg2[%c2_332, %c40_333] : memref<3x64xf32, #tpu.memory_space<smem>>
    %816 = vector.broadcast %815 : f32 to vector<8x128xf32>
    %817 = arith.mulf %5, %816 : vector<8x128xf32>
    %c40_334 = arith.constant 40 : index
    %818 = memref.load %arg3[%c40_334] : memref<64xf32, #tpu.memory_space<smem>>
    %819 = vector.broadcast %818 : f32 to vector<8x128xf32>
    %820 = arith.addf %817, %819 : vector<8x128xf32>
    %821 = arith.addf %814, %820 : vector<8x128xf32>
    %cst_335 = arith.constant 0.000000e+00 : f32
    %822 = vector.broadcast %cst_335 : f32 to vector<8x128xf32>
    %823 = arith.maximumf %821, %822 : vector<8x128xf32>
    %c40_336 = arith.constant 40 : index
    %824 = memref.load %arg4[%c40_336] : memref<64xf32, #tpu.memory_space<smem>>
    %825 = vector.broadcast %824 : f32 to vector<8x128xf32>
    %826 = arith.mulf %823, %825 : vector<8x128xf32>
    %827 = arith.addf %807, %826 : vector<8x128xf32>
    %c0_337 = arith.constant 0 : index
    %c41 = arith.constant 41 : index
    %828 = memref.load %arg2[%c0_337, %c41] : memref<3x64xf32, #tpu.memory_space<smem>>
    %829 = vector.broadcast %828 : f32 to vector<8x128xf32>
    %830 = arith.mulf %1, %829 : vector<8x128xf32>
    %c1_338 = arith.constant 1 : index
    %c41_339 = arith.constant 41 : index
    %831 = memref.load %arg2[%c1_338, %c41_339] : memref<3x64xf32, #tpu.memory_space<smem>>
    %832 = vector.broadcast %831 : f32 to vector<8x128xf32>
    %833 = arith.mulf %3, %832 : vector<8x128xf32>
    %834 = arith.addf %830, %833 : vector<8x128xf32>
    %c2_340 = arith.constant 2 : index
    %c41_341 = arith.constant 41 : index
    %835 = memref.load %arg2[%c2_340, %c41_341] : memref<3x64xf32, #tpu.memory_space<smem>>
    %836 = vector.broadcast %835 : f32 to vector<8x128xf32>
    %837 = arith.mulf %5, %836 : vector<8x128xf32>
    %c41_342 = arith.constant 41 : index
    %838 = memref.load %arg3[%c41_342] : memref<64xf32, #tpu.memory_space<smem>>
    %839 = vector.broadcast %838 : f32 to vector<8x128xf32>
    %840 = arith.addf %837, %839 : vector<8x128xf32>
    %841 = arith.addf %834, %840 : vector<8x128xf32>
    %cst_343 = arith.constant 0.000000e+00 : f32
    %842 = vector.broadcast %cst_343 : f32 to vector<8x128xf32>
    %843 = arith.maximumf %841, %842 : vector<8x128xf32>
    %c41_344 = arith.constant 41 : index
    %844 = memref.load %arg4[%c41_344] : memref<64xf32, #tpu.memory_space<smem>>
    %845 = vector.broadcast %844 : f32 to vector<8x128xf32>
    %846 = arith.mulf %843, %845 : vector<8x128xf32>
    %847 = arith.addf %827, %846 : vector<8x128xf32>
    %c0_345 = arith.constant 0 : index
    %c42 = arith.constant 42 : index
    %848 = memref.load %arg2[%c0_345, %c42] : memref<3x64xf32, #tpu.memory_space<smem>>
    %849 = vector.broadcast %848 : f32 to vector<8x128xf32>
    %850 = arith.mulf %1, %849 : vector<8x128xf32>
    %c1_346 = arith.constant 1 : index
    %c42_347 = arith.constant 42 : index
    %851 = memref.load %arg2[%c1_346, %c42_347] : memref<3x64xf32, #tpu.memory_space<smem>>
    %852 = vector.broadcast %851 : f32 to vector<8x128xf32>
    %853 = arith.mulf %3, %852 : vector<8x128xf32>
    %854 = arith.addf %850, %853 : vector<8x128xf32>
    %c2_348 = arith.constant 2 : index
    %c42_349 = arith.constant 42 : index
    %855 = memref.load %arg2[%c2_348, %c42_349] : memref<3x64xf32, #tpu.memory_space<smem>>
    %856 = vector.broadcast %855 : f32 to vector<8x128xf32>
    %857 = arith.mulf %5, %856 : vector<8x128xf32>
    %c42_350 = arith.constant 42 : index
    %858 = memref.load %arg3[%c42_350] : memref<64xf32, #tpu.memory_space<smem>>
    %859 = vector.broadcast %858 : f32 to vector<8x128xf32>
    %860 = arith.addf %857, %859 : vector<8x128xf32>
    %861 = arith.addf %854, %860 : vector<8x128xf32>
    %cst_351 = arith.constant 0.000000e+00 : f32
    %862 = vector.broadcast %cst_351 : f32 to vector<8x128xf32>
    %863 = arith.maximumf %861, %862 : vector<8x128xf32>
    %c42_352 = arith.constant 42 : index
    %864 = memref.load %arg4[%c42_352] : memref<64xf32, #tpu.memory_space<smem>>
    %865 = vector.broadcast %864 : f32 to vector<8x128xf32>
    %866 = arith.mulf %863, %865 : vector<8x128xf32>
    %867 = arith.addf %847, %866 : vector<8x128xf32>
    %c0_353 = arith.constant 0 : index
    %c43 = arith.constant 43 : index
    %868 = memref.load %arg2[%c0_353, %c43] : memref<3x64xf32, #tpu.memory_space<smem>>
    %869 = vector.broadcast %868 : f32 to vector<8x128xf32>
    %870 = arith.mulf %1, %869 : vector<8x128xf32>
    %c1_354 = arith.constant 1 : index
    %c43_355 = arith.constant 43 : index
    %871 = memref.load %arg2[%c1_354, %c43_355] : memref<3x64xf32, #tpu.memory_space<smem>>
    %872 = vector.broadcast %871 : f32 to vector<8x128xf32>
    %873 = arith.mulf %3, %872 : vector<8x128xf32>
    %874 = arith.addf %870, %873 : vector<8x128xf32>
    %c2_356 = arith.constant 2 : index
    %c43_357 = arith.constant 43 : index
    %875 = memref.load %arg2[%c2_356, %c43_357] : memref<3x64xf32, #tpu.memory_space<smem>>
    %876 = vector.broadcast %875 : f32 to vector<8x128xf32>
    %877 = arith.mulf %5, %876 : vector<8x128xf32>
    %c43_358 = arith.constant 43 : index
    %878 = memref.load %arg3[%c43_358] : memref<64xf32, #tpu.memory_space<smem>>
    %879 = vector.broadcast %878 : f32 to vector<8x128xf32>
    %880 = arith.addf %877, %879 : vector<8x128xf32>
    %881 = arith.addf %874, %880 : vector<8x128xf32>
    %cst_359 = arith.constant 0.000000e+00 : f32
    %882 = vector.broadcast %cst_359 : f32 to vector<8x128xf32>
    %883 = arith.maximumf %881, %882 : vector<8x128xf32>
    %c43_360 = arith.constant 43 : index
    %884 = memref.load %arg4[%c43_360] : memref<64xf32, #tpu.memory_space<smem>>
    %885 = vector.broadcast %884 : f32 to vector<8x128xf32>
    %886 = arith.mulf %883, %885 : vector<8x128xf32>
    %887 = arith.addf %867, %886 : vector<8x128xf32>
    %c0_361 = arith.constant 0 : index
    %c44 = arith.constant 44 : index
    %888 = memref.load %arg2[%c0_361, %c44] : memref<3x64xf32, #tpu.memory_space<smem>>
    %889 = vector.broadcast %888 : f32 to vector<8x128xf32>
    %890 = arith.mulf %1, %889 : vector<8x128xf32>
    %c1_362 = arith.constant 1 : index
    %c44_363 = arith.constant 44 : index
    %891 = memref.load %arg2[%c1_362, %c44_363] : memref<3x64xf32, #tpu.memory_space<smem>>
    %892 = vector.broadcast %891 : f32 to vector<8x128xf32>
    %893 = arith.mulf %3, %892 : vector<8x128xf32>
    %894 = arith.addf %890, %893 : vector<8x128xf32>
    %c2_364 = arith.constant 2 : index
    %c44_365 = arith.constant 44 : index
    %895 = memref.load %arg2[%c2_364, %c44_365] : memref<3x64xf32, #tpu.memory_space<smem>>
    %896 = vector.broadcast %895 : f32 to vector<8x128xf32>
    %897 = arith.mulf %5, %896 : vector<8x128xf32>
    %c44_366 = arith.constant 44 : index
    %898 = memref.load %arg3[%c44_366] : memref<64xf32, #tpu.memory_space<smem>>
    %899 = vector.broadcast %898 : f32 to vector<8x128xf32>
    %900 = arith.addf %897, %899 : vector<8x128xf32>
    %901 = arith.addf %894, %900 : vector<8x128xf32>
    %cst_367 = arith.constant 0.000000e+00 : f32
    %902 = vector.broadcast %cst_367 : f32 to vector<8x128xf32>
    %903 = arith.maximumf %901, %902 : vector<8x128xf32>
    %c44_368 = arith.constant 44 : index
    %904 = memref.load %arg4[%c44_368] : memref<64xf32, #tpu.memory_space<smem>>
    %905 = vector.broadcast %904 : f32 to vector<8x128xf32>
    %906 = arith.mulf %903, %905 : vector<8x128xf32>
    %907 = arith.addf %887, %906 : vector<8x128xf32>
    %c0_369 = arith.constant 0 : index
    %c45 = arith.constant 45 : index
    %908 = memref.load %arg2[%c0_369, %c45] : memref<3x64xf32, #tpu.memory_space<smem>>
    %909 = vector.broadcast %908 : f32 to vector<8x128xf32>
    %910 = arith.mulf %1, %909 : vector<8x128xf32>
    %c1_370 = arith.constant 1 : index
    %c45_371 = arith.constant 45 : index
    %911 = memref.load %arg2[%c1_370, %c45_371] : memref<3x64xf32, #tpu.memory_space<smem>>
    %912 = vector.broadcast %911 : f32 to vector<8x128xf32>
    %913 = arith.mulf %3, %912 : vector<8x128xf32>
    %914 = arith.addf %910, %913 : vector<8x128xf32>
    %c2_372 = arith.constant 2 : index
    %c45_373 = arith.constant 45 : index
    %915 = memref.load %arg2[%c2_372, %c45_373] : memref<3x64xf32, #tpu.memory_space<smem>>
    %916 = vector.broadcast %915 : f32 to vector<8x128xf32>
    %917 = arith.mulf %5, %916 : vector<8x128xf32>
    %c45_374 = arith.constant 45 : index
    %918 = memref.load %arg3[%c45_374] : memref<64xf32, #tpu.memory_space<smem>>
    %919 = vector.broadcast %918 : f32 to vector<8x128xf32>
    %920 = arith.addf %917, %919 : vector<8x128xf32>
    %921 = arith.addf %914, %920 : vector<8x128xf32>
    %cst_375 = arith.constant 0.000000e+00 : f32
    %922 = vector.broadcast %cst_375 : f32 to vector<8x128xf32>
    %923 = arith.maximumf %921, %922 : vector<8x128xf32>
    %c45_376 = arith.constant 45 : index
    %924 = memref.load %arg4[%c45_376] : memref<64xf32, #tpu.memory_space<smem>>
    %925 = vector.broadcast %924 : f32 to vector<8x128xf32>
    %926 = arith.mulf %923, %925 : vector<8x128xf32>
    %927 = arith.addf %907, %926 : vector<8x128xf32>
    %c0_377 = arith.constant 0 : index
    %c46 = arith.constant 46 : index
    %928 = memref.load %arg2[%c0_377, %c46] : memref<3x64xf32, #tpu.memory_space<smem>>
    %929 = vector.broadcast %928 : f32 to vector<8x128xf32>
    %930 = arith.mulf %1, %929 : vector<8x128xf32>
    %c1_378 = arith.constant 1 : index
    %c46_379 = arith.constant 46 : index
    %931 = memref.load %arg2[%c1_378, %c46_379] : memref<3x64xf32, #tpu.memory_space<smem>>
    %932 = vector.broadcast %931 : f32 to vector<8x128xf32>
    %933 = arith.mulf %3, %932 : vector<8x128xf32>
    %934 = arith.addf %930, %933 : vector<8x128xf32>
    %c2_380 = arith.constant 2 : index
    %c46_381 = arith.constant 46 : index
    %935 = memref.load %arg2[%c2_380, %c46_381] : memref<3x64xf32, #tpu.memory_space<smem>>
    %936 = vector.broadcast %935 : f32 to vector<8x128xf32>
    %937 = arith.mulf %5, %936 : vector<8x128xf32>
    %c46_382 = arith.constant 46 : index
    %938 = memref.load %arg3[%c46_382] : memref<64xf32, #tpu.memory_space<smem>>
    %939 = vector.broadcast %938 : f32 to vector<8x128xf32>
    %940 = arith.addf %937, %939 : vector<8x128xf32>
    %941 = arith.addf %934, %940 : vector<8x128xf32>
    %cst_383 = arith.constant 0.000000e+00 : f32
    %942 = vector.broadcast %cst_383 : f32 to vector<8x128xf32>
    %943 = arith.maximumf %941, %942 : vector<8x128xf32>
    %c46_384 = arith.constant 46 : index
    %944 = memref.load %arg4[%c46_384] : memref<64xf32, #tpu.memory_space<smem>>
    %945 = vector.broadcast %944 : f32 to vector<8x128xf32>
    %946 = arith.mulf %943, %945 : vector<8x128xf32>
    %947 = arith.addf %927, %946 : vector<8x128xf32>
    %c0_385 = arith.constant 0 : index
    %c47 = arith.constant 47 : index
    %948 = memref.load %arg2[%c0_385, %c47] : memref<3x64xf32, #tpu.memory_space<smem>>
    %949 = vector.broadcast %948 : f32 to vector<8x128xf32>
    %950 = arith.mulf %1, %949 : vector<8x128xf32>
    %c1_386 = arith.constant 1 : index
    %c47_387 = arith.constant 47 : index
    %951 = memref.load %arg2[%c1_386, %c47_387] : memref<3x64xf32, #tpu.memory_space<smem>>
    %952 = vector.broadcast %951 : f32 to vector<8x128xf32>
    %953 = arith.mulf %3, %952 : vector<8x128xf32>
    %954 = arith.addf %950, %953 : vector<8x128xf32>
    %c2_388 = arith.constant 2 : index
    %c47_389 = arith.constant 47 : index
    %955 = memref.load %arg2[%c2_388, %c47_389] : memref<3x64xf32, #tpu.memory_space<smem>>
    %956 = vector.broadcast %955 : f32 to vector<8x128xf32>
    %957 = arith.mulf %5, %956 : vector<8x128xf32>
    %c47_390 = arith.constant 47 : index
    %958 = memref.load %arg3[%c47_390] : memref<64xf32, #tpu.memory_space<smem>>
    %959 = vector.broadcast %958 : f32 to vector<8x128xf32>
    %960 = arith.addf %957, %959 : vector<8x128xf32>
    %961 = arith.addf %954, %960 : vector<8x128xf32>
    %cst_391 = arith.constant 0.000000e+00 : f32
    %962 = vector.broadcast %cst_391 : f32 to vector<8x128xf32>
    %963 = arith.maximumf %961, %962 : vector<8x128xf32>
    %c47_392 = arith.constant 47 : index
    %964 = memref.load %arg4[%c47_392] : memref<64xf32, #tpu.memory_space<smem>>
    %965 = vector.broadcast %964 : f32 to vector<8x128xf32>
    %966 = arith.mulf %963, %965 : vector<8x128xf32>
    %967 = arith.addf %947, %966 : vector<8x128xf32>
    %c0_393 = arith.constant 0 : index
    %c48 = arith.constant 48 : index
    %968 = memref.load %arg2[%c0_393, %c48] : memref<3x64xf32, #tpu.memory_space<smem>>
    %969 = vector.broadcast %968 : f32 to vector<8x128xf32>
    %970 = arith.mulf %1, %969 : vector<8x128xf32>
    %c1_394 = arith.constant 1 : index
    %c48_395 = arith.constant 48 : index
    %971 = memref.load %arg2[%c1_394, %c48_395] : memref<3x64xf32, #tpu.memory_space<smem>>
    %972 = vector.broadcast %971 : f32 to vector<8x128xf32>
    %973 = arith.mulf %3, %972 : vector<8x128xf32>
    %974 = arith.addf %970, %973 : vector<8x128xf32>
    %c2_396 = arith.constant 2 : index
    %c48_397 = arith.constant 48 : index
    %975 = memref.load %arg2[%c2_396, %c48_397] : memref<3x64xf32, #tpu.memory_space<smem>>
    %976 = vector.broadcast %975 : f32 to vector<8x128xf32>
    %977 = arith.mulf %5, %976 : vector<8x128xf32>
    %c48_398 = arith.constant 48 : index
    %978 = memref.load %arg3[%c48_398] : memref<64xf32, #tpu.memory_space<smem>>
    %979 = vector.broadcast %978 : f32 to vector<8x128xf32>
    %980 = arith.addf %977, %979 : vector<8x128xf32>
    %981 = arith.addf %974, %980 : vector<8x128xf32>
    %cst_399 = arith.constant 0.000000e+00 : f32
    %982 = vector.broadcast %cst_399 : f32 to vector<8x128xf32>
    %983 = arith.maximumf %981, %982 : vector<8x128xf32>
    %c48_400 = arith.constant 48 : index
    %984 = memref.load %arg4[%c48_400] : memref<64xf32, #tpu.memory_space<smem>>
    %985 = vector.broadcast %984 : f32 to vector<8x128xf32>
    %986 = arith.mulf %983, %985 : vector<8x128xf32>
    %987 = arith.addf %967, %986 : vector<8x128xf32>
    %c0_401 = arith.constant 0 : index
    %c49 = arith.constant 49 : index
    %988 = memref.load %arg2[%c0_401, %c49] : memref<3x64xf32, #tpu.memory_space<smem>>
    %989 = vector.broadcast %988 : f32 to vector<8x128xf32>
    %990 = arith.mulf %1, %989 : vector<8x128xf32>
    %c1_402 = arith.constant 1 : index
    %c49_403 = arith.constant 49 : index
    %991 = memref.load %arg2[%c1_402, %c49_403] : memref<3x64xf32, #tpu.memory_space<smem>>
    %992 = vector.broadcast %991 : f32 to vector<8x128xf32>
    %993 = arith.mulf %3, %992 : vector<8x128xf32>
    %994 = arith.addf %990, %993 : vector<8x128xf32>
    %c2_404 = arith.constant 2 : index
    %c49_405 = arith.constant 49 : index
    %995 = memref.load %arg2[%c2_404, %c49_405] : memref<3x64xf32, #tpu.memory_space<smem>>
    %996 = vector.broadcast %995 : f32 to vector<8x128xf32>
    %997 = arith.mulf %5, %996 : vector<8x128xf32>
    %c49_406 = arith.constant 49 : index
    %998 = memref.load %arg3[%c49_406] : memref<64xf32, #tpu.memory_space<smem>>
    %999 = vector.broadcast %998 : f32 to vector<8x128xf32>
    %1000 = arith.addf %997, %999 : vector<8x128xf32>
    %1001 = arith.addf %994, %1000 : vector<8x128xf32>
    %cst_407 = arith.constant 0.000000e+00 : f32
    %1002 = vector.broadcast %cst_407 : f32 to vector<8x128xf32>
    %1003 = arith.maximumf %1001, %1002 : vector<8x128xf32>
    %c49_408 = arith.constant 49 : index
    %1004 = memref.load %arg4[%c49_408] : memref<64xf32, #tpu.memory_space<smem>>
    %1005 = vector.broadcast %1004 : f32 to vector<8x128xf32>
    %1006 = arith.mulf %1003, %1005 : vector<8x128xf32>
    %1007 = arith.addf %987, %1006 : vector<8x128xf32>
    %c0_409 = arith.constant 0 : index
    %c50 = arith.constant 50 : index
    %1008 = memref.load %arg2[%c0_409, %c50] : memref<3x64xf32, #tpu.memory_space<smem>>
    %1009 = vector.broadcast %1008 : f32 to vector<8x128xf32>
    %1010 = arith.mulf %1, %1009 : vector<8x128xf32>
    %c1_410 = arith.constant 1 : index
    %c50_411 = arith.constant 50 : index
    %1011 = memref.load %arg2[%c1_410, %c50_411] : memref<3x64xf32, #tpu.memory_space<smem>>
    %1012 = vector.broadcast %1011 : f32 to vector<8x128xf32>
    %1013 = arith.mulf %3, %1012 : vector<8x128xf32>
    %1014 = arith.addf %1010, %1013 : vector<8x128xf32>
    %c2_412 = arith.constant 2 : index
    %c50_413 = arith.constant 50 : index
    %1015 = memref.load %arg2[%c2_412, %c50_413] : memref<3x64xf32, #tpu.memory_space<smem>>
    %1016 = vector.broadcast %1015 : f32 to vector<8x128xf32>
    %1017 = arith.mulf %5, %1016 : vector<8x128xf32>
    %c50_414 = arith.constant 50 : index
    %1018 = memref.load %arg3[%c50_414] : memref<64xf32, #tpu.memory_space<smem>>
    %1019 = vector.broadcast %1018 : f32 to vector<8x128xf32>
    %1020 = arith.addf %1017, %1019 : vector<8x128xf32>
    %1021 = arith.addf %1014, %1020 : vector<8x128xf32>
    %cst_415 = arith.constant 0.000000e+00 : f32
    %1022 = vector.broadcast %cst_415 : f32 to vector<8x128xf32>
    %1023 = arith.maximumf %1021, %1022 : vector<8x128xf32>
    %c50_416 = arith.constant 50 : index
    %1024 = memref.load %arg4[%c50_416] : memref<64xf32, #tpu.memory_space<smem>>
    %1025 = vector.broadcast %1024 : f32 to vector<8x128xf32>
    %1026 = arith.mulf %1023, %1025 : vector<8x128xf32>
    %1027 = arith.addf %1007, %1026 : vector<8x128xf32>
    %c0_417 = arith.constant 0 : index
    %c51 = arith.constant 51 : index
    %1028 = memref.load %arg2[%c0_417, %c51] : memref<3x64xf32, #tpu.memory_space<smem>>
    %1029 = vector.broadcast %1028 : f32 to vector<8x128xf32>
    %1030 = arith.mulf %1, %1029 : vector<8x128xf32>
    %c1_418 = arith.constant 1 : index
    %c51_419 = arith.constant 51 : index
    %1031 = memref.load %arg2[%c1_418, %c51_419] : memref<3x64xf32, #tpu.memory_space<smem>>
    %1032 = vector.broadcast %1031 : f32 to vector<8x128xf32>
    %1033 = arith.mulf %3, %1032 : vector<8x128xf32>
    %1034 = arith.addf %1030, %1033 : vector<8x128xf32>
    %c2_420 = arith.constant 2 : index
    %c51_421 = arith.constant 51 : index
    %1035 = memref.load %arg2[%c2_420, %c51_421] : memref<3x64xf32, #tpu.memory_space<smem>>
    %1036 = vector.broadcast %1035 : f32 to vector<8x128xf32>
    %1037 = arith.mulf %5, %1036 : vector<8x128xf32>
    %c51_422 = arith.constant 51 : index
    %1038 = memref.load %arg3[%c51_422] : memref<64xf32, #tpu.memory_space<smem>>
    %1039 = vector.broadcast %1038 : f32 to vector<8x128xf32>
    %1040 = arith.addf %1037, %1039 : vector<8x128xf32>
    %1041 = arith.addf %1034, %1040 : vector<8x128xf32>
    %cst_423 = arith.constant 0.000000e+00 : f32
    %1042 = vector.broadcast %cst_423 : f32 to vector<8x128xf32>
    %1043 = arith.maximumf %1041, %1042 : vector<8x128xf32>
    %c51_424 = arith.constant 51 : index
    %1044 = memref.load %arg4[%c51_424] : memref<64xf32, #tpu.memory_space<smem>>
    %1045 = vector.broadcast %1044 : f32 to vector<8x128xf32>
    %1046 = arith.mulf %1043, %1045 : vector<8x128xf32>
    %1047 = arith.addf %1027, %1046 : vector<8x128xf32>
    %c0_425 = arith.constant 0 : index
    %c52 = arith.constant 52 : index
    %1048 = memref.load %arg2[%c0_425, %c52] : memref<3x64xf32, #tpu.memory_space<smem>>
    %1049 = vector.broadcast %1048 : f32 to vector<8x128xf32>
    %1050 = arith.mulf %1, %1049 : vector<8x128xf32>
    %c1_426 = arith.constant 1 : index
    %c52_427 = arith.constant 52 : index
    %1051 = memref.load %arg2[%c1_426, %c52_427] : memref<3x64xf32, #tpu.memory_space<smem>>
    %1052 = vector.broadcast %1051 : f32 to vector<8x128xf32>
    %1053 = arith.mulf %3, %1052 : vector<8x128xf32>
    %1054 = arith.addf %1050, %1053 : vector<8x128xf32>
    %c2_428 = arith.constant 2 : index
    %c52_429 = arith.constant 52 : index
    %1055 = memref.load %arg2[%c2_428, %c52_429] : memref<3x64xf32, #tpu.memory_space<smem>>
    %1056 = vector.broadcast %1055 : f32 to vector<8x128xf32>
    %1057 = arith.mulf %5, %1056 : vector<8x128xf32>
    %c52_430 = arith.constant 52 : index
    %1058 = memref.load %arg3[%c52_430] : memref<64xf32, #tpu.memory_space<smem>>
    %1059 = vector.broadcast %1058 : f32 to vector<8x128xf32>
    %1060 = arith.addf %1057, %1059 : vector<8x128xf32>
    %1061 = arith.addf %1054, %1060 : vector<8x128xf32>
    %cst_431 = arith.constant 0.000000e+00 : f32
    %1062 = vector.broadcast %cst_431 : f32 to vector<8x128xf32>
    %1063 = arith.maximumf %1061, %1062 : vector<8x128xf32>
    %c52_432 = arith.constant 52 : index
    %1064 = memref.load %arg4[%c52_432] : memref<64xf32, #tpu.memory_space<smem>>
    %1065 = vector.broadcast %1064 : f32 to vector<8x128xf32>
    %1066 = arith.mulf %1063, %1065 : vector<8x128xf32>
    %1067 = arith.addf %1047, %1066 : vector<8x128xf32>
    %c0_433 = arith.constant 0 : index
    %c53 = arith.constant 53 : index
    %1068 = memref.load %arg2[%c0_433, %c53] : memref<3x64xf32, #tpu.memory_space<smem>>
    %1069 = vector.broadcast %1068 : f32 to vector<8x128xf32>
    %1070 = arith.mulf %1, %1069 : vector<8x128xf32>
    %c1_434 = arith.constant 1 : index
    %c53_435 = arith.constant 53 : index
    %1071 = memref.load %arg2[%c1_434, %c53_435] : memref<3x64xf32, #tpu.memory_space<smem>>
    %1072 = vector.broadcast %1071 : f32 to vector<8x128xf32>
    %1073 = arith.mulf %3, %1072 : vector<8x128xf32>
    %1074 = arith.addf %1070, %1073 : vector<8x128xf32>
    %c2_436 = arith.constant 2 : index
    %c53_437 = arith.constant 53 : index
    %1075 = memref.load %arg2[%c2_436, %c53_437] : memref<3x64xf32, #tpu.memory_space<smem>>
    %1076 = vector.broadcast %1075 : f32 to vector<8x128xf32>
    %1077 = arith.mulf %5, %1076 : vector<8x128xf32>
    %c53_438 = arith.constant 53 : index
    %1078 = memref.load %arg3[%c53_438] : memref<64xf32, #tpu.memory_space<smem>>
    %1079 = vector.broadcast %1078 : f32 to vector<8x128xf32>
    %1080 = arith.addf %1077, %1079 : vector<8x128xf32>
    %1081 = arith.addf %1074, %1080 : vector<8x128xf32>
    %cst_439 = arith.constant 0.000000e+00 : f32
    %1082 = vector.broadcast %cst_439 : f32 to vector<8x128xf32>
    %1083 = arith.maximumf %1081, %1082 : vector<8x128xf32>
    %c53_440 = arith.constant 53 : index
    %1084 = memref.load %arg4[%c53_440] : memref<64xf32, #tpu.memory_space<smem>>
    %1085 = vector.broadcast %1084 : f32 to vector<8x128xf32>
    %1086 = arith.mulf %1083, %1085 : vector<8x128xf32>
    %1087 = arith.addf %1067, %1086 : vector<8x128xf32>
    %c0_441 = arith.constant 0 : index
    %c54 = arith.constant 54 : index
    %1088 = memref.load %arg2[%c0_441, %c54] : memref<3x64xf32, #tpu.memory_space<smem>>
    %1089 = vector.broadcast %1088 : f32 to vector<8x128xf32>
    %1090 = arith.mulf %1, %1089 : vector<8x128xf32>
    %c1_442 = arith.constant 1 : index
    %c54_443 = arith.constant 54 : index
    %1091 = memref.load %arg2[%c1_442, %c54_443] : memref<3x64xf32, #tpu.memory_space<smem>>
    %1092 = vector.broadcast %1091 : f32 to vector<8x128xf32>
    %1093 = arith.mulf %3, %1092 : vector<8x128xf32>
    %1094 = arith.addf %1090, %1093 : vector<8x128xf32>
    %c2_444 = arith.constant 2 : index
    %c54_445 = arith.constant 54 : index
    %1095 = memref.load %arg2[%c2_444, %c54_445] : memref<3x64xf32, #tpu.memory_space<smem>>
    %1096 = vector.broadcast %1095 : f32 to vector<8x128xf32>
    %1097 = arith.mulf %5, %1096 : vector<8x128xf32>
    %c54_446 = arith.constant 54 : index
    %1098 = memref.load %arg3[%c54_446] : memref<64xf32, #tpu.memory_space<smem>>
    %1099 = vector.broadcast %1098 : f32 to vector<8x128xf32>
    %1100 = arith.addf %1097, %1099 : vector<8x128xf32>
    %1101 = arith.addf %1094, %1100 : vector<8x128xf32>
    %cst_447 = arith.constant 0.000000e+00 : f32
    %1102 = vector.broadcast %cst_447 : f32 to vector<8x128xf32>
    %1103 = arith.maximumf %1101, %1102 : vector<8x128xf32>
    %c54_448 = arith.constant 54 : index
    %1104 = memref.load %arg4[%c54_448] : memref<64xf32, #tpu.memory_space<smem>>
    %1105 = vector.broadcast %1104 : f32 to vector<8x128xf32>
    %1106 = arith.mulf %1103, %1105 : vector<8x128xf32>
    %1107 = arith.addf %1087, %1106 : vector<8x128xf32>
    %c0_449 = arith.constant 0 : index
    %c55 = arith.constant 55 : index
    %1108 = memref.load %arg2[%c0_449, %c55] : memref<3x64xf32, #tpu.memory_space<smem>>
    %1109 = vector.broadcast %1108 : f32 to vector<8x128xf32>
    %1110 = arith.mulf %1, %1109 : vector<8x128xf32>
    %c1_450 = arith.constant 1 : index
    %c55_451 = arith.constant 55 : index
    %1111 = memref.load %arg2[%c1_450, %c55_451] : memref<3x64xf32, #tpu.memory_space<smem>>
    %1112 = vector.broadcast %1111 : f32 to vector<8x128xf32>
    %1113 = arith.mulf %3, %1112 : vector<8x128xf32>
    %1114 = arith.addf %1110, %1113 : vector<8x128xf32>
    %c2_452 = arith.constant 2 : index
    %c55_453 = arith.constant 55 : index
    %1115 = memref.load %arg2[%c2_452, %c55_453] : memref<3x64xf32, #tpu.memory_space<smem>>
    %1116 = vector.broadcast %1115 : f32 to vector<8x128xf32>
    %1117 = arith.mulf %5, %1116 : vector<8x128xf32>
    %c55_454 = arith.constant 55 : index
    %1118 = memref.load %arg3[%c55_454] : memref<64xf32, #tpu.memory_space<smem>>
    %1119 = vector.broadcast %1118 : f32 to vector<8x128xf32>
    %1120 = arith.addf %1117, %1119 : vector<8x128xf32>
    %1121 = arith.addf %1114, %1120 : vector<8x128xf32>
    %cst_455 = arith.constant 0.000000e+00 : f32
    %1122 = vector.broadcast %cst_455 : f32 to vector<8x128xf32>
    %1123 = arith.maximumf %1121, %1122 : vector<8x128xf32>
    %c55_456 = arith.constant 55 : index
    %1124 = memref.load %arg4[%c55_456] : memref<64xf32, #tpu.memory_space<smem>>
    %1125 = vector.broadcast %1124 : f32 to vector<8x128xf32>
    %1126 = arith.mulf %1123, %1125 : vector<8x128xf32>
    %1127 = arith.addf %1107, %1126 : vector<8x128xf32>
    %c0_457 = arith.constant 0 : index
    %c56 = arith.constant 56 : index
    %1128 = memref.load %arg2[%c0_457, %c56] : memref<3x64xf32, #tpu.memory_space<smem>>
    %1129 = vector.broadcast %1128 : f32 to vector<8x128xf32>
    %1130 = arith.mulf %1, %1129 : vector<8x128xf32>
    %c1_458 = arith.constant 1 : index
    %c56_459 = arith.constant 56 : index
    %1131 = memref.load %arg2[%c1_458, %c56_459] : memref<3x64xf32, #tpu.memory_space<smem>>
    %1132 = vector.broadcast %1131 : f32 to vector<8x128xf32>
    %1133 = arith.mulf %3, %1132 : vector<8x128xf32>
    %1134 = arith.addf %1130, %1133 : vector<8x128xf32>
    %c2_460 = arith.constant 2 : index
    %c56_461 = arith.constant 56 : index
    %1135 = memref.load %arg2[%c2_460, %c56_461] : memref<3x64xf32, #tpu.memory_space<smem>>
    %1136 = vector.broadcast %1135 : f32 to vector<8x128xf32>
    %1137 = arith.mulf %5, %1136 : vector<8x128xf32>
    %c56_462 = arith.constant 56 : index
    %1138 = memref.load %arg3[%c56_462] : memref<64xf32, #tpu.memory_space<smem>>
    %1139 = vector.broadcast %1138 : f32 to vector<8x128xf32>
    %1140 = arith.addf %1137, %1139 : vector<8x128xf32>
    %1141 = arith.addf %1134, %1140 : vector<8x128xf32>
    %cst_463 = arith.constant 0.000000e+00 : f32
    %1142 = vector.broadcast %cst_463 : f32 to vector<8x128xf32>
    %1143 = arith.maximumf %1141, %1142 : vector<8x128xf32>
    %c56_464 = arith.constant 56 : index
    %1144 = memref.load %arg4[%c56_464] : memref<64xf32, #tpu.memory_space<smem>>
    %1145 = vector.broadcast %1144 : f32 to vector<8x128xf32>
    %1146 = arith.mulf %1143, %1145 : vector<8x128xf32>
    %1147 = arith.addf %1127, %1146 : vector<8x128xf32>
    %c0_465 = arith.constant 0 : index
    %c57 = arith.constant 57 : index
    %1148 = memref.load %arg2[%c0_465, %c57] : memref<3x64xf32, #tpu.memory_space<smem>>
    %1149 = vector.broadcast %1148 : f32 to vector<8x128xf32>
    %1150 = arith.mulf %1, %1149 : vector<8x128xf32>
    %c1_466 = arith.constant 1 : index
    %c57_467 = arith.constant 57 : index
    %1151 = memref.load %arg2[%c1_466, %c57_467] : memref<3x64xf32, #tpu.memory_space<smem>>
    %1152 = vector.broadcast %1151 : f32 to vector<8x128xf32>
    %1153 = arith.mulf %3, %1152 : vector<8x128xf32>
    %1154 = arith.addf %1150, %1153 : vector<8x128xf32>
    %c2_468 = arith.constant 2 : index
    %c57_469 = arith.constant 57 : index
    %1155 = memref.load %arg2[%c2_468, %c57_469] : memref<3x64xf32, #tpu.memory_space<smem>>
    %1156 = vector.broadcast %1155 : f32 to vector<8x128xf32>
    %1157 = arith.mulf %5, %1156 : vector<8x128xf32>
    %c57_470 = arith.constant 57 : index
    %1158 = memref.load %arg3[%c57_470] : memref<64xf32, #tpu.memory_space<smem>>
    %1159 = vector.broadcast %1158 : f32 to vector<8x128xf32>
    %1160 = arith.addf %1157, %1159 : vector<8x128xf32>
    %1161 = arith.addf %1154, %1160 : vector<8x128xf32>
    %cst_471 = arith.constant 0.000000e+00 : f32
    %1162 = vector.broadcast %cst_471 : f32 to vector<8x128xf32>
    %1163 = arith.maximumf %1161, %1162 : vector<8x128xf32>
    %c57_472 = arith.constant 57 : index
    %1164 = memref.load %arg4[%c57_472] : memref<64xf32, #tpu.memory_space<smem>>
    %1165 = vector.broadcast %1164 : f32 to vector<8x128xf32>
    %1166 = arith.mulf %1163, %1165 : vector<8x128xf32>
    %1167 = arith.addf %1147, %1166 : vector<8x128xf32>
    %c0_473 = arith.constant 0 : index
    %c58 = arith.constant 58 : index
    %1168 = memref.load %arg2[%c0_473, %c58] : memref<3x64xf32, #tpu.memory_space<smem>>
    %1169 = vector.broadcast %1168 : f32 to vector<8x128xf32>
    %1170 = arith.mulf %1, %1169 : vector<8x128xf32>
    %c1_474 = arith.constant 1 : index
    %c58_475 = arith.constant 58 : index
    %1171 = memref.load %arg2[%c1_474, %c58_475] : memref<3x64xf32, #tpu.memory_space<smem>>
    %1172 = vector.broadcast %1171 : f32 to vector<8x128xf32>
    %1173 = arith.mulf %3, %1172 : vector<8x128xf32>
    %1174 = arith.addf %1170, %1173 : vector<8x128xf32>
    %c2_476 = arith.constant 2 : index
    %c58_477 = arith.constant 58 : index
    %1175 = memref.load %arg2[%c2_476, %c58_477] : memref<3x64xf32, #tpu.memory_space<smem>>
    %1176 = vector.broadcast %1175 : f32 to vector<8x128xf32>
    %1177 = arith.mulf %5, %1176 : vector<8x128xf32>
    %c58_478 = arith.constant 58 : index
    %1178 = memref.load %arg3[%c58_478] : memref<64xf32, #tpu.memory_space<smem>>
    %1179 = vector.broadcast %1178 : f32 to vector<8x128xf32>
    %1180 = arith.addf %1177, %1179 : vector<8x128xf32>
    %1181 = arith.addf %1174, %1180 : vector<8x128xf32>
    %cst_479 = arith.constant 0.000000e+00 : f32
    %1182 = vector.broadcast %cst_479 : f32 to vector<8x128xf32>
    %1183 = arith.maximumf %1181, %1182 : vector<8x128xf32>
    %c58_480 = arith.constant 58 : index
    %1184 = memref.load %arg4[%c58_480] : memref<64xf32, #tpu.memory_space<smem>>
    %1185 = vector.broadcast %1184 : f32 to vector<8x128xf32>
    %1186 = arith.mulf %1183, %1185 : vector<8x128xf32>
    %1187 = arith.addf %1167, %1186 : vector<8x128xf32>
    %c0_481 = arith.constant 0 : index
    %c59 = arith.constant 59 : index
    %1188 = memref.load %arg2[%c0_481, %c59] : memref<3x64xf32, #tpu.memory_space<smem>>
    %1189 = vector.broadcast %1188 : f32 to vector<8x128xf32>
    %1190 = arith.mulf %1, %1189 : vector<8x128xf32>
    %c1_482 = arith.constant 1 : index
    %c59_483 = arith.constant 59 : index
    %1191 = memref.load %arg2[%c1_482, %c59_483] : memref<3x64xf32, #tpu.memory_space<smem>>
    %1192 = vector.broadcast %1191 : f32 to vector<8x128xf32>
    %1193 = arith.mulf %3, %1192 : vector<8x128xf32>
    %1194 = arith.addf %1190, %1193 : vector<8x128xf32>
    %c2_484 = arith.constant 2 : index
    %c59_485 = arith.constant 59 : index
    %1195 = memref.load %arg2[%c2_484, %c59_485] : memref<3x64xf32, #tpu.memory_space<smem>>
    %1196 = vector.broadcast %1195 : f32 to vector<8x128xf32>
    %1197 = arith.mulf %5, %1196 : vector<8x128xf32>
    %c59_486 = arith.constant 59 : index
    %1198 = memref.load %arg3[%c59_486] : memref<64xf32, #tpu.memory_space<smem>>
    %1199 = vector.broadcast %1198 : f32 to vector<8x128xf32>
    %1200 = arith.addf %1197, %1199 : vector<8x128xf32>
    %1201 = arith.addf %1194, %1200 : vector<8x128xf32>
    %cst_487 = arith.constant 0.000000e+00 : f32
    %1202 = vector.broadcast %cst_487 : f32 to vector<8x128xf32>
    %1203 = arith.maximumf %1201, %1202 : vector<8x128xf32>
    %c59_488 = arith.constant 59 : index
    %1204 = memref.load %arg4[%c59_488] : memref<64xf32, #tpu.memory_space<smem>>
    %1205 = vector.broadcast %1204 : f32 to vector<8x128xf32>
    %1206 = arith.mulf %1203, %1205 : vector<8x128xf32>
    %1207 = arith.addf %1187, %1206 : vector<8x128xf32>
    %c0_489 = arith.constant 0 : index
    %c60 = arith.constant 60 : index
    %1208 = memref.load %arg2[%c0_489, %c60] : memref<3x64xf32, #tpu.memory_space<smem>>
    %1209 = vector.broadcast %1208 : f32 to vector<8x128xf32>
    %1210 = arith.mulf %1, %1209 : vector<8x128xf32>
    %c1_490 = arith.constant 1 : index
    %c60_491 = arith.constant 60 : index
    %1211 = memref.load %arg2[%c1_490, %c60_491] : memref<3x64xf32, #tpu.memory_space<smem>>
    %1212 = vector.broadcast %1211 : f32 to vector<8x128xf32>
    %1213 = arith.mulf %3, %1212 : vector<8x128xf32>
    %1214 = arith.addf %1210, %1213 : vector<8x128xf32>
    %c2_492 = arith.constant 2 : index
    %c60_493 = arith.constant 60 : index
    %1215 = memref.load %arg2[%c2_492, %c60_493] : memref<3x64xf32, #tpu.memory_space<smem>>
    %1216 = vector.broadcast %1215 : f32 to vector<8x128xf32>
    %1217 = arith.mulf %5, %1216 : vector<8x128xf32>
    %c60_494 = arith.constant 60 : index
    %1218 = memref.load %arg3[%c60_494] : memref<64xf32, #tpu.memory_space<smem>>
    %1219 = vector.broadcast %1218 : f32 to vector<8x128xf32>
    %1220 = arith.addf %1217, %1219 : vector<8x128xf32>
    %1221 = arith.addf %1214, %1220 : vector<8x128xf32>
    %cst_495 = arith.constant 0.000000e+00 : f32
    %1222 = vector.broadcast %cst_495 : f32 to vector<8x128xf32>
    %1223 = arith.maximumf %1221, %1222 : vector<8x128xf32>
    %c60_496 = arith.constant 60 : index
    %1224 = memref.load %arg4[%c60_496] : memref<64xf32, #tpu.memory_space<smem>>
    %1225 = vector.broadcast %1224 : f32 to vector<8x128xf32>
    %1226 = arith.mulf %1223, %1225 : vector<8x128xf32>
    %1227 = arith.addf %1207, %1226 : vector<8x128xf32>
    %c0_497 = arith.constant 0 : index
    %c61 = arith.constant 61 : index
    %1228 = memref.load %arg2[%c0_497, %c61] : memref<3x64xf32, #tpu.memory_space<smem>>
    %1229 = vector.broadcast %1228 : f32 to vector<8x128xf32>
    %1230 = arith.mulf %1, %1229 : vector<8x128xf32>
    %c1_498 = arith.constant 1 : index
    %c61_499 = arith.constant 61 : index
    %1231 = memref.load %arg2[%c1_498, %c61_499] : memref<3x64xf32, #tpu.memory_space<smem>>
    %1232 = vector.broadcast %1231 : f32 to vector<8x128xf32>
    %1233 = arith.mulf %3, %1232 : vector<8x128xf32>
    %1234 = arith.addf %1230, %1233 : vector<8x128xf32>
    %c2_500 = arith.constant 2 : index
    %c61_501 = arith.constant 61 : index
    %1235 = memref.load %arg2[%c2_500, %c61_501] : memref<3x64xf32, #tpu.memory_space<smem>>
    %1236 = vector.broadcast %1235 : f32 to vector<8x128xf32>
    %1237 = arith.mulf %5, %1236 : vector<8x128xf32>
    %c61_502 = arith.constant 61 : index
    %1238 = memref.load %arg3[%c61_502] : memref<64xf32, #tpu.memory_space<smem>>
    %1239 = vector.broadcast %1238 : f32 to vector<8x128xf32>
    %1240 = arith.addf %1237, %1239 : vector<8x128xf32>
    %1241 = arith.addf %1234, %1240 : vector<8x128xf32>
    %cst_503 = arith.constant 0.000000e+00 : f32
    %1242 = vector.broadcast %cst_503 : f32 to vector<8x128xf32>
    %1243 = arith.maximumf %1241, %1242 : vector<8x128xf32>
    %c61_504 = arith.constant 61 : index
    %1244 = memref.load %arg4[%c61_504] : memref<64xf32, #tpu.memory_space<smem>>
    %1245 = vector.broadcast %1244 : f32 to vector<8x128xf32>
    %1246 = arith.mulf %1243, %1245 : vector<8x128xf32>
    %1247 = arith.addf %1227, %1246 : vector<8x128xf32>
    %c0_505 = arith.constant 0 : index
    %c62 = arith.constant 62 : index
    %1248 = memref.load %arg2[%c0_505, %c62] : memref<3x64xf32, #tpu.memory_space<smem>>
    %1249 = vector.broadcast %1248 : f32 to vector<8x128xf32>
    %1250 = arith.mulf %1, %1249 : vector<8x128xf32>
    %c1_506 = arith.constant 1 : index
    %c62_507 = arith.constant 62 : index
    %1251 = memref.load %arg2[%c1_506, %c62_507] : memref<3x64xf32, #tpu.memory_space<smem>>
    %1252 = vector.broadcast %1251 : f32 to vector<8x128xf32>
    %1253 = arith.mulf %3, %1252 : vector<8x128xf32>
    %1254 = arith.addf %1250, %1253 : vector<8x128xf32>
    %c2_508 = arith.constant 2 : index
    %c62_509 = arith.constant 62 : index
    %1255 = memref.load %arg2[%c2_508, %c62_509] : memref<3x64xf32, #tpu.memory_space<smem>>
    %1256 = vector.broadcast %1255 : f32 to vector<8x128xf32>
    %1257 = arith.mulf %5, %1256 : vector<8x128xf32>
    %c62_510 = arith.constant 62 : index
    %1258 = memref.load %arg3[%c62_510] : memref<64xf32, #tpu.memory_space<smem>>
    %1259 = vector.broadcast %1258 : f32 to vector<8x128xf32>
    %1260 = arith.addf %1257, %1259 : vector<8x128xf32>
    %1261 = arith.addf %1254, %1260 : vector<8x128xf32>
    %cst_511 = arith.constant 0.000000e+00 : f32
    %1262 = vector.broadcast %cst_511 : f32 to vector<8x128xf32>
    %1263 = arith.maximumf %1261, %1262 : vector<8x128xf32>
    %c62_512 = arith.constant 62 : index
    %1264 = memref.load %arg4[%c62_512] : memref<64xf32, #tpu.memory_space<smem>>
    %1265 = vector.broadcast %1264 : f32 to vector<8x128xf32>
    %1266 = arith.mulf %1263, %1265 : vector<8x128xf32>
    %1267 = arith.addf %1247, %1266 : vector<8x128xf32>
    %c0_513 = arith.constant 0 : index
    %c63 = arith.constant 63 : index
    %1268 = memref.load %arg2[%c0_513, %c63] : memref<3x64xf32, #tpu.memory_space<smem>>
    %1269 = vector.broadcast %1268 : f32 to vector<8x128xf32>
    %1270 = arith.mulf %1, %1269 : vector<8x128xf32>
    %c1_514 = arith.constant 1 : index
    %c63_515 = arith.constant 63 : index
    %1271 = memref.load %arg2[%c1_514, %c63_515] : memref<3x64xf32, #tpu.memory_space<smem>>
    %1272 = vector.broadcast %1271 : f32 to vector<8x128xf32>
    %1273 = arith.mulf %3, %1272 : vector<8x128xf32>
    %1274 = arith.addf %1270, %1273 : vector<8x128xf32>
    %c2_516 = arith.constant 2 : index
    %c63_517 = arith.constant 63 : index
    %1275 = memref.load %arg2[%c2_516, %c63_517] : memref<3x64xf32, #tpu.memory_space<smem>>
    %1276 = vector.broadcast %1275 : f32 to vector<8x128xf32>
    %1277 = arith.mulf %5, %1276 : vector<8x128xf32>
    %c63_518 = arith.constant 63 : index
    %1278 = memref.load %arg3[%c63_518] : memref<64xf32, #tpu.memory_space<smem>>
    %1279 = vector.broadcast %1278 : f32 to vector<8x128xf32>
    %1280 = arith.addf %1277, %1279 : vector<8x128xf32>
    %1281 = arith.addf %1274, %1280 : vector<8x128xf32>
    %cst_519 = arith.constant 0.000000e+00 : f32
    %1282 = vector.broadcast %cst_519 : f32 to vector<8x128xf32>
    %1283 = arith.maximumf %1281, %1282 : vector<8x128xf32>
    %c63_520 = arith.constant 63 : index
    %1284 = memref.load %arg4[%c63_520] : memref<64xf32, #tpu.memory_space<smem>>
    %1285 = vector.broadcast %1284 : f32 to vector<8x128xf32>
    %1286 = arith.mulf %1283, %1285 : vector<8x128xf32>
    %1287 = arith.addf %1267, %1286 : vector<8x128xf32>
    %c0_521 = arith.constant 0 : index
    %c0_522 = arith.constant 0 : index
    %1288 = vector.load %arg6[%c0_521, %c0_522] : memref<8x128xf32, #tpu.memory_space<vmem>>, vector<8x128xf32>
    tpu.vector_store %arg6[%c0_521, %c0_522], %1287 {strides = array<i32>} : memref<8x128xf32, #tpu.memory_space<vmem>>, vector<8x128xf32>,
    return
  }
  func.func @transform_0(%arg0: i32) -> (i32, i32, i32) {
    %c0_i32 = arith.constant 0 : i32
    %c0_i32_0 = arith.constant 0 : i32
    %c0_i32_1 = arith.constant 0 : i32
    return %c0_i32, %arg0, %c0_i32_0 : i32, i32, i32
  }
  func.func @transform_1(%arg0: i32) -> (i32, i32) {
    %c0_i32 = arith.constant 0 : i32
    %c0_i32_0 = arith.constant 0 : i32
    %c0_i32_1 = arith.constant 0 : i32
    return %c0_i32, %c0_i32_0 : i32, i32
  }
  func.func @transform_2(%arg0: i32) -> i32 {
    %c0_i32 = arith.constant 0 : i32
    %c0_i32_0 = arith.constant 0 : i32
    return %c0_i32 : i32
  }
  func.func @transform_3(%arg0: i32) -> i32 {
    %c0_i32 = arith.constant 0 : i32
    %c0_i32_0 = arith.constant 0 : i32
    return %c0_i32 : i32
  }
  func.func @transform_4(%arg0: i32) -> i32 {
    %c0_i32 = arith.constant 0 : i32
    %c0_i32_0 = arith.constant 0 : i32
    return %c0_i32 : i32
  }
  func.func @transform_5(%arg0: i32) -> (i32, i32) {
    %c0_i32 = arith.constant 0 : i32
    %c0_i32_0 = arith.constant 0 : i32
    return %arg0, %c0_i32 : i32, i32
  }
}

</mosaic_0001>

<bundles_post_ra>
// kernel: tpu_custom_call.1
= control target key start
LH: loop header
LB: loop body
LE: loop exit
PB: predicated region body
PF: predicated region fallthrough
CT: control target
= control target key end

     0   :  { %11 = vsyncpa [#allocation4], 0  ;;  %s2953_s0 = inlined_call_operand.hbm [shape: f32[3,8,128], index: 0, kind: input, shape index: {}]   ;;  %s2954_s1 = inlined_call_operand.vmem [shape: f32[3,64], index: 1, kind: input, shape index: {}]   ;;  %s2955_s2 = inlined_call_operand.vmem [shape: f32[64], index: 2, kind: input, shape index: {}]   ;;  %s2956_s3 = inlined_call_operand.vmem [shape: f32[64], index: 3, kind: input, shape index: {}]   ;;  %s2957_s4 = inlined_call_operand.<no memory space> [shape: f32[1], index: 4, kind: input, shape index: {}]   ;;  %s2958_s5 = inlined_call_operand.hbm [shape: f32[8,128], index: 5, kind: output, shape index: {}]  }
   0x1   :  { %12 = vsyncpa [#allocation6], 0 }
   0x2   :  { %13 = vsyncpa [#allocation9], 0  ;;  %s43_s20 = sshll.u32 %s2955_s2, 4  ;;  %s44_s20 = int_to_ptr.vmem [resolvable:$true] %s43_s20 }
   0x3   :  { %14 = vsyncpa [#allocation5], 0  ;;  %s1643_s21 = scalar_lea.vmem %s44_s20, 16  ;;  %p1648_p1 = scmp.lt.s32.totalorder %s44_s20, %s44_s20 }
   0x4   :  { %p1644_p0 = scmp.ne.s32.totalorder %s44_s20, %s1643_s21  ;;  %p1649_p2 = scmp.lt.s32.totalorder %s1643_s21, %s1643_s21 }
   0x6   :  { %p1650_p3 = por %p1649_p2, %p1648_p1 }
   0x8   :  { %p1651_p4 = pnand %p1650_p3, %p1644_p0 }
   0xa   :  { %1654 = shalt.err (!%p1651_p4)
}
   0xb   :  { %s1731_s22 = smov [#allocation8]   ;;  %s1732_s23 = smov [#allocation3]  }
   0xc   :  { %46 = dma.vmem_to_smem %s44_s20, 16, %s1731_s22, [#allocation9]  }
   0xd   :  { %s20_s24 = sshll.u32 %s1732_s23, 4  ;;  %s1655_s27 = scalar_lea.hbm %s2953_s0, 384  ;;  %s21_s24 = int_to_ptr.vmem [resolvable:$true] %s20_s24 }
   0xe   :  { %p1656_p5 = scmp.ne.s32.totalorder %s2953_s0, %s1655_s27  ;;  %p1659_p6 = scmp.lt.u32.totalorder %s1655_s27, %s2953_s0 }
  0x10   :  { %p1661_p7 = pnand %p1659_p6, %p1656_p5 }
  0x12   :  { %1664 = shalt.err (!%p1661_p7)
}
  0x13   :  { %s1665_s6 = scalar_lea.vmem %s21_s24, 384  ;;  %p1670_p9 = scmp.lt.s32.totalorder %s21_s24, %s21_s24 }
  0x14   :  { %p1666_p8 = scmp.ne.s32.totalorder %s21_s24, %s1665_s6  ;;  %p1671_p10 = scmp.lt.s32.totalorder %s1665_s6, %s1665_s6 }
  0x16   :  { %p1672_p11 = por %p1671_p10, %p1670_p9 }
  0x18   :  { %p1673_p12 = pnand %p1672_p11, %p1666_p8 }
  0x1a   :  { %1676 = shalt.err (!%p1673_p12)
}
  0x1b   :  { %s1733_s7 = smov 128   ;;  %s1734_s8 = smov 8  }
  0x1c   :  { %26 = dma.hbm_to_vmem [thread:$0]  %s2953_s0, 384, %s21_s24, [#allocation4], %s1733_s7, %s1733_s7, %s1734_s8  }
  0x1d   :  { %s33_s13 = sshll.u32 %s2954_s1, 4  ;;  %s53_s16 = sshll.u32 %s2956_s3, 4  ;;  %s34_s13 = int_to_ptr.vmem [resolvable:$true] %s33_s13  ;;  %s54_s16 = int_to_ptr.vmem [resolvable:$true] %s53_s16 }
  0x1e   :  { %s1677_s17 = scalar_lea.vmem %s34_s13, 64  ;;  %p1682_p0 = scmp.lt.s32.totalorder %s34_s13, %s34_s13 }
  0x1f   :  { %p1678_p13 = scmp.ne.s32.totalorder %s34_s13, %s1677_s17  ;;  %p1683_p1 = scmp.lt.s32.totalorder %s1677_s17, %s1677_s17 }
  0x21   :  { %p1684_p2 = por %p1683_p1, %p1682_p0 }
  0x23   :  { %p1685_p3 = pnand %p1684_p2, %p1678_p13 }
  0x25   :  { %1688 = shalt.err (!%p1685_p3)
}
  0x26   :  { %s1735_s18 = smov [#allocation7]   ;;  %s1689_s0 = scalar_lea.vmem %s54_s16, 16 }
  0x27   :  { %36 = dma.vmem_to_smem %s34_s13, 64, %s1735_s18, [#allocation6]  }
  0x28   :  { %p1690_p4 = scmp.ne.s32.totalorder %s54_s16, %s1689_s0  ;;  %p1694_p5 = scmp.lt.s32.totalorder %s54_s16, %s54_s16 }
  0x29   :  { %p1695_p6 = scmp.lt.s32.totalorder %s1689_s0, %s1689_s0 }
  0x2b   :  { %p1696_p7 = por %p1695_p6, %p1694_p5 }
  0x2d   :  { %p1697_p8 = pnand %p1696_p7, %p1690_p4 }
  0x2f   :  { %1700 = shalt.err (!%p1697_p8)
}
  0x30   :  { %s1736_s1 = smov [#allocation10]  }
  0x31   :  { %56 = dma.vmem_to_smem %s54_s16, 16, %s1736_s1, [#allocation9]  }
  0x32   :  { %1723 = dma.done.wait [#allocation4], 384  }
  0x33   :  { %1724 = vsyncadd [#allocation4], 4294966912 }
  0x34   :  { %1725 = dma.done.wait [#allocation6], 64  }
  0x35   :  { %1726 = vsyncadd [#allocation6], 4294967232 }
  0x36   :  { %1727 = dma.done.wait [#allocation9], 32  }
  0x37   :  { %1728 = vsyncadd [#allocation9], 4294967264 }
  0x38   :  { %71 = sfence }
  0x39   :  { %s79_s3 = sld [smem:[#allocation7]]  ;;  %s1315_s23 = sld [smem:[#allocation7 + $0x1]]  ;;  %v1791_v0 = vld [vmem:[#allocation3] sm:$0xff]  ;;  %v1797_v1 = vld [vmem:[#allocation3 + $0x8] sm:$0xff]  ;;  %v1799_v2 = vld [vmem:[#allocation3 + $0x10] sm:$0xff]  ;;  %v78_v10 = vstv %s2957_s4 }
  0x3a   :  { %s1313_s19 = sld [smem:[#allocation7 + $0x80]]  ;;  %s1316_s24 = sld [smem:[#allocation7 + $0x81]] }
  0x3b   :  { %s1314_s20 = sld [smem:[#allocation7 + $0x100]]  ;;  %s1793_s25 = sld [smem:[#allocation7 + $0x101]] }
  0x3c   :  { %s89_s21 = sld [smem:[#allocation8]]  ;;  %s1795_s26 = sld [smem:[#allocation8 + $0x1]] }
  0x3d   :  { %s1789_s22 = sld [smem:[#allocation10]]  ;;  %s1801_s27 = sld [smem:[#allocation10 + $0x1]] }
  0x3e   :  { %s1803_s28 = sld [smem:[#allocation7 + $0x2]]  ;;  %s1816_s7 = sld [smem:[#allocation7 + $0x3]] }
  0x3f   :  { %v80_v3 = vstv %s79_s3  ;;  %s1805_s2 = sld [smem:[#allocation7 + $0x82]]  ;;  %s1818_s8 = sld [smem:[#allocation7 + $0x83]]  ;;  %v99_v11 = vstv %s1315_s23 }
  0x40   :  { %s1807_s29 = sld [smem:[#allocation7 + $0x102]]  ;;  %v81_v4 = vmul.f32 %v80_v3, %v1791_v0  ;;  %v83_v5 = vstv %s1313_s19  ;;  %v102_v12 = vstv %s1316_s24  ;;  %s1823_s11 = sld [smem:[#allocation7 + $0x103]]  ;;  %v100_v15 = vmul.f32 %v99_v11, %v1791_v0 }
  0x41   :  { %v87_v6 = vstv %s1314_s20  ;;  %s1810_s30 = sld [smem:[#allocation8 + $0x2]]  ;;  %v84_v7 = vmul.f32 %v83_v5, %v1797_v1  ;;  %s1825_s12 = sld [smem:[#allocation8 + $0x3]]  ;;  %v103_v16 = vmul.f32 %v102_v12, %v1797_v1  ;;  %v106_v18 = vstv %s1793_s25 }
  0x42   :  { %s1812_s6 = sld [smem:[#allocation10 + $0x2]]  ;;  %v88_v8 = vmul.f32 %v87_v6, %v1799_v2  ;;  %v90_v9 = vstv %s89_s21  ;;  %s1829_s13 = sld [smem:[#allocation7 + $0x4]]  ;;  %v109_v19 = vstv %s1795_s26  ;;  %v107_v23 = vmul.f32 %v106_v18, %v1799_v2 }
  0x43   :  { %v85_v13 = vadd.f32 %v84_v7, %v81_v4  ;;  %v95_v17 = vstv %s1789_s22  ;;  %s1835_s4 = sld [smem:[#allocation7 + $0x84]]  ;;  %v104_v22 = vadd.f32 %v103_v16, %v100_v15  ;;  %v114_v25 = vstv %s1801_s27  ;;  %s1845_s15 = sld [smem:[#allocation10 + $0x3]] }
  0x44   :  { %v91_v14 = vadd.f32 %v90_v9, %v88_v8  ;;  %v118_v20 = vstv %s1803_s28  ;;  %s1839_s14 = sld [smem:[#allocation7 + $0x104]]  ;;  %v110_v30 = vadd.f32 %v109_v19, %v107_v23  ;;  %s1851_s17 = sld [smem:[#allocation7 + $0x5]]  ;;  %v137_v33 = vstv %s1816_s7 }
  0x45   :  { %v119_v24 = vmul.f32 %v118_v20, %v1791_v0  ;;  %v121_v26 = vstv %s1805_s2  ;;  %s1847_s16 = sld [smem:[#allocation8 + $0x4]]  ;;  %v140_v34 = vstv %s1818_s8  ;;  %s1857_s18 = sld [smem:[#allocation7 + $0x85]]  ;;  %v138_v42 = vmul.f32 %v137_v33, %v1791_v0 }
  0x46   :  { %v92_v21 = vadd.f32 %v91_v14, %v85_v13  ;;  %v125_v27 = vstv %s1807_s29  ;;  %v122_v31 = vmul.f32 %v121_v26, %v1797_v1  ;;  %v144_v35 = vstv %s1823_s11  ;;  %s1859_s0 = sld [smem:[#allocation7 + $0x105]]  ;;  %s1867_s3 = sld [smem:[#allocation10 + $0x4]] }
  0x47   :  { %v128_v28 = vstv %s1810_s30  ;;  %v126_v32 = vmul.f32 %v125_v27, %v1799_v2  ;;  %v147_v36 = vstv %s1825_s12  ;;  %v111_v38 = vadd.f32 %v110_v30, %v104_v22  ;;  %s1861_s1 = sld [smem:[#allocation8 + $0x5]]  ;;  %s1869_s19 = sld [smem:[#allocation7 + $0x6]] }
  0x48   :  { %v93_v29 = vmax.f32 %v92_v21, 0.0  ;;  %v123_v39 = vadd.f32 %v122_v31, %v119_v24  ;;  %v133_v41 = vstv %s1812_s6  ;;  %v141_v43 = vmul.f32 %v140_v34, %v1797_v1  ;;  %s1872_s20 = sld [smem:[#allocation7 + $0x86]]  ;;  %s1880_s22 = sld [smem:[#allocation10 + $0x5]] }
  0x49   :  { %v129_v40 = vadd.f32 %v128_v28, %v126_v32  ;;  %v145_v44 = vmul.f32 %v144_v35, %v1799_v2  ;;  %v112_v46 = vmax.f32 %v111_v38, 0.0  ;;  %v156_v48 = vstv %s1829_s13  ;;  %s1874_s21 = sld [smem:[#allocation7 + $0x106]]  ;;  %s1887_s24 = sld [smem:[#allocation7 + $0x7]] }
  0x4a   :  { %v96_v37 = vmul.f32 %v95_v17, %v93_v29  ;;  %v142_v49 = vadd.f32 %v141_v43, %v138_v42  ;;  %v157_v51 = vmul.f32 %v156_v48, %v1791_v0  ;;  %v159_v52 = vstv %s1835_s4  ;;  %s1882_s23 = sld [smem:[#allocation8 + $0x6]]  ;;  %s1889_s25 = sld [smem:[#allocation7 + $0x87]] }
  0x4b   :  { %v130_v47 = vadd.f32 %v129_v40, %v123_v39  ;;  %v148_v50 = vadd.f32 %v147_v36, %v145_v44  ;;  %v115_v53 = vmul.f32 %v114_v25, %v112_v46  ;;  %v160_v55 = vmul.f32 %v159_v52, %v1797_v1  ;;  %s1894_s26 = sld [smem:[#allocation7 + $0x107]]  ;;  %s1901_s28 = sld [smem:[#allocation10 + $0x6]] }
  0x4c   :  { %v97_v45 = vadd.f32 %v96_v37, %v78_v10  ;;  %v163_v56 = vstv %s1839_s14  ;;  %v152_v58 = vstv %s1845_s15  ;;  %v166_v60 = vstv %s1847_s16  ;;  %s1896_s27 = sld [smem:[#allocation8 + $0x7]]  ;;  %s1903_s2 = sld [smem:[#allocation7 + $0x8]] }
  0x4d   :  { %v131_v54 = vmax.f32 %v130_v47, 0.0  ;;  %v149_v57 = vadd.f32 %v148_v50, %v142_v49  ;;  %v164_v59 = vmul.f32 %v163_v56, %v1799_v2  ;;  %v161_v63 = vadd.f32 %v160_v55, %v157_v51  ;;  %s1907_s29 = sld [smem:[#allocation7 + $0x88]]  ;;  %s1915_s6 = sld [smem:[#allocation10 + $0x7]] }
  0x4e   :  { %v116_v61 = vadd.f32 %v115_v53, %v97_v45  ;;  %v175_v3 = vstv %s1851_s17  ;;  %v178_v7 = vstv %s1857_s18  ;;  %v182_v10 = vstv %s1859_s0  ;;  %s1909_s30 = sld [smem:[#allocation7 + $0x108]]  ;;  %s1923_s8 = sld [smem:[#allocation7 + $0x9]] }
  0x4f   :  { %v134_v62 = vmul.f32 %v133_v41, %v131_v54  ;;  %v150_v4 = vmax.f32 %v149_v57, 0.0  ;;  %v167_v5 = vadd.f32 %v166_v60, %v164_v59  ;;  %v176_v6 = vmul.f32 %v175_v3, %v1791_v0  ;;  %s1917_s7 = sld [smem:[#allocation8 + $0x8]]  ;;  %s1927_s9 = sld [smem:[#allocation7 + $0x89]] }
  0x50   :  { %v179_v9 = vmul.f32 %v178_v7, %v1797_v1  ;;  %v185_v11 = vstv %s1861_s1  ;;  %v171_v14 = vstv %s1867_s3  ;;  %v183_v15 = vmul.f32 %v182_v10, %v1799_v2  ;;  %s1929_s10 = sld [smem:[#allocation7 + $0x109]]  ;;  %s1933_s11 = sld [smem:[#allocation10 + $0x8]] }
  0x51   :  { %v135_v8 = vadd.f32 %v134_v62, %v116_v61  ;;  %v153_v12 = vmul.f32 %v152_v58, %v150_v4  ;;  %v168_v13 = vadd.f32 %v167_v5, %v161_v63  ;;  %v194_v17 = vstv %s1869_s19  ;;  %s1937_s12 = sld [smem:[#allocation8 + $0x9]]  ;;  %s1939_s13 = sld [smem:[#allocation7 + $0xa]] }
  0x52   :  { %v180_v16 = vadd.f32 %v179_v9, %v176_v6  ;;  %v197_v18 = vstv %s1872_s20  ;;  %v201_v19 = vstv %s1874_s21  ;;  %v186_v22 = vadd.f32 %v185_v11, %v183_v15  ;;  %s1943_s4 = sld [smem:[#allocation7 + $0x8a]]  ;;  %s1954_s16 = sld [smem:[#allocation10 + $0x9]] }
  0x53   :  { %v154_v20 = vadd.f32 %v153_v12, %v135_v8  ;;  %v169_v21 = vmax.f32 %v168_v13, 0.0  ;;  %v195_v23 = vmul.f32 %v194_v17, %v1791_v0  ;;  %v190_v24 = vstv %s1880_s22  ;;  %s1948_s14 = sld [smem:[#allocation7 + $0x10a]]  ;;  %s1959_s17 = sld [smem:[#allocation7 + $0xb]] }
  0x54   :  { %v198_v25 = vmul.f32 %v197_v18, %v1797_v1  ;;  %v202_v26 = vmul.f32 %v201_v19, %v1799_v2  ;;  %v204_v27 = vstv %s1882_s23  ;;  %v187_v29 = vadd.f32 %v186_v22, %v180_v16  ;;  %s1950_s15 = sld [smem:[#allocation8 + $0xa]]  ;;  %s1961_s18 = sld [smem:[#allocation7 + $0x8b]] }
  0x55   :  { %v172_v28 = vmul.f32 %v171_v14, %v169_v21  ;;  %v213_v30 = vstv %s1887_s24  ;;  %v216_v31 = vstv %s1889_s25  ;;  %v220_v38 = vstv %s1894_s26  ;;  %s1967_s0 = sld [smem:[#allocation7 + $0x10b]]  ;;  %s1973_s3 = sld [smem:[#allocation10 + $0xa]] }
  0x56   :  { %v199_v32 = vadd.f32 %v198_v25, %v195_v23  ;;  %v205_v33 = vadd.f32 %v204_v27, %v202_v26  ;;  %v214_v34 = vmul.f32 %v213_v30, %v1791_v0  ;;  %v217_v35 = vmul.f32 %v216_v31, %v1797_v1  ;;  %s1969_s1 = sld [smem:[#allocation8 + $0xb]]  ;;  %s1975_s19 = sld [smem:[#allocation7 + $0xc]] }
  0x57   :  { %v173_v36 = vadd.f32 %v172_v28, %v154_v20  ;;  %v188_v37 = vmax.f32 %v187_v29, 0.0  ;;  %v223_v39 = vstv %s1896_s27  ;;  %v209_v41 = vstv %s1901_s28  ;;  %s1980_s20 = sld [smem:[#allocation7 + $0x8c]]  ;;  %s1988_s22 = sld [smem:[#allocation10 + $0xb]] }
  0x58   :  { %v206_v40 = vadd.f32 %v205_v33, %v199_v32  ;;  %v218_v42 = vadd.f32 %v217_v35, %v214_v34  ;;  %v221_v43 = vmul.f32 %v220_v38, %v1799_v2  ;;  %v232_v45 = vstv %s1903_s2  ;;  %s1982_s21 = sld [smem:[#allocation7 + $0x10c]]  ;;  %s1994_s24 = sld [smem:[#allocation7 + $0xd]] }
  0x59   :  { %v191_v44 = vmul.f32 %v190_v24, %v188_v37  ;;  %v235_v46 = vstv %s1907_s29  ;;  %v239_v47 = vstv %s1909_s30  ;;  %v233_v50 = vmul.f32 %v232_v45, %v1791_v0  ;;  %s1990_s23 = sld [smem:[#allocation8 + $0xc]]  ;;  %s1996_s25 = sld [smem:[#allocation7 + $0x8d]] }
  0x5a   :  { %v207_v48 = vmax.f32 %v206_v40, 0.0  ;;  %v224_v49 = vadd.f32 %v223_v39, %v221_v43  ;;  %v236_v51 = vmul.f32 %v235_v46, %v1797_v1  ;;  %v228_v53 = vstv %s1915_s6  ;;  %s2002_s26 = sld [smem:[#allocation7 + $0x10d]]  ;;  %s2009_s28 = sld [smem:[#allocation10 + $0xc]] }
  0x5b   :  { %v192_v52 = vadd.f32 %v191_v44, %v173_v36  ;;  %v240_v54 = vmul.f32 %v239_v47, %v1799_v2  ;;  %v242_v55 = vstv %s1917_s7  ;;  %v251_v59 = vstv %s1923_s8  ;;  %s2004_s27 = sld [smem:[#allocation8 + $0xd]]  ;;  %s2011_s2 = sld [smem:[#allocation7 + $0xe]] }
  0x5c   :  { %v210_v56 = vmul.f32 %v209_v41, %v207_v48  ;;  %v225_v57 = vadd.f32 %v224_v49, %v218_v42  ;;  %v237_v58 = vadd.f32 %v236_v51, %v233_v50  ;;  %v252_v61 = vmul.f32 %v251_v59, %v1791_v0  ;;  %s2015_s29 = sld [smem:[#allocation7 + $0x8e]]  ;;  %s2023_s6 = sld [smem:[#allocation10 + $0xd]] }
  0x5d   :  { %v243_v60 = vadd.f32 %v242_v55, %v240_v54  ;;  %v254_v62 = vstv %s1927_s9  ;;  %v258_v63 = vstv %s1929_s10  ;;  %v247_v8 = vstv %s1933_s11  ;;  %s2017_s30 = sld [smem:[#allocation7 + $0x10e]]  ;;  %s2031_s8 = sld [smem:[#allocation7 + $0xf]] }
  0x5e   :  { %v211_v3 = vadd.f32 %v210_v56, %v192_v52  ;;  %v226_v4 = vmax.f32 %v225_v57, 0.0  ;;  %v255_v5 = vmul.f32 %v254_v62, %v1797_v1  ;;  %v259_v6 = vmul.f32 %v258_v63, %v1799_v2  ;;  %s2025_s7 = sld [smem:[#allocation8 + $0xe]]  ;;  %s2035_s9 = sld [smem:[#allocation7 + $0x8f]] }
  0x5f   :  { %v244_v7 = vadd.f32 %v243_v60, %v237_v58  ;;  %v261_v9 = vstv %s1937_s12  ;;  %v270_v10 = vstv %s1939_s13  ;;  %v273_v16 = vstv %s1943_s4  ;;  %s2037_s10 = sld [smem:[#allocation7 + $0x10f]]  ;;  %s2041_s11 = sld [smem:[#allocation10 + $0xe]] }
  0x60   :  { %v229_v11 = vmul.f32 %v228_v53, %v226_v4  ;;  %v256_v12 = vadd.f32 %v255_v5, %v252_v61  ;;  %v262_v13 = vadd.f32 %v261_v9, %v259_v6  ;;  %v271_v14 = vmul.f32 %v270_v10, %v1791_v0  ;;  %s2045_s12 = sld [smem:[#allocation8 + $0xf]]  ;;  %s2047_s13 = sld [smem:[#allocation7 + $0x10]] }
  0x61   :  { %v245_v15 = vmax.f32 %v244_v7, 0.0  ;;  %v277_v17 = vstv %s1948_s14  ;;  %v280_v18 = vstv %s1950_s15  ;;  %v274_v21 = vmul.f32 %v273_v16, %v1797_v1  ;;  %s2051_s4 = sld [smem:[#allocation7 + $0x90]] }
  0x62   :  { %v230_v19 = vadd.f32 %v229_v11, %v211_v3  ;;  %v263_v20 = vadd.f32 %v262_v13, %v256_v12  ;;  %v278_v22 = vmul.f32 %v277_v17, %v1799_v2  ;;  %v266_v24 = vstv %s1954_s16  ;;  %s2056_s14 = sld [smem:[#allocation7 + $0x110]]  ;;  %s2062_s16 = sld [smem:[#allocation10 + $0xf]] }
  0x63   :  { %v248_v23 = vmul.f32 %v247_v8, %v245_v15  ;;  %v289_v25 = vstv %s1959_s17  ;;  %v292_v26 = vstv %s1961_s18  ;;  %v275_v28 = vadd.f32 %v274_v21, %v271_v14  ;;  %s2058_s15 = sld [smem:[#allocation8 + $0x10]]  ;;  %s2067_s17 = sld [smem:[#allocation7 + $0x11]] }
  0x64   :  { %v264_v27 = vmax.f32 %v263_v20, 0.0  ;;  %v281_v29 = vadd.f32 %v280_v18, %v278_v22  ;;  %v290_v30 = vmul.f32 %v289_v25, %v1791_v0  ;;  %v293_v32 = vmul.f32 %v292_v26, %v1797_v1  ;;  %s2069_s18 = sld [smem:[#allocation7 + $0x91]] }
  0x65   :  { %v249_v31 = vadd.f32 %v248_v23, %v230_v19  ;;  %v296_v33 = vstv %s1967_s0  ;;  %v299_v34 = vstv %s1969_s1  ;;  %v285_v37 = vstv %s1973_s3  ;;  %s2075_s0 = sld [smem:[#allocation7 + $0x111]]  ;;  %s2081_s3 = sld [smem:[#allocation10 + $0x10]] }
  0x66   :  { %v267_v35 = vmul.f32 %v266_v24, %v264_v27  ;;  %v282_v36 = vadd.f32 %v281_v29, %v275_v28  ;;  %v297_v38 = vmul.f32 %v296_v33, %v1799_v2  ;;  %v294_v39 = vadd.f32 %v293_v32, %v290_v30  ;;  %s2077_s1 = sld [smem:[#allocation8 + $0x11]] }
  0x67   :  { %v308_v40 = vstv %s1975_s19  ;;  %v311_v41 = vstv %s1980_s20  ;;  %v315_v42 = vstv %s1982_s21  ;;  %v304_v47 = vstv %s1988_s22  ;;  %s2083_s19 = sld [smem:[#allocation7 + $0x12]]  ;;  %s2096_s22 = sld [smem:[#allocation10 + $0x11]] }
  0x68   :  { %v268_v43 = vadd.f32 %v267_v35, %v249_v31  ;;  %v283_v44 = vmax.f32 %v282_v36, 0.0  ;;  %v300_v45 = vadd.f32 %v299_v34, %v297_v38  ;;  %v309_v46 = vmul.f32 %v308_v40, %v1791_v0  ;;  %s2088_s20 = sld [smem:[#allocation7 + $0x92]] }
  0x69   :  { %v312_v48 = vmul.f32 %v311_v41, %v1797_v1  ;;  %v316_v49 = vmul.f32 %v315_v42, %v1799_v2  ;;  %v318_v50 = vstv %s1990_s23  ;;  %v327_v53 = vstv %s1994_s24  ;;  %s2090_s21 = sld [smem:[#allocation7 + $0x112]]  ;;  %s2102_s24 = sld [smem:[#allocation7 + $0x13]] }
  0x6a   :  { %v286_v51 = vmul.f32 %v285_v37, %v283_v44  ;;  %v301_v52 = vadd.f32 %v300_v45, %v294_v39  ;;  %v330_v54 = vstv %s1996_s25  ;;  %v328_v57 = vmul.f32 %v327_v53, %v1791_v0  ;;  %s2098_s23 = sld [smem:[#allocation8 + $0x12]]  ;;  %s2104_s25 = sld [smem:[#allocation7 + $0x93]] }
  0x6b   :  { %v313_v55 = vadd.f32 %v312_v48, %v309_v46  ;;  %v319_v56 = vadd.f32 %v318_v50, %v316_v49  ;;  %v331_v58 = vmul.f32 %v330_v54, %v1797_v1  ;;  %v334_v61 = vstv %s2002_s26  ;;  %s2110_s26 = sld [smem:[#allocation7 + $0x113]] }
  0x6c   :  { %v287_v59 = vadd.f32 %v286_v51, %v268_v43  ;;  %v302_v60 = vmax.f32 %v301_v52, 0.0  ;;  %v337_v62 = vstv %s2004_s27  ;;  %v323_v3 = vstv %s2009_s28  ;;  %s2112_s27 = sld [smem:[#allocation8 + $0x13]]  ;;  %s2117_s28 = sld [smem:[#allocation10 + $0x12]] }
  0x6d   :  { %v320_v63 = vadd.f32 %v319_v56, %v313_v55  ;;  %v332_v4 = vadd.f32 %v331_v58, %v328_v57  ;;  %v335_v5 = vmul.f32 %v334_v61, %v1799_v2  ;;  %v346_v7 = vstv %s2011_s2  ;;  %s2119_s2 = sld [smem:[#allocation7 + $0x14]] }
  0x6e   :  { %v305_v6 = vmul.f32 %v304_v47, %v302_v60  ;;  %v349_v8 = vstv %s2015_s29  ;;  %v353_v9 = vstv %s2017_s30  ;;  %v347_v12 = vmul.f32 %v346_v7, %v1791_v0  ;;  %s2123_s29 = sld [smem:[#allocation7 + $0x94]] }
  0x6f   :  { %v321_v10 = vmax.f32 %v320_v63, 0.0  ;;  %v338_v11 = vadd.f32 %v337_v62, %v335_v5  ;;  %v350_v13 = vmul.f32 %v349_v8, %v1797_v1  ;;  %v342_v15 = vstv %s2023_s6  ;;  %s2125_s30 = sld [smem:[#allocation7 + $0x114]]  ;;  %s2131_s6 = sld [smem:[#allocation10 + $0x13]] }
  0x70   :  { %v306_v14 = vadd.f32 %v305_v6, %v287_v59  ;;  %v354_v16 = vmul.f32 %v353_v9, %v1799_v2  ;;  %v356_v17 = vstv %s2025_s7  ;;  %v365_v21 = vstv %s2031_s8  ;;  %s2133_s7 = sld [smem:[#allocation8 + $0x14]]  ;;  %s2139_s8 = sld [smem:[#allocation7 + $0x15]] }
  0x71   :  { %v324_v18 = vmul.f32 %v323_v3, %v321_v10  ;;  %v339_v19 = vadd.f32 %v338_v11, %v332_v4  ;;  %v351_v20 = vadd.f32 %v350_v13, %v347_v12  ;;  %v366_v23 = vmul.f32 %v365_v21, %v1791_v0 }
  0x72   :  { %v357_v22 = vadd.f32 %v356_v17, %v354_v16  ;;  %v368_v24 = vstv %s2035_s9  ;;  %v372_v25 = vstv %s2037_s10  ;;  %v361_v31 = vstv %s2041_s11  ;;  %s2143_s9 = sld [smem:[#allocation7 + $0x95]]  ;;  %s2149_s11 = sld [smem:[#allocation10 + $0x14]] }
  0x73   :  { %v325_v26 = vadd.f32 %v324_v18, %v306_v14  ;;  %v340_v27 = vmax.f32 %v339_v19, 0.0  ;;  %v369_v28 = vmul.f32 %v368_v24, %v1797_v1  ;;  %v373_v29 = vmul.f32 %v372_v25, %v1799_v2  ;;  %s2145_s10 = sld [smem:[#allocation7 + $0x115]] }
  0x74   :  { %v358_v30 = vadd.f32 %v357_v22, %v351_v20  ;;  %v375_v32 = vstv %s2045_s12  ;;  %v384_v33 = vstv %s2047_s13  ;;  %v387_v39 = vstv %s2051_s4  ;;  %s2153_s12 = sld [smem:[#allocation8 + $0x15]]  ;;  %s2155_s13 = sld [smem:[#allocation7 + $0x16]] }
  0x75   :  { %v343_v34 = vmul.f32 %v342_v15, %v340_v27  ;;  %v370_v35 = vadd.f32 %v369_v28, %v366_v23  ;;  %v376_v36 = vadd.f32 %v375_v32, %v373_v29  ;;  %v385_v37 = vmul.f32 %v384_v33, %v1791_v0  ;;  %s2159_s4 = sld [smem:[#allocation7 + $0x96]] }
  0x76   :  { %v359_v38 = vmax.f32 %v358_v30, 0.0  ;;  %v391_v40 = vstv %s2056_s14  ;;  %v394_v41 = vstv %s2058_s15  ;;  %v388_v44 = vmul.f32 %v387_v39, %v1797_v1  ;;  %s2164_s14 = sld [smem:[#allocation7 + $0x116]] }
  0x77   :  { %v344_v42 = vadd.f32 %v343_v34, %v325_v26  ;;  %v377_v43 = vadd.f32 %v376_v36, %v370_v35  ;;  %v392_v45 = vmul.f32 %v391_v40, %v1799_v2  ;;  %v380_v47 = vstv %s2062_s16  ;;  %s2166_s15 = sld [smem:[#allocation8 + $0x16]]  ;;  %s2170_s16 = sld [smem:[#allocation10 + $0x15]] }
  0x78   :  { %v362_v46 = vmul.f32 %v361_v31, %v359_v38  ;;  %v403_v48 = vstv %s2067_s17  ;;  %v406_v49 = vstv %s2069_s18  ;;  %v389_v51 = vadd.f32 %v388_v44, %v385_v37  ;;  %s2175_s17 = sld [smem:[#allocation7 + $0x17]] }
  0x79   :  { %v378_v50 = vmax.f32 %v377_v43, 0.0  ;;  %v395_v52 = vadd.f32 %v394_v41, %v392_v45  ;;  %v404_v53 = vmul.f32 %v403_v48, %v1791_v0  ;;  %v407_v55 = vmul.f32 %v406_v49, %v1797_v1  ;;  %s2177_s18 = sld [smem:[#allocation7 + $0x97]] }
  0x7a   :  { %v363_v54 = vadd.f32 %v362_v46, %v344_v42  ;;  %v410_v56 = vstv %s2075_s0  ;;  %v413_v57 = vstv %s2077_s1  ;;  %v399_v60 = vstv %s2081_s3  ;;  %s2183_s0 = sld [smem:[#allocation7 + $0x117]]  ;;  %s2189_s3 = sld [smem:[#allocation10 + $0x16]] }
  0x7b   :  { %v381_v58 = vmul.f32 %v380_v47, %v378_v50  ;;  %v396_v59 = vadd.f32 %v395_v52, %v389_v51  ;;  %v411_v61 = vmul.f32 %v410_v56, %v1799_v2  ;;  %v408_v62 = vadd.f32 %v407_v55, %v404_v53  ;;  %s2185_s1 = sld [smem:[#allocation8 + $0x17]] }
  0x7c   :  { %v422_v63 = vstv %s2083_s19  ;;  %v425_v3 = vstv %s2088_s20  ;;  %v429_v4 = vstv %s2090_s21  ;;  %v418_v9 = vstv %s2096_s22  ;;  %s2191_s19 = sld [smem:[#allocation7 + $0x18]]  ;;  %s2204_s22 = sld [smem:[#allocation10 + $0x17]] }
  0x7d   :  { %v382_v5 = vadd.f32 %v381_v58, %v363_v54  ;;  %v397_v6 = vmax.f32 %v396_v59, 0.0  ;;  %v414_v7 = vadd.f32 %v413_v57, %v411_v61  ;;  %v423_v8 = vmul.f32 %v422_v63, %v1791_v0  ;;  %s2196_s20 = sld [smem:[#allocation7 + $0x98]] }
  0x7e   :  { %v426_v10 = vmul.f32 %v425_v3, %v1797_v1  ;;  %v430_v11 = vmul.f32 %v429_v4, %v1799_v2  ;;  %v432_v12 = vstv %s2098_s23  ;;  %v441_v15 = vstv %s2102_s24  ;;  %s2198_s21 = sld [smem:[#allocation7 + $0x118]]  ;;  %s2210_s24 = sld [smem:[#allocation7 + $0x19]] }
  0x7f   :  { %v400_v13 = vmul.f32 %v399_v60, %v397_v6  ;;  %v415_v14 = vadd.f32 %v414_v7, %v408_v62  ;;  %v444_v16 = vstv %s2104_s25  ;;  %v442_v19 = vmul.f32 %v441_v15, %v1791_v0  ;;  %s2206_s23 = sld [smem:[#allocation8 + $0x18]]  ;;  %s2212_s25 = sld [smem:[#allocation7 + $0x99]] }
  0x80   :  { %v427_v17 = vadd.f32 %v426_v10, %v423_v8  ;;  %v433_v18 = vadd.f32 %v432_v12, %v430_v11  ;;  %v445_v20 = vmul.f32 %v444_v16, %v1797_v1  ;;  %v448_v23 = vstv %s2110_s26  ;;  %s2218_s26 = sld [smem:[#allocation7 + $0x119]] }
  0x81   :  { %v401_v21 = vadd.f32 %v400_v13, %v382_v5  ;;  %v416_v22 = vmax.f32 %v415_v14, 0.0  ;;  %v451_v24 = vstv %s2112_s27  ;;  %v437_v26 = vstv %s2117_s28  ;;  %s2220_s27 = sld [smem:[#allocation8 + $0x19]]  ;;  %s2225_s28 = sld [smem:[#allocation10 + $0x18]] }
  0x82   :  { %v434_v25 = vadd.f32 %v433_v18, %v427_v17  ;;  %v446_v27 = vadd.f32 %v445_v20, %v442_v19  ;;  %v449_v28 = vmul.f32 %v448_v23, %v1799_v2  ;;  %v460_v30 = vstv %s2119_s2  ;;  %s2227_s2 = sld [smem:[#allocation7 + $0x1a]] }
  0x83   :  { %v419_v29 = vmul.f32 %v418_v9, %v416_v22  ;;  %v463_v31 = vstv %s2123_s29  ;;  %v467_v32 = vstv %s2125_s30  ;;  %v461_v35 = vmul.f32 %v460_v30, %v1791_v0  ;;  %s2231_s29 = sld [smem:[#allocation7 + $0x9a]] }
  0x84   :  { %v435_v33 = vmax.f32 %v434_v25, 0.0  ;;  %v452_v34 = vadd.f32 %v451_v24, %v449_v28  ;;  %v464_v36 = vmul.f32 %v463_v31, %v1797_v1  ;;  %v456_v38 = vstv %s2131_s6  ;;  %s2233_s30 = sld [smem:[#allocation7 + $0x11a]]  ;;  %s2239_s6 = sld [smem:[#allocation10 + $0x19]] }
  0x85   :  { %v420_v37 = vadd.f32 %v419_v29, %v401_v21  ;;  %v468_v39 = vmul.f32 %v467_v32, %v1799_v2  ;;  %v470_v40 = vstv %s2133_s7  ;;  %v479_v44 = vstv %s2139_s8  ;;  %s2241_s7 = sld [smem:[#allocation8 + $0x1a]]  ;;  %s2247_s8 = sld [smem:[#allocation7 + $0x1b]] }
  0x86   :  { %v438_v41 = vmul.f32 %v437_v26, %v435_v33  ;;  %v453_v42 = vadd.f32 %v452_v34, %v446_v27  ;;  %v465_v43 = vadd.f32 %v464_v36, %v461_v35  ;;  %v480_v46 = vmul.f32 %v479_v44, %v1791_v0 }
  0x87   :  { %v471_v45 = vadd.f32 %v470_v40, %v468_v39  ;;  %v482_v47 = vstv %s2143_s9  ;;  %v486_v48 = vstv %s2145_s10  ;;  %v475_v54 = vstv %s2149_s11  ;;  %s2251_s9 = sld [smem:[#allocation7 + $0x9b]]  ;;  %s2257_s11 = sld [smem:[#allocation10 + $0x1a]] }
  0x88   :  { %v439_v49 = vadd.f32 %v438_v41, %v420_v37  ;;  %v454_v50 = vmax.f32 %v453_v42, 0.0  ;;  %v483_v51 = vmul.f32 %v482_v47, %v1797_v1  ;;  %v487_v52 = vmul.f32 %v486_v48, %v1799_v2  ;;  %s2253_s10 = sld [smem:[#allocation7 + $0x11b]] }
  0x89   :  { %v472_v53 = vadd.f32 %v471_v45, %v465_v43  ;;  %v489_v55 = vstv %s2153_s12  ;;  %v498_v56 = vstv %s2155_s13  ;;  %v501_v62 = vstv %s2159_s4  ;;  %s2261_s12 = sld [smem:[#allocation8 + $0x1b]]  ;;  %s2263_s13 = sld [smem:[#allocation7 + $0x1c]] }
  0x8a   :  { %v457_v57 = vmul.f32 %v456_v38, %v454_v50  ;;  %v484_v58 = vadd.f32 %v483_v51, %v480_v46  ;;  %v490_v59 = vadd.f32 %v489_v55, %v487_v52  ;;  %v499_v60 = vmul.f32 %v498_v56, %v1791_v0  ;;  %s2267_s4 = sld [smem:[#allocation7 + $0x9c]] }
  0x8b   :  { %v473_v61 = vmax.f32 %v472_v53, 0.0  ;;  %v505_v63 = vstv %s2164_s14  ;;  %v508_v3 = vstv %s2166_s15  ;;  %v502_v6 = vmul.f32 %v501_v62, %v1797_v1  ;;  %s2272_s14 = sld [smem:[#allocation7 + $0x11c]] }
  0x8c   :  { %v458_v4 = vadd.f32 %v457_v57, %v439_v49  ;;  %v491_v5 = vadd.f32 %v490_v59, %v484_v58  ;;  %v506_v7 = vmul.f32 %v505_v63, %v1799_v2  ;;  %v494_v9 = vstv %s2170_s16  ;;  %s2274_s15 = sld [smem:[#allocation8 + $0x1c]]  ;;  %s2278_s16 = sld [smem:[#allocation10 + $0x1b]] }
  0x8d   :  { %v476_v8 = vmul.f32 %v475_v54, %v473_v61  ;;  %v517_v10 = vstv %s2175_s17  ;;  %v520_v11 = vstv %s2177_s18  ;;  %v503_v13 = vadd.f32 %v502_v6, %v499_v60  ;;  %s2283_s17 = sld [smem:[#allocation7 + $0x1d]] }
  0x8e   :  { %v492_v12 = vmax.f32 %v491_v5, 0.0  ;;  %v509_v14 = vadd.f32 %v508_v3, %v506_v7  ;;  %v518_v15 = vmul.f32 %v517_v10, %v1791_v0  ;;  %v521_v17 = vmul.f32 %v520_v11, %v1797_v1  ;;  %s2285_s18 = sld [smem:[#allocation7 + $0x9d]]  ;;  %v2288_v7 = vld [vmem:[#allocation3] sm:$0xff]  ;;  %v2297_v11 = vld [vmem:[#allocation3 + $0x8] sm:$0xff] }
  0x8f   :  { %v477_v16 = vadd.f32 %v476_v8, %v458_v4  ;;  %v524_v18 = vstv %s2183_s0  ;;  %v527_v19 = vstv %s2185_s1  ;;  %v513_v22 = vstv %s2189_s3  ;;  %s2293_s0 = sld [smem:[#allocation7 + $0x11d]]  ;;  %s2303_s3 = sld [smem:[#allocation10 + $0x1c]] }
  0x90   :  { %v495_v20 = vmul.f32 %v494_v9, %v492_v12  ;;  %v510_v21 = vadd.f32 %v509_v14, %v503_v13  ;;  %v525_v23 = vmul.f32 %v524_v18, %v1799_v2  ;;  %v522_v24 = vadd.f32 %v521_v17, %v518_v15  ;;  %s2295_s1 = sld [smem:[#allocation8 + $0x1d]]  ;;  %v2300_v13 = vld [vmem:[#allocation3 + $0x10] sm:$0xff] }
  0x91   :  { %v536_v25 = vstv %s2191_s19  ;;  %v539_v26 = vstv %s2196_s20  ;;  %v543_v27 = vstv %s2198_s21  ;;  %v532_v32 = vstv %s2204_s22  ;;  %s2305_s19 = sld [smem:[#allocation7 + $0x1e]]  ;;  %s2318_s22 = sld [smem:[#allocation10 + $0x1d]] }
  0x92   :  { %v496_v28 = vadd.f32 %v495_v20, %v477_v16  ;;  %v511_v29 = vmax.f32 %v510_v21, 0.0  ;;  %v528_v30 = vadd.f32 %v527_v19, %v525_v23  ;;  %v537_v31 = vmul.f32 %v536_v25, %v1791_v0  ;;  %s2310_s20 = sld [smem:[#allocation7 + $0x9e]] }
  0x93   :  { %v540_v33 = vmul.f32 %v539_v26, %v1797_v1  ;;  %v544_v34 = vmul.f32 %v543_v27, %v1799_v2  ;;  %v546_v35 = vstv %s2206_s23  ;;  %v555_v38 = vstv %s2210_s24  ;;  %s2312_s21 = sld [smem:[#allocation7 + $0x11e]]  ;;  %s2324_s24 = sld [smem:[#allocation7 + $0x1f]] }
  0x94   :  { %v514_v36 = vmul.f32 %v513_v22, %v511_v29  ;;  %v529_v37 = vadd.f32 %v528_v30, %v522_v24  ;;  %v558_v39 = vstv %s2212_s25  ;;  %v556_v42 = vmul.f32 %v555_v38, %v1791_v0  ;;  %s2320_s23 = sld [smem:[#allocation8 + $0x1e]]  ;;  %s2326_s25 = sld [smem:[#allocation7 + $0x9f]] }
  0x95   :  { %v541_v40 = vadd.f32 %v540_v33, %v537_v31  ;;  %v547_v41 = vadd.f32 %v546_v35, %v544_v34  ;;  %v559_v43 = vmul.f32 %v558_v39, %v1797_v1  ;;  %v562_v46 = vstv %s2218_s26  ;;  %s2332_s26 = sld [smem:[#allocation7 + $0x11f]] }
  0x96   :  { %v515_v44 = vadd.f32 %v514_v36, %v496_v28  ;;  %v530_v45 = vmax.f32 %v529_v37, 0.0  ;;  %v565_v47 = vstv %s2220_s27  ;;  %v551_v49 = vstv %s2225_s28  ;;  %s2334_s27 = sld [smem:[#allocation8 + $0x1f]]  ;;  %s2339_s28 = sld [smem:[#allocation10 + $0x1e]] }
  0x97   :  { %v548_v48 = vadd.f32 %v547_v41, %v541_v40  ;;  %v560_v50 = vadd.f32 %v559_v43, %v556_v42  ;;  %v563_v51 = vmul.f32 %v562_v46, %v1799_v2  ;;  %v574_v53 = vstv %s2227_s2  ;;  %s2341_s2 = sld [smem:[#allocation7 + $0x20]] }
  0x98   :  { %v533_v52 = vmul.f32 %v532_v32, %v530_v45  ;;  %v577_v54 = vstv %s2231_s29  ;;  %v581_v55 = vstv %s2233_s30  ;;  %v575_v58 = vmul.f32 %v574_v53, %v1791_v0  ;;  %s2345_s29 = sld [smem:[#allocation7 + $0xa0]] }
  0x99   :  { %v549_v56 = vmax.f32 %v548_v48, 0.0  ;;  %v566_v57 = vadd.f32 %v565_v47, %v563_v51  ;;  %v578_v59 = vmul.f32 %v577_v54, %v1797_v1  ;;  %v570_v61 = vstv %s2239_s6  ;;  %s2347_s30 = sld [smem:[#allocation7 + $0x120]]  ;;  %s2353_s6 = sld [smem:[#allocation10 + $0x1f]] }
  0x9a   :  { %v534_v60 = vadd.f32 %v533_v52, %v515_v44  ;;  %v582_v62 = vmul.f32 %v581_v55, %v1799_v2  ;;  %v584_v63 = vstv %s2241_s7  ;;  %v593_v6 = vstv %s2247_s8  ;;  %s2355_s7 = sld [smem:[#allocation8 + $0x20]]  ;;  %s2361_s8 = sld [smem:[#allocation7 + $0x21]] }
  0x9b   :  { %v552_v3 = vmul.f32 %v551_v49, %v549_v56  ;;  %v567_v4 = vadd.f32 %v566_v57, %v560_v50  ;;  %v579_v5 = vadd.f32 %v578_v59, %v575_v58  ;;  %v594_v1 = vmul.f32 %v2288_v7, %v593_v6 }
  0x9c   :  { %v585_v0 = vadd.f32 %v584_v63, %v582_v62  ;;  %v596_v8 = vstv %s2251_s9  ;;  %v600_v9 = vstv %s2253_s10  ;;  %v589_v16 = vstv %s2257_s11  ;;  %s2365_s9 = sld [smem:[#allocation7 + $0xa1]]  ;;  %s2371_s11 = sld [smem:[#allocation10 + $0x20]] }
  0x9d   :  { %v553_v2 = vadd.f32 %v552_v3, %v534_v60  ;;  %v568_v10 = vmax.f32 %v567_v4, 0.0  ;;  %v597_v12 = vmul.f32 %v2297_v11, %v596_v8  ;;  %v601_v14 = vmul.f32 %v2300_v13, %v600_v9  ;;  %s2367_s10 = sld [smem:[#allocation7 + $0x121]] }
  0x9e   :  { %v586_v15 = vadd.f32 %v585_v0, %v579_v5  ;;  %v603_v17 = vstv %s2261_s12  ;;  %v612_v18 = vstv %s2263_s13  ;;  %v615_v24 = vstv %s2267_s4  ;;  %s2375_s12 = sld [smem:[#allocation8 + $0x21]]  ;;  %s2377_s13 = sld [smem:[#allocation7 + $0x22]] }
  0x9f   :  { %v571_v19 = vmul.f32 %v570_v61, %v568_v10  ;;  %v598_v20 = vadd.f32 %v597_v12, %v594_v1  ;;  %v604_v21 = vadd.f32 %v603_v17, %v601_v14  ;;  %v613_v22 = vmul.f32 %v2288_v7, %v612_v18  ;;  %s2381_s4 = sld [smem:[#allocation7 + $0xa2]] }
  0xa0   :  { %v587_v23 = vmax.f32 %v586_v15, 0.0  ;;  %v619_v25 = vstv %s2272_s14  ;;  %v622_v26 = vstv %s2274_s15  ;;  %v616_v29 = vmul.f32 %v2297_v11, %v615_v24  ;;  %s2386_s14 = sld [smem:[#allocation7 + $0x122]] }
  0xa1   :  { %v572_v27 = vadd.f32 %v571_v19, %v553_v2  ;;  %v605_v28 = vadd.f32 %v604_v21, %v598_v20  ;;  %v620_v30 = vmul.f32 %v2300_v13, %v619_v25  ;;  %v608_v32 = vstv %s2278_s16  ;;  %s2388_s15 = sld [smem:[#allocation8 + $0x22]]  ;;  %s2392_s16 = sld [smem:[#allocation10 + $0x21]] }
  0xa2   :  { %v590_v31 = vmul.f32 %v589_v16, %v587_v23  ;;  %v631_v33 = vstv %s2283_s17  ;;  %v634_v34 = vstv %s2285_s18  ;;  %v617_v36 = vadd.f32 %v616_v29, %v613_v22  ;;  %s2397_s17 = sld [smem:[#allocation7 + $0x23]] }
  0xa3   :  { %v606_v35 = vmax.f32 %v605_v28, 0.0  ;;  %v623_v37 = vadd.f32 %v622_v26, %v620_v30  ;;  %v632_v38 = vmul.f32 %v2288_v7, %v631_v33  ;;  %v635_v40 = vmul.f32 %v2297_v11, %v634_v34  ;;  %s2399_s18 = sld [smem:[#allocation7 + $0xa3]] }
  0xa4   :  { %v591_v39 = vadd.f32 %v590_v31, %v572_v27  ;;  %v638_v41 = vstv %s2293_s0  ;;  %v641_v42 = vstv %s2295_s1  ;;  %v627_v45 = vstv %s2303_s3  ;;  %s2405_s0 = sld [smem:[#allocation7 + $0x123]]  ;;  %s2411_s3 = sld [smem:[#allocation10 + $0x22]] }
  0xa5   :  { %v609_v43 = vmul.f32 %v608_v32, %v606_v35  ;;  %v624_v44 = vadd.f32 %v623_v37, %v617_v36  ;;  %v639_v46 = vmul.f32 %v2300_v13, %v638_v41  ;;  %v636_v47 = vadd.f32 %v635_v40, %v632_v38  ;;  %s2407_s1 = sld [smem:[#allocation8 + $0x23]] }
  0xa6   :  { %v650_v48 = vstv %s2305_s19  ;;  %v653_v49 = vstv %s2310_s20  ;;  %v657_v50 = vstv %s2312_s21  ;;  %v646_v55 = vstv %s2318_s22  ;;  %s2413_s19 = sld [smem:[#allocation7 + $0x24]]  ;;  %s2426_s22 = sld [smem:[#allocation10 + $0x23]] }
  0xa7   :  { %v610_v51 = vadd.f32 %v609_v43, %v591_v39  ;;  %v625_v52 = vmax.f32 %v624_v44, 0.0  ;;  %v642_v53 = vadd.f32 %v641_v42, %v639_v46  ;;  %v651_v54 = vmul.f32 %v2288_v7, %v650_v48  ;;  %s2418_s20 = sld [smem:[#allocation7 + $0xa4]] }
  0xa8   :  { %v654_v56 = vmul.f32 %v2297_v11, %v653_v49  ;;  %v658_v57 = vmul.f32 %v2300_v13, %v657_v50  ;;  %v660_v58 = vstv %s2320_s23  ;;  %v669_v61 = vstv %s2324_s24  ;;  %s2420_s21 = sld [smem:[#allocation7 + $0x124]]  ;;  %s2432_s24 = sld [smem:[#allocation7 + $0x25]] }
  0xa9   :  { %v628_v59 = vmul.f32 %v627_v45, %v625_v52  ;;  %v643_v60 = vadd.f32 %v642_v53, %v636_v47  ;;  %v672_v62 = vstv %s2326_s25  ;;  %v670_v4 = vmul.f32 %v2288_v7, %v669_v61  ;;  %s2428_s23 = sld [smem:[#allocation8 + $0x24]]  ;;  %s2434_s25 = sld [smem:[#allocation7 + $0xa5]] }
  0xaa   :  { %v655_v63 = vadd.f32 %v654_v56, %v651_v54  ;;  %v661_v3 = vadd.f32 %v660_v58, %v658_v57  ;;  %v673_v5 = vmul.f32 %v2297_v11, %v672_v62  ;;  %v676_v1 = vstv %s2332_s26  ;;  %s2440_s26 = sld [smem:[#allocation7 + $0x125]] }
  0xab   :  { %v629_v6 = vadd.f32 %v628_v59, %v610_v51  ;;  %v644_v0 = vmax.f32 %v643_v60, 0.0  ;;  %v679_v8 = vstv %s2334_s27  ;;  %v665_v2 = vstv %s2339_s28  ;;  %s2442_s27 = sld [smem:[#allocation8 + $0x25]]  ;;  %s2447_s28 = sld [smem:[#allocation10 + $0x24]] }
  0xac   :  { %v662_v9 = vadd.f32 %v661_v3, %v655_v63  ;;  %v674_v10 = vadd.f32 %v673_v5, %v670_v4  ;;  %v677_v12 = vmul.f32 %v2300_v13, %v676_v1  ;;  %v688_v15 = vstv %s2341_s2  ;;  %s2449_s2 = sld [smem:[#allocation7 + $0x26]] }
  0xad   :  { %v647_v14 = vmul.f32 %v646_v55, %v644_v0  ;;  %v691_v16 = vstv %s2345_s29  ;;  %v695_v17 = vstv %s2347_s30  ;;  %v689_v20 = vmul.f32 %v2288_v7, %v688_v15  ;;  %s2453_s29 = sld [smem:[#allocation7 + $0xa6]] }
  0xae   :  { %v663_v18 = vmax.f32 %v662_v9, 0.0  ;;  %v680_v19 = vadd.f32 %v679_v8, %v677_v12  ;;  %v692_v21 = vmul.f32 %v2297_v11, %v691_v16  ;;  %v684_v23 = vstv %s2353_s6  ;;  %s2455_s30 = sld [smem:[#allocation7 + $0x126]]  ;;  %s2461_s6 = sld [smem:[#allocation10 + $0x25]] }
  0xaf   :  { %v648_v22 = vadd.f32 %v647_v14, %v629_v6  ;;  %v696_v24 = vmul.f32 %v2300_v13, %v695_v17  ;;  %v698_v25 = vstv %s2355_s7  ;;  %v707_v29 = vstv %s2361_s8  ;;  %s2463_s7 = sld [smem:[#allocation8 + $0x26]]  ;;  %s2469_s8 = sld [smem:[#allocation7 + $0x27]] }
  0xb0   :  { %v666_v26 = vmul.f32 %v665_v2, %v663_v18  ;;  %v681_v27 = vadd.f32 %v680_v19, %v674_v10  ;;  %v693_v28 = vadd.f32 %v692_v21, %v689_v20  ;;  %v708_v31 = vmul.f32 %v2288_v7, %v707_v29 }
  0xb1   :  { %v699_v30 = vadd.f32 %v698_v25, %v696_v24  ;;  %v710_v32 = vstv %s2365_s9  ;;  %v714_v33 = vstv %s2367_s10  ;;  %v703_v39 = vstv %s2371_s11  ;;  %s2473_s9 = sld [smem:[#allocation7 + $0xa7]]  ;;  %s2479_s11 = sld [smem:[#allocation10 + $0x26]] }
  0xb2   :  { %v667_v34 = vadd.f32 %v666_v26, %v648_v22  ;;  %v682_v35 = vmax.f32 %v681_v27, 0.0  ;;  %v711_v36 = vmul.f32 %v2297_v11, %v710_v32  ;;  %v715_v37 = vmul.f32 %v2300_v13, %v714_v33  ;;  %s2475_s10 = sld [smem:[#allocation7 + $0x127]] }
  0xb3   :  { %v700_v38 = vadd.f32 %v699_v30, %v693_v28  ;;  %v717_v40 = vstv %s2375_s12  ;;  %v726_v41 = vstv %s2377_s13  ;;  %v729_v47 = vstv %s2381_s4  ;;  %s2483_s12 = sld [smem:[#allocation8 + $0x27]]  ;;  %s2485_s13 = sld [smem:[#allocation7 + $0x28]] }
  0xb4   :  { %v685_v42 = vmul.f32 %v684_v23, %v682_v35  ;;  %v712_v43 = vadd.f32 %v711_v36, %v708_v31  ;;  %v718_v44 = vadd.f32 %v717_v40, %v715_v37  ;;  %v727_v45 = vmul.f32 %v2288_v7, %v726_v41  ;;  %s2489_s4 = sld [smem:[#allocation7 + $0xa8]] }
  0xb5   :  { %v701_v46 = vmax.f32 %v700_v38, 0.0  ;;  %v733_v48 = vstv %s2386_s14  ;;  %v736_v49 = vstv %s2388_s15  ;;  %v730_v52 = vmul.f32 %v2297_v11, %v729_v47  ;;  %s2494_s14 = sld [smem:[#allocation7 + $0x128]] }
  0xb6   :  { %v686_v50 = vadd.f32 %v685_v42, %v667_v34  ;;  %v719_v51 = vadd.f32 %v718_v44, %v712_v43  ;;  %v734_v53 = vmul.f32 %v2300_v13, %v733_v48  ;;  %v722_v55 = vstv %s2392_s16  ;;  %s2496_s15 = sld [smem:[#allocation8 + $0x28]]  ;;  %s2500_s16 = sld [smem:[#allocation10 + $0x27]] }
  0xb7   :  { %v704_v54 = vmul.f32 %v703_v39, %v701_v46  ;;  %v745_v56 = vstv %s2397_s17  ;;  %v748_v57 = vstv %s2399_s18  ;;  %v731_v59 = vadd.f32 %v730_v52, %v727_v45  ;;  %s2505_s17 = sld [smem:[#allocation7 + $0x29]] }
  0xb8   :  { %v720_v58 = vmax.f32 %v719_v51, 0.0  ;;  %v737_v60 = vadd.f32 %v736_v49, %v734_v53  ;;  %v746_v61 = vmul.f32 %v2288_v7, %v745_v56  ;;  %v749_v63 = vmul.f32 %v2297_v11, %v748_v57  ;;  %s2507_s18 = sld [smem:[#allocation7 + $0xa9]] }
  0xb9   :  { %v705_v62 = vadd.f32 %v704_v54, %v686_v50  ;;  %v752_v3 = vstv %s2405_s0  ;;  %v755_v4 = vstv %s2407_s1  ;;  %v741_v0 = vstv %s2411_s3  ;;  %s2513_s0 = sld [smem:[#allocation7 + $0x129]]  ;;  %s2519_s3 = sld [smem:[#allocation10 + $0x28]] }
  0xba   :  { %v723_v5 = vmul.f32 %v722_v55, %v720_v58  ;;  %v738_v6 = vadd.f32 %v737_v60, %v731_v59  ;;  %v753_v1 = vmul.f32 %v2300_v13, %v752_v3  ;;  %v750_v8 = vadd.f32 %v749_v63, %v746_v61  ;;  %s2515_s1 = sld [smem:[#allocation8 + $0x29]] }
  0xbb   :  { %v764_v9 = vstv %s2413_s19  ;;  %v767_v2 = vstv %s2418_s20  ;;  %v771_v10 = vstv %s2420_s21  ;;  %v760_v17 = vstv %s2426_s22  ;;  %s2521_s19 = sld [smem:[#allocation7 + $0x2a]]  ;;  %s2534_s22 = sld [smem:[#allocation10 + $0x29]] }
  0xbc   :  { %v724_v12 = vadd.f32 %v723_v5, %v705_v62  ;;  %v739_v14 = vmax.f32 %v738_v6, 0.0  ;;  %v756_v15 = vadd.f32 %v755_v4, %v753_v1  ;;  %v765_v16 = vmul.f32 %v2288_v7, %v764_v9  ;;  %s2526_s20 = sld [smem:[#allocation7 + $0xaa]] }
  0xbd   :  { %v768_v18 = vmul.f32 %v2297_v11, %v767_v2  ;;  %v772_v19 = vmul.f32 %v2300_v13, %v771_v10  ;;  %v774_v20 = vstv %s2428_s23  ;;  %v783_v23 = vstv %s2432_s24  ;;  %s2528_s21 = sld [smem:[#allocation7 + $0x12a]]  ;;  %s2540_s24 = sld [smem:[#allocation7 + $0x2b]] }
  0xbe   :  { %v742_v21 = vmul.f32 %v741_v0, %v739_v14  ;;  %v757_v22 = vadd.f32 %v756_v15, %v750_v8  ;;  %v786_v24 = vstv %s2434_s25  ;;  %v784_v27 = vmul.f32 %v2288_v7, %v783_v23  ;;  %s2536_s23 = sld [smem:[#allocation8 + $0x2a]]  ;;  %s2542_s25 = sld [smem:[#allocation7 + $0xab]] }
  0xbf   :  { %v769_v25 = vadd.f32 %v768_v18, %v765_v16  ;;  %v775_v26 = vadd.f32 %v774_v20, %v772_v19  ;;  %v787_v28 = vmul.f32 %v2297_v11, %v786_v24  ;;  %v790_v31 = vstv %s2440_s26  ;;  %s2548_s26 = sld [smem:[#allocation7 + $0x12b]] }
  0xc0   :  { %v743_v29 = vadd.f32 %v742_v21, %v724_v12  ;;  %v758_v30 = vmax.f32 %v757_v22, 0.0  ;;  %v793_v32 = vstv %s2442_s27  ;;  %v779_v34 = vstv %s2447_s28  ;;  %s2550_s27 = sld [smem:[#allocation8 + $0x2b]]  ;;  %s2555_s28 = sld [smem:[#allocation10 + $0x2a]] }
  0xc1   :  { %v776_v33 = vadd.f32 %v775_v26, %v769_v25  ;;  %v788_v35 = vadd.f32 %v787_v28, %v784_v27  ;;  %v791_v36 = vmul.f32 %v2300_v13, %v790_v31  ;;  %v802_v38 = vstv %s2449_s2  ;;  %s2557_s2 = sld [smem:[#allocation7 + $0x2c]] }
  0xc2   :  { %v761_v37 = vmul.f32 %v760_v17, %v758_v30  ;;  %v805_v39 = vstv %s2453_s29  ;;  %v809_v40 = vstv %s2455_s30  ;;  %v803_v43 = vmul.f32 %v2288_v7, %v802_v38  ;;  %s2561_s29 = sld [smem:[#allocation7 + $0xac]] }
  0xc3   :  { %v777_v41 = vmax.f32 %v776_v33, 0.0  ;;  %v794_v42 = vadd.f32 %v793_v32, %v791_v36  ;;  %v806_v44 = vmul.f32 %v2297_v11, %v805_v39  ;;  %v798_v46 = vstv %s2461_s6  ;;  %s2563_s30 = sld [smem:[#allocation7 + $0x12c]]  ;;  %s2569_s6 = sld [smem:[#allocation10 + $0x2b]] }
  0xc4   :  { %v762_v45 = vadd.f32 %v761_v37, %v743_v29  ;;  %v810_v47 = vmul.f32 %v2300_v13, %v809_v40  ;;  %v812_v48 = vstv %s2463_s7  ;;  %v821_v52 = vstv %s2469_s8  ;;  %s2571_s7 = sld [smem:[#allocation8 + $0x2c]]  ;;  %s2577_s8 = sld [smem:[#allocation7 + $0x2d]] }
  0xc5   :  { %v780_v49 = vmul.f32 %v779_v34, %v777_v41  ;;  %v795_v50 = vadd.f32 %v794_v42, %v788_v35  ;;  %v807_v51 = vadd.f32 %v806_v44, %v803_v43  ;;  %v822_v54 = vmul.f32 %v2288_v7, %v821_v52 }
  0xc6   :  { %v813_v53 = vadd.f32 %v812_v48, %v810_v47  ;;  %v824_v55 = vstv %s2473_s9  ;;  %v828_v56 = vstv %s2475_s10  ;;  %v817_v62 = vstv %s2479_s11  ;;  %s2581_s9 = sld [smem:[#allocation7 + $0xad]]  ;;  %s2587_s11 = sld [smem:[#allocation10 + $0x2c]] }
  0xc7   :  { %v781_v57 = vadd.f32 %v780_v49, %v762_v45  ;;  %v796_v58 = vmax.f32 %v795_v50, 0.0  ;;  %v825_v59 = vmul.f32 %v2297_v11, %v824_v55  ;;  %v829_v60 = vmul.f32 %v2300_v13, %v828_v56  ;;  %s2583_s10 = sld [smem:[#allocation7 + $0x12d]] }
  0xc8   :  { %v814_v61 = vadd.f32 %v813_v53, %v807_v51  ;;  %v831_v63 = vstv %s2483_s12  ;;  %v840_v3 = vstv %s2485_s13  ;;  %v843_v8 = vstv %s2489_s4  ;;  %s2591_s12 = sld [smem:[#allocation8 + $0x2d]]  ;;  %s2593_s13 = sld [smem:[#allocation7 + $0x2e]] }
  0xc9   :  { %v799_v4 = vmul.f32 %v798_v46, %v796_v58  ;;  %v826_v5 = vadd.f32 %v825_v59, %v822_v54  ;;  %v832_v6 = vadd.f32 %v831_v63, %v829_v60  ;;  %v841_v0 = vmul.f32 %v2288_v7, %v840_v3  ;;  %s2597_s4 = sld [smem:[#allocation7 + $0xae]] }
  0xca   :  { %v815_v1 = vmax.f32 %v814_v61, 0.0  ;;  %v847_v9 = vstv %s2494_s14  ;;  %v850_v2 = vstv %s2496_s15  ;;  %v844_v14 = vmul.f32 %v2297_v11, %v843_v8  ;;  %s2602_s14 = sld [smem:[#allocation7 + $0x12e]] }
  0xcb   :  { %v800_v10 = vadd.f32 %v799_v4, %v781_v57  ;;  %v833_v12 = vadd.f32 %v832_v6, %v826_v5  ;;  %v848_v15 = vmul.f32 %v2300_v13, %v847_v9  ;;  %v836_v17 = vstv %s2500_s16  ;;  %s2604_s15 = sld [smem:[#allocation8 + $0x2e]]  ;;  %s2608_s16 = sld [smem:[#allocation10 + $0x2d]] }
  0xcc   :  { %v818_v16 = vmul.f32 %v817_v62, %v815_v1  ;;  %v859_v18 = vstv %s2505_s17  ;;  %v862_v19 = vstv %s2507_s18  ;;  %v845_v21 = vadd.f32 %v844_v14, %v841_v0  ;;  %s2613_s17 = sld [smem:[#allocation7 + $0x2f]] }
  0xcd   :  { %v834_v20 = vmax.f32 %v833_v12, 0.0  ;;  %v851_v22 = vadd.f32 %v850_v2, %v848_v15  ;;  %v860_v23 = vmul.f32 %v2288_v7, %v859_v18  ;;  %v863_v25 = vmul.f32 %v2297_v11, %v862_v19  ;;  %s2615_s18 = sld [smem:[#allocation7 + $0xaf]] }
  0xce   :  { %v819_v24 = vadd.f32 %v818_v16, %v800_v10  ;;  %v866_v26 = vstv %s2513_s0  ;;  %v869_v27 = vstv %s2515_s1  ;;  %v855_v30 = vstv %s2519_s3  ;;  %s2621_s0 = sld [smem:[#allocation7 + $0x12f]]  ;;  %s2627_s3 = sld [smem:[#allocation10 + $0x2e]] }
  0xcf   :  { %v837_v28 = vmul.f32 %v836_v17, %v834_v20  ;;  %v852_v29 = vadd.f32 %v851_v22, %v845_v21  ;;  %v867_v31 = vmul.f32 %v2300_v13, %v866_v26  ;;  %v864_v32 = vadd.f32 %v863_v25, %v860_v23  ;;  %s2623_s1 = sld [smem:[#allocation8 + $0x2f]] }
  0xd0   :  { %v878_v33 = vstv %s2521_s19  ;;  %v881_v34 = vstv %s2526_s20  ;;  %v885_v35 = vstv %s2528_s21  ;;  %v874_v40 = vstv %s2534_s22  ;;  %s2629_s19 = sld [smem:[#allocation7 + $0x30]]  ;;  %s2642_s22 = sld [smem:[#allocation10 + $0x2f]] }
  0xd1   :  { %v838_v36 = vadd.f32 %v837_v28, %v819_v24  ;;  %v853_v37 = vmax.f32 %v852_v29, 0.0  ;;  %v870_v38 = vadd.f32 %v869_v27, %v867_v31  ;;  %v879_v39 = vmul.f32 %v2288_v7, %v878_v33  ;;  %s2634_s20 = sld [smem:[#allocation7 + $0xb0]] }
  0xd2   :  { %v882_v41 = vmul.f32 %v2297_v11, %v881_v34  ;;  %v886_v42 = vmul.f32 %v2300_v13, %v885_v35  ;;  %v888_v43 = vstv %s2536_s23  ;;  %v897_v46 = vstv %s2540_s24  ;;  %s2636_s21 = sld [smem:[#allocation7 + $0x130]]  ;;  %s2648_s24 = sld [smem:[#allocation7 + $0x31]] }
  0xd3   :  { %v856_v44 = vmul.f32 %v855_v30, %v853_v37  ;;  %v871_v45 = vadd.f32 %v870_v38, %v864_v32  ;;  %v900_v47 = vstv %s2542_s25  ;;  %v898_v50 = vmul.f32 %v2288_v7, %v897_v46  ;;  %s2644_s23 = sld [smem:[#allocation8 + $0x30]]  ;;  %s2650_s25 = sld [smem:[#allocation7 + $0xb1]] }
  0xd4   :  { %v883_v48 = vadd.f32 %v882_v41, %v879_v39  ;;  %v889_v49 = vadd.f32 %v888_v43, %v886_v42  ;;  %v901_v51 = vmul.f32 %v2297_v11, %v900_v47  ;;  %v904_v54 = vstv %s2548_s26  ;;  %s2656_s26 = sld [smem:[#allocation7 + $0x131]] }
  0xd5   :  { %v857_v52 = vadd.f32 %v856_v44, %v838_v36  ;;  %v872_v53 = vmax.f32 %v871_v45, 0.0  ;;  %v907_v55 = vstv %s2550_s27  ;;  %v893_v57 = vstv %s2555_s28  ;;  %s2658_s27 = sld [smem:[#allocation8 + $0x31]]  ;;  %s2663_s28 = sld [smem:[#allocation10 + $0x30]] }
  0xd6   :  { %v890_v56 = vadd.f32 %v889_v49, %v883_v48  ;;  %v902_v58 = vadd.f32 %v901_v51, %v898_v50  ;;  %v905_v59 = vmul.f32 %v2300_v13, %v904_v54  ;;  %v916_v61 = vstv %s2557_s2  ;;  %s2665_s2 = sld [smem:[#allocation7 + $0x32]] }
  0xd7   :  { %v875_v60 = vmul.f32 %v874_v40, %v872_v53  ;;  %v919_v62 = vstv %s2561_s29  ;;  %v923_v63 = vstv %s2563_s30  ;;  %v917_v5 = vmul.f32 %v2288_v7, %v916_v61  ;;  %s2669_s29 = sld [smem:[#allocation7 + $0xb2]] }
  0xd8   :  { %v891_v3 = vmax.f32 %v890_v56, 0.0  ;;  %v908_v4 = vadd.f32 %v907_v55, %v905_v59  ;;  %v920_v6 = vmul.f32 %v2297_v11, %v919_v62  ;;  %v912_v1 = vstv %s2569_s6  ;;  %s2671_s30 = sld [smem:[#allocation7 + $0x132]]  ;;  %s2677_s6 = sld [smem:[#allocation10 + $0x31]] }
  0xd9   :  { %v876_v0 = vadd.f32 %v875_v60, %v857_v52  ;;  %v924_v8 = vmul.f32 %v2300_v13, %v923_v63  ;;  %v926_v9 = vstv %s2571_s7  ;;  %v935_v14 = vstv %s2577_s8  ;;  %s2679_s7 = sld [smem:[#allocation8 + $0x32]]  ;;  %s2685_s8 = sld [smem:[#allocation7 + $0x33]] }
  0xda   :  { %v894_v2 = vmul.f32 %v893_v57, %v891_v3  ;;  %v909_v10 = vadd.f32 %v908_v4, %v902_v58  ;;  %v921_v12 = vadd.f32 %v920_v6, %v917_v5  ;;  %v936_v16 = vmul.f32 %v2288_v7, %v935_v14 }
  0xdb   :  { %v927_v15 = vadd.f32 %v926_v9, %v924_v8  ;;  %v938_v17 = vstv %s2581_s9  ;;  %v942_v18 = vstv %s2583_s10  ;;  %v931_v24 = vstv %s2587_s11  ;;  %s2689_s9 = sld [smem:[#allocation7 + $0xb3]]  ;;  %s2695_s11 = sld [smem:[#allocation10 + $0x32]] }
  0xdc   :  { %v895_v19 = vadd.f32 %v894_v2, %v876_v0  ;;  %v910_v20 = vmax.f32 %v909_v10, 0.0  ;;  %v939_v21 = vmul.f32 %v2297_v11, %v938_v17  ;;  %v943_v22 = vmul.f32 %v2300_v13, %v942_v18  ;;  %s2691_s10 = sld [smem:[#allocation7 + $0x133]] }
  0xdd   :  { %v928_v23 = vadd.f32 %v927_v15, %v921_v12  ;;  %v945_v25 = vstv %s2591_s12  ;;  %v954_v26 = vstv %s2593_s13  ;;  %v957_v32 = vstv %s2597_s4  ;;  %s2699_s12 = sld [smem:[#allocation8 + $0x33]]  ;;  %s2701_s13 = sld [smem:[#allocation7 + $0x34]] }
  0xde   :  { %v913_v27 = vmul.f32 %v912_v1, %v910_v20  ;;  %v940_v28 = vadd.f32 %v939_v21, %v936_v16  ;;  %v946_v29 = vadd.f32 %v945_v25, %v943_v22  ;;  %v955_v30 = vmul.f32 %v2288_v7, %v954_v26  ;;  %s2705_s4 = sld [smem:[#allocation7 + $0xb4]] }
  0xdf   :  { %v929_v31 = vmax.f32 %v928_v23, 0.0  ;;  %v961_v33 = vstv %s2602_s14  ;;  %v964_v34 = vstv %s2604_s15  ;;  %v958_v37 = vmul.f32 %v2297_v11, %v957_v32  ;;  %s2710_s14 = sld [smem:[#allocation7 + $0x134]] }
  0xe0   :  { %v914_v35 = vadd.f32 %v913_v27, %v895_v19  ;;  %v947_v36 = vadd.f32 %v946_v29, %v940_v28  ;;  %v962_v38 = vmul.f32 %v2300_v13, %v961_v33  ;;  %v950_v40 = vstv %s2608_s16  ;;  %s2712_s15 = sld [smem:[#allocation8 + $0x34]]  ;;  %s2716_s16 = sld [smem:[#allocation10 + $0x33]] }
  0xe1   :  { %v932_v39 = vmul.f32 %v931_v24, %v929_v31  ;;  %v973_v41 = vstv %s2613_s17  ;;  %v976_v42 = vstv %s2615_s18  ;;  %v959_v44 = vadd.f32 %v958_v37, %v955_v30  ;;  %s2721_s17 = sld [smem:[#allocation7 + $0x35]] }
  0xe2   :  { %v948_v43 = vmax.f32 %v947_v36, 0.0  ;;  %v965_v45 = vadd.f32 %v964_v34, %v962_v38  ;;  %v974_v46 = vmul.f32 %v2288_v7, %v973_v41  ;;  %v977_v48 = vmul.f32 %v2297_v11, %v976_v42  ;;  %s2723_s18 = sld [smem:[#allocation7 + $0xb5]] }
  0xe3   :  { %v933_v47 = vadd.f32 %v932_v39, %v914_v35  ;;  %v980_v49 = vstv %s2621_s0  ;;  %v983_v50 = vstv %s2623_s1  ;;  %v969_v53 = vstv %s2627_s3  ;;  %s2729_s0 = sld [smem:[#allocation7 + $0x135]]  ;;  %s2735_s3 = sld [smem:[#allocation10 + $0x34]] }
  0xe4   :  { %v951_v51 = vmul.f32 %v950_v40, %v948_v43  ;;  %v966_v52 = vadd.f32 %v965_v45, %v959_v44  ;;  %v981_v54 = vmul.f32 %v2300_v13, %v980_v49  ;;  %v978_v55 = vadd.f32 %v977_v48, %v974_v46  ;;  %s2731_s1 = sld [smem:[#allocation8 + $0x35]] }
  0xe5   :  { %v992_v56 = vstv %s2629_s19  ;;  %v995_v57 = vstv %s2634_s20  ;;  %v999_v58 = vstv %s2636_s21  ;;  %v988_v63 = vstv %s2642_s22  ;;  %s2737_s19 = sld [smem:[#allocation7 + $0x36]]  ;;  %s2750_s22 = sld [smem:[#allocation10 + $0x35]] }
  0xe6   :  { %v952_v59 = vadd.f32 %v951_v51, %v933_v47  ;;  %v967_v60 = vmax.f32 %v966_v52, 0.0  ;;  %v984_v61 = vadd.f32 %v983_v50, %v981_v54  ;;  %v993_v62 = vmul.f32 %v2288_v7, %v992_v56  ;;  %s2742_s20 = sld [smem:[#allocation7 + $0xb6]] }
  0xe7   :  { %v996_v3 = vmul.f32 %v2297_v11, %v995_v57  ;;  %v1000_v4 = vmul.f32 %v2300_v13, %v999_v58  ;;  %v1002_v5 = vstv %s2644_s23  ;;  %v1011_v1 = vstv %s2648_s24  ;;  %s2744_s21 = sld [smem:[#allocation7 + $0x136]]  ;;  %s2756_s24 = sld [smem:[#allocation7 + $0x37]] }
  0xe8   :  { %v970_v6 = vmul.f32 %v969_v53, %v967_v60  ;;  %v985_v0 = vadd.f32 %v984_v61, %v978_v55  ;;  %v1014_v8 = vstv %s2650_s25  ;;  %v1012_v10 = vmul.f32 %v2288_v7, %v1011_v1  ;;  %s2752_s23 = sld [smem:[#allocation8 + $0x36]]  ;;  %s2758_s25 = sld [smem:[#allocation7 + $0xb7]] }
  0xe9   :  { %v997_v9 = vadd.f32 %v996_v3, %v993_v62  ;;  %v1003_v2 = vadd.f32 %v1002_v5, %v1000_v4  ;;  %v1015_v12 = vmul.f32 %v2297_v11, %v1014_v8  ;;  %v1018_v16 = vstv %s2656_s26  ;;  %s2764_s26 = sld [smem:[#allocation7 + $0x137]] }
  0xea   :  { %v971_v14 = vadd.f32 %v970_v6, %v952_v59  ;;  %v986_v15 = vmax.f32 %v985_v0, 0.0  ;;  %v1021_v17 = vstv %s2658_s27  ;;  %v1007_v19 = vstv %s2663_s28  ;;  %s2766_s27 = sld [smem:[#allocation8 + $0x37]]  ;;  %s2771_s28 = sld [smem:[#allocation10 + $0x36]] }
  0xeb   :  { %v1004_v18 = vadd.f32 %v1003_v2, %v997_v9  ;;  %v1016_v20 = vadd.f32 %v1015_v12, %v1012_v10  ;;  %v1019_v21 = vmul.f32 %v2300_v13, %v1018_v16  ;;  %v1030_v23 = vstv %s2665_s2  ;;  %s2773_s2 = sld [smem:[#allocation7 + $0x38]] }
  0xec   :  { %v989_v22 = vmul.f32 %v988_v63, %v986_v15  ;;  %v1033_v24 = vstv %s2669_s29  ;;  %v1037_v25 = vstv %s2671_s30  ;;  %v1031_v28 = vmul.f32 %v2288_v7, %v1030_v23  ;;  %s2777_s29 = sld [smem:[#allocation7 + $0xb8]] }
  0xed   :  { %v1005_v26 = vmax.f32 %v1004_v18, 0.0  ;;  %v1022_v27 = vadd.f32 %v1021_v17, %v1019_v21  ;;  %v1034_v29 = vmul.f32 %v2297_v11, %v1033_v24  ;;  %v1026_v31 = vstv %s2677_s6  ;;  %s2779_s30 = sld [smem:[#allocation7 + $0x138]]  ;;  %s2787_s6 = sld [smem:[#allocation10 + $0x37]]  ;;  %v2792_v24 = vld [vmem:[#allocation3 + $0x8] sm:$0xff] }
  0xee   :  { %v990_v30 = vadd.f32 %v989_v22, %v971_v14  ;;  %v1038_v32 = vmul.f32 %v2300_v13, %v1037_v25  ;;  %v1040_v33 = vstv %s2679_s7  ;;  %v1049_v37 = vstv %s2685_s8  ;;  %v2784_v22 = vld [vmem:[#allocation3] sm:$0xff]  ;;  %s2789_s7 = sld [smem:[#allocation8 + $0x38]]  ;;  %s2799_s8 = sld [smem:[#allocation7 + $0x39]] }
  0xef   :  { %v1008_v34 = vmul.f32 %v1007_v19, %v1005_v26  ;;  %v1023_v35 = vadd.f32 %v1022_v27, %v1016_v20  ;;  %v1035_v36 = vadd.f32 %v1034_v29, %v1031_v28  ;;  %v1050_v39 = vmul.f32 %v2288_v7, %v1049_v37  ;;  %v2795_v26 = vld [vmem:[#allocation3 + $0x10] sm:$0xff] }
  0xf0   :  { %v1041_v38 = vadd.f32 %v1040_v33, %v1038_v32  ;;  %v1052_v40 = vstv %s2689_s9  ;;  %v1056_v41 = vstv %s2691_s10  ;;  %v1045_v47 = vstv %s2695_s11  ;;  %s2803_s9 = sld [smem:[#allocation7 + $0xb9]]  ;;  %s2809_s11 = sld [smem:[#allocation10 + $0x38]] }
  0xf1   :  { %v1009_v42 = vadd.f32 %v1008_v34, %v990_v30  ;;  %v1024_v43 = vmax.f32 %v1023_v35, 0.0  ;;  %v1053_v44 = vmul.f32 %v2297_v11, %v1052_v40  ;;  %v1057_v45 = vmul.f32 %v2300_v13, %v1056_v41  ;;  %s2805_s10 = sld [smem:[#allocation7 + $0x139]] }
  0xf2   :  { %v1042_v46 = vadd.f32 %v1041_v38, %v1035_v36  ;;  %v1059_v48 = vstv %s2699_s12  ;;  %v1068_v49 = vstv %s2701_s13  ;;  %v1071_v55 = vstv %s2705_s4  ;;  %s2813_s12 = sld [smem:[#allocation8 + $0x39]]  ;;  %s2815_s13 = sld [smem:[#allocation7 + $0x3a]] }
  0xf3   :  { %v1027_v50 = vmul.f32 %v1026_v31, %v1024_v43  ;;  %v1054_v51 = vadd.f32 %v1053_v44, %v1050_v39  ;;  %v1060_v52 = vadd.f32 %v1059_v48, %v1057_v45  ;;  %v1069_v53 = vmul.f32 %v2288_v7, %v1068_v49  ;;  %s2819_s4 = sld [smem:[#allocation7 + $0xba]] }
  0xf4   :  { %v1043_v54 = vmax.f32 %v1042_v46, 0.0  ;;  %v1075_v56 = vstv %s2710_s14  ;;  %v1078_v57 = vstv %s2712_s15  ;;  %v1072_v60 = vmul.f32 %v2297_v11, %v1071_v55  ;;  %s2824_s14 = sld [smem:[#allocation7 + $0x13a]] }
  0xf5   :  { %v1028_v58 = vadd.f32 %v1027_v50, %v1009_v42  ;;  %v1061_v59 = vadd.f32 %v1060_v52, %v1054_v51  ;;  %v1076_v61 = vmul.f32 %v2300_v13, %v1075_v56  ;;  %v1064_v63 = vstv %s2716_s16  ;;  %s2826_s15 = sld [smem:[#allocation8 + $0x3a]]  ;;  %s2830_s16 = sld [smem:[#allocation10 + $0x39]] }
  0xf6   :  { %v1046_v62 = vmul.f32 %v1045_v47, %v1043_v54  ;;  %v1087_v3 = vstv %s2721_s17  ;;  %v1090_v4 = vstv %s2723_s18  ;;  %v1073_v6 = vadd.f32 %v1072_v60, %v1069_v53  ;;  %s2835_s17 = sld [smem:[#allocation7 + $0x3b]] }
  0xf7   :  { %v1062_v5 = vmax.f32 %v1061_v59, 0.0  ;;  %v1079_v0 = vadd.f32 %v1078_v57, %v1076_v61  ;;  %v1088_v1 = vmul.f32 %v2288_v7, %v1087_v3  ;;  %v1091_v9 = vmul.f32 %v2297_v11, %v1090_v4  ;;  %s2837_s18 = sld [smem:[#allocation7 + $0xbb]] }
  0xf8   :  { %v1047_v8 = vadd.f32 %v1046_v62, %v1028_v58  ;;  %v1094_v2 = vstv %s2729_s0  ;;  %v1097_v10 = vstv %s2731_s1  ;;  %v1083_v7 = vstv %s2735_s3  ;;  %s2843_s0 = sld [smem:[#allocation7 + $0x13b]]  ;;  %s2849_s3 = sld [smem:[#allocation10 + $0x3a]] }
  0xf9   :  { %v1065_v12 = vmul.f32 %v1064_v63, %v1062_v5  ;;  %v1080_v14 = vadd.f32 %v1079_v0, %v1073_v6  ;;  %v1095_v15 = vmul.f32 %v2300_v13, %v1094_v2  ;;  %v1092_v16 = vadd.f32 %v1091_v9, %v1088_v1  ;;  %s2845_s1 = sld [smem:[#allocation8 + $0x3b]] }
  0xfa   :  { %v1106_v17 = vstv %s2737_s19  ;;  %v1109_v11 = vstv %s2742_s20  ;;  %v1113_v18 = vstv %s2744_s21  ;;  %v1102_v13 = vstv %s2750_s22  ;;  %s2851_s19 = sld [smem:[#allocation7 + $0x3c]]  ;;  %s2864_s22 = sld [smem:[#allocation10 + $0x3b]] }
  0xfb   :  { %v1066_v19 = vadd.f32 %v1065_v12, %v1047_v8  ;;  %v1081_v20 = vmax.f32 %v1080_v14, 0.0  ;;  %v1098_v21 = vadd.f32 %v1097_v10, %v1095_v15  ;;  %v1107_v23 = vmul.f32 %v2784_v22, %v1106_v17  ;;  %s2856_s20 = sld [smem:[#allocation7 + $0xbc]] }
  0xfc   :  { %v1110_v25 = vmul.f32 %v2792_v24, %v1109_v11  ;;  %v1114_v27 = vmul.f32 %v2795_v26, %v1113_v18  ;;  %v1116_v28 = vstv %s2752_s23  ;;  %v1125_v31 = vstv %s2756_s24  ;;  %s2858_s21 = sld [smem:[#allocation7 + $0x13c]]  ;;  %s2870_s24 = sld [smem:[#allocation7 + $0x3d]] }
  0xfd   :  { %v1084_v29 = vmul.f32 %v1083_v7, %v1081_v20  ;;  %v1099_v30 = vadd.f32 %v1098_v21, %v1092_v16  ;;  %v1128_v32 = vstv %s2758_s25  ;;  %v1126_v35 = vmul.f32 %v2784_v22, %v1125_v31  ;;  %s2866_s23 = sld [smem:[#allocation8 + $0x3c]]  ;;  %s2872_s25 = sld [smem:[#allocation7 + $0xbd]] }
  0xfe   :  { %v1111_v33 = vadd.f32 %v1110_v25, %v1107_v23  ;;  %v1117_v34 = vadd.f32 %v1116_v28, %v1114_v27  ;;  %v1129_v36 = vmul.f32 %v2792_v24, %v1128_v32  ;;  %v1132_v39 = vstv %s2764_s26  ;;  %s2878_s26 = sld [smem:[#allocation7 + $0x13d]] }
  0xff   :  { %v1085_v37 = vadd.f32 %v1084_v29, %v1066_v19  ;;  %v1100_v38 = vmax.f32 %v1099_v30, 0.0  ;;  %v1135_v40 = vstv %s2766_s27  ;;  %v1121_v42 = vstv %s2771_s28  ;;  %s2880_s27 = sld [smem:[#allocation8 + $0x3d]]  ;;  %s2885_s28 = sld [smem:[#allocation10 + $0x3c]] }
 0x100   :  { %v1118_v41 = vadd.f32 %v1117_v34, %v1111_v33  ;;  %v1130_v43 = vadd.f32 %v1129_v36, %v1126_v35  ;;  %v1133_v44 = vmul.f32 %v2795_v26, %v1132_v39  ;;  %v1144_v46 = vstv %s2773_s2  ;;  %s2887_s2 = sld [smem:[#allocation7 + $0x3e]] }
 0x101   :  { %v1103_v45 = vmul.f32 %v1102_v13, %v1100_v38  ;;  %v1147_v47 = vstv %s2777_s29  ;;  %v1151_v48 = vstv %s2779_s30  ;;  %v1145_v51 = vmul.f32 %v2784_v22, %v1144_v46  ;;  %s2891_s29 = sld [smem:[#allocation7 + $0xbe]] }
 0x102   :  { %v1119_v49 = vmax.f32 %v1118_v41, 0.0  ;;  %v1136_v50 = vadd.f32 %v1135_v40, %v1133_v44  ;;  %v1148_v52 = vmul.f32 %v2792_v24, %v1147_v47  ;;  %v1140_v54 = vstv %s2787_s6  ;;  %s2893_s30 = sld [smem:[#allocation7 + $0x13e]]  ;;  %s2899_s6 = sld [smem:[#allocation10 + $0x3d]] }
 0x103   :  { %v1104_v53 = vadd.f32 %v1103_v45, %v1085_v37  ;;  %v1152_v55 = vmul.f32 %v2795_v26, %v1151_v48  ;;  %v1154_v56 = vstv %s2789_s7  ;;  %v1163_v60 = vstv %s2799_s8  ;;  %s2901_s7 = sld [smem:[#allocation8 + $0x3e]]  ;;  %s2907_s8 = sld [smem:[#allocation7 + $0x3f]] }
 0x104   :  { %v1122_v57 = vmul.f32 %v1121_v42, %v1119_v49  ;;  %v1137_v58 = vadd.f32 %v1136_v50, %v1130_v43  ;;  %v1149_v59 = vadd.f32 %v1148_v52, %v1145_v51  ;;  %v1164_v62 = vmul.f32 %v2784_v22, %v1163_v60 }
 0x105   :  { %v1155_v61 = vadd.f32 %v1154_v56, %v1152_v55  ;;  %v1166_v63 = vstv %s2803_s9  ;;  %v1170_v3 = vstv %s2805_s10  ;;  %v1159_v8 = vstv %s2809_s11  ;;  %s2911_s9 = sld [smem:[#allocation7 + $0xbf]] }
 0x106   :  { %v1123_v4 = vadd.f32 %v1122_v57, %v1104_v53  ;;  %v1138_v5 = vmax.f32 %v1137_v58, 0.0  ;;  %v1167_v6 = vmul.f32 %v2792_v24, %v1166_v63  ;;  %v1171_v0 = vmul.f32 %v2795_v26, %v1170_v3  ;;  %s2913_s10 = sld [smem:[#allocation7 + $0x13f]] }
 0x107   :  { %v1156_v1 = vadd.f32 %v1155_v61, %v1149_v59  ;;  %v1173_v9 = vstv %s2813_s12  ;;  %v1182_v2 = vstv %s2815_s13  ;;  %v1185_v16 = vstv %s2819_s4  ;;  %s2919_s11 = sld [smem:[#allocation8 + $0x3f]]  ;;  %s2923_s12 = sld [smem:[#allocation10 + $0x3e]] }
 0x108   :  { %v1141_v10 = vmul.f32 %v1140_v54, %v1138_v5  ;;  %v1168_v12 = vadd.f32 %v1167_v6, %v1164_v62  ;;  %v1174_v14 = vadd.f32 %v1173_v9, %v1171_v0  ;;  %v1183_v7 = vmul.f32 %v2784_v22, %v1182_v2  ;;  %s1629_s13 = sld [smem:[#allocation10 + $0x3f]]  ;;  %s1737_s4 = smov [#allocation11]  }
 0x109   :  { %v1157_v15 = vmax.f32 %v1156_v1, 0.0  ;;  %v1189_v17 = vstv %s2824_s14  ;;  %v1192_v11 = vstv %s2826_s15  ;;  %v1186_v20 = vmul.f32 %v2792_v24, %v1185_v16  ;;  %s1302_s14 = sshll.u32 %s1737_s4, 4  ;;  %s1303_s14 = int_to_ptr.vmem [resolvable:$true] %s1302_s14 }
 0x10a   :  { %v1142_v18 = vadd.f32 %v1141_v10, %v1123_v4  ;;  %v1175_v19 = vadd.f32 %v1174_v14, %v1168_v12  ;;  %v1190_v21 = vmul.f32 %v2795_v26, %v1189_v17  ;;  %v1178_v13 = vstv %s2830_s16  ;;  %s1701_s15 = scalar_lea.vmem %s1303_s14, 128  ;;  %p1706_p10 = scmp.lt.s32.totalorder %s1303_s14, %s1303_s14 }
 0x10b   :  { %v1160_v23 = vmul.f32 %v1159_v8, %v1157_v15  ;;  %v1201_v25 = vstv %s2835_s17  ;;  %v1204_v27 = vstv %s2837_s18  ;;  %v1187_v29 = vadd.f32 %v1186_v20, %v1183_v7  ;;  %p1702_p9 = scmp.ne.s32.totalorder %s1303_s14, %s1701_s15  ;;  %p1707_p11 = scmp.lt.s32.totalorder %s1701_s15, %s1701_s15 }
 0x10c   :  { %v1176_v28 = vmax.f32 %v1175_v19, 0.0  ;;  %v1193_v30 = vadd.f32 %v1192_v11, %v1190_v21  ;;  %v1202_v31 = vmul.f32 %v2784_v22, %v1201_v25  ;;  %v1205_v33 = vmul.f32 %v2792_v24, %v1204_v27 }
 0x10d   :  { %v1161_v32 = vadd.f32 %v1160_v23, %v1142_v18  ;;  %v1208_v34 = vstv %s2843_s0  ;;  %v1211_v35 = vstv %s2845_s1  ;;  %v1197_v38 = vstv %s2849_s3  ;;  %p1708_p12 = por %p1707_p11, %p1706_p10 }
 0x10e   :  { %v1179_v36 = vmul.f32 %v1178_v13, %v1176_v28  ;;  %v1194_v37 = vadd.f32 %v1193_v30, %v1187_v29  ;;  %v1209_v39 = vmul.f32 %v2795_v26, %v1208_v34  ;;  %v1206_v40 = vadd.f32 %v1205_v33, %v1202_v31 }
 0x10f   :  { %v1220_v41 = vstv %s2851_s19  ;;  %v1223_v42 = vstv %s2856_s20  ;;  %v1227_v43 = vstv %s2858_s21  ;;  %v1216_v48 = vstv %s2864_s22  ;;  %p1709_p13 = pnand %p1708_p12, %p1702_p9 }
 0x110   :  { %v1180_v44 = vadd.f32 %v1179_v36, %v1161_v32  ;;  %v1195_v45 = vmax.f32 %v1194_v37, 0.0  ;;  %v1212_v46 = vadd.f32 %v1211_v35, %v1209_v39  ;;  %v1221_v47 = vmul.f32 %v2784_v22, %v1220_v41 }
 0x111   :  { %v1224_v49 = vmul.f32 %v2792_v24, %v1223_v42  ;;  %v1228_v50 = vmul.f32 %v2795_v26, %v1227_v43  ;;  %v1230_v51 = vstv %s2866_s23  ;;  %v1239_v54 = vstv %s2870_s24 }
 0x112   :  { %v1198_v52 = vmul.f32 %v1197_v38, %v1195_v45  ;;  %v1213_v53 = vadd.f32 %v1212_v46, %v1206_v40  ;;  %v1242_v55 = vstv %s2872_s25  ;;  %v1240_v58 = vmul.f32 %v2784_v22, %v1239_v54 }
 0x113   :  { %v1225_v56 = vadd.f32 %v1224_v49, %v1221_v47  ;;  %v1231_v57 = vadd.f32 %v1230_v51, %v1228_v50  ;;  %v1243_v59 = vmul.f32 %v2792_v24, %v1242_v55  ;;  %v1246_v62 = vstv %s2878_s26 }
 0x114   :  { %v1199_v60 = vadd.f32 %v1198_v52, %v1180_v44  ;;  %v1214_v61 = vmax.f32 %v1213_v53, 0.0  ;;  %v1249_v63 = vstv %s2880_s27  ;;  %v1235_v4 = vstv %s2885_s28 }
 0x115   :  { %v1232_v3 = vadd.f32 %v1231_v57, %v1225_v56  ;;  %v1244_v5 = vadd.f32 %v1243_v59, %v1240_v58  ;;  %v1247_v6 = vmul.f32 %v2795_v26, %v1246_v62  ;;  %v1258_v1 = vstv %s2887_s2 }
 0x116   :  { %v1217_v0 = vmul.f32 %v1216_v48, %v1214_v61  ;;  %v1261_v8 = vstv %s2891_s29  ;;  %v1265_v9 = vstv %s2893_s30  ;;  %v1259_v12 = vmul.f32 %v2784_v22, %v1258_v1 }
 0x117   :  { %v1233_v2 = vmax.f32 %v1232_v3, 0.0  ;;  %v1250_v10 = vadd.f32 %v1249_v63, %v1247_v6  ;;  %v1262_v14 = vmul.f32 %v2792_v24, %v1261_v8  ;;  %v1254_v15 = vstv %s2899_s6 }
 0x118   :  { %v1218_v7 = vadd.f32 %v1217_v0, %v1199_v60  ;;  %v1266_v16 = vmul.f32 %v2795_v26, %v1265_v9  ;;  %v1268_v17 = vstv %s2901_s7  ;;  %v1277_v20 = vstv %s2907_s8 }
 0x119   :  { %v1236_v11 = vmul.f32 %v1235_v4, %v1233_v2  ;;  %v1251_v18 = vadd.f32 %v1250_v10, %v1244_v5  ;;  %v1263_v19 = vadd.f32 %v1262_v14, %v1259_v12  ;;  %v1278_v23 = vmul.f32 %v2784_v22, %v1277_v20 }
 0x11a   :  { %v1269_v21 = vadd.f32 %v1268_v17, %v1266_v16  ;;  %v1280_v13 = vstv %s2911_s9  ;;  %v1284_v25 = vstv %s2913_s10  ;;  %v1287_v32 = vstv %s2919_s11 }
 0x11b   :  { %v1237_v27 = vadd.f32 %v1236_v11, %v1218_v7  ;;  %v1252_v28 = vmax.f32 %v1251_v18, 0.0  ;;  %v1281_v29 = vmul.f32 %v2792_v24, %v1280_v13  ;;  %v1285_v30 = vmul.f32 %v2795_v26, %v1284_v25 }
 0x11c   :  { %v1270_v31 = vadd.f32 %v1269_v21, %v1263_v19  ;;  %v1273_v34 = vstv %s2923_s12  ;;  %v1292_v41 = vstv %s1629_s13 }
 0x11d   :  { %v1255_v33 = vmul.f32 %v1254_v15, %v1252_v28  ;;  %v1282_v35 = vadd.f32 %v1281_v29, %v1278_v23  ;;  %v1288_v36 = vadd.f32 %v1287_v32, %v1285_v30 }
 0x11e   :  { %v1271_v37 = vmax.f32 %v1270_v31, 0.0 }
 0x11f   :  { %v1256_v38 = vadd.f32 %v1255_v33, %v1237_v27  ;;  %v1289_v39 = vadd.f32 %v1288_v36, %v1282_v35 }
 0x120   :  { %v1274_v40 = vmul.f32 %v1273_v34, %v1271_v37 }
 0x121   :  { %v1290_v22 = vmax.f32 %v1289_v39, 0.0 }
 0x122   :  { %v1275_v42 = vadd.f32 %v1274_v40, %v1256_v38 }
 0x123   :  { %v1293_v43 = vmul.f32 %v1292_v41, %v1290_v22 }
 0x125   :  { %v1294_v44 = vadd.f32 %v1293_v43, %v1275_v42 }
 0x127   :  { %1295 = vst [vmem:[#allocation11] sm:$0xff] %v1294_v44 }
 0x128   :  { %1712 = shalt.err (!%p1709_p13)
}
 0x129   :  { %s1713_s18 = scalar_lea.hbm %s2958_s5, 128 }
 0x12a   :  { %p1714_p0 = scmp.ne.s32.totalorder %s2958_s5, %s1713_s18  ;;  %p1717_p1 = scmp.lt.u32.totalorder %s1713_s18, %s2958_s5 }
 0x12c   :  { %p1719_p2 = pnand %p1717_p1, %p1714_p0 }
 0x12e   :  { %1722 = shalt.err (!%p1719_p2)
}
 0x12f   :  { %1305 = dma.vmem_to_hbm [thread:$0]  %s1303_s14, 128, %s2958_s5, [#allocation5]  }
 0x130   :  { %1729 = dma.done.wait [#allocation5], 128  }
 0x131   :  { %1730 = vsyncadd [#allocation5], 4294967168 }
 0x132   :  { %1309 = vsyncpa [#allocation4], 1 }
 0x133   :  { %1310 = vsyncpa [#allocation5], 1 }
 0x134   :  { %1311 = vsyncpa [#allocation6], 1 }
 0x135   :  { %1312 = vsyncpa [#allocation9], 1 }

</bundles_post_ra>
